<compile_context>
chip_gen: v7x
topology: tpu7x:2x2x1
jax: 0.10.0
libtpu: 0.0.40
codegen_flags: <defaults>
</compile_context>

<pallas_src>
import functools
import math

import jax
import jax.numpy as jnp
from jax.experimental import pallas as pl
from jax.experimental.pallas import tpu as pltpu


# ----------------------------- helpers (traced inside the kernel) ----------

def _layernorm(x, g, b, eps=1e-5):
    # x: (T, C) f32, g/b: (1, C) f32
    mu = jnp.mean(x, axis=-1, keepdims=True)
    var = jnp.mean((x - mu) ** 2, axis=-1, keepdims=True)
    return (x - mu) * jax.lax.rsqrt(var + eps) * g + b


def _gelu_tanh(x):
    # matches torch.nn.GELU(approximate='tanh')
    c = math.sqrt(2.0 / math.pi)
    return 0.5 * x * (1.0 + jnp.tanh(c * (x + 0.044715 * x * x * x)))


# ----------------------------- the Pallas kernel ----------------------------

def block_kernel(x_ref,
                 ln1_g_ref, ln1_b_ref,
                 w_attn_ref, b_attn_ref,
                 w_aproj_ref, b_aproj_ref,
                 ln2_g_ref, ln2_b_ref,
                 w_fc_ref, b_fc_ref,
                 w_mproj_ref, b_mproj_ref,
                 o_ref,
                 *, n_head):
    cdt = jnp.bfloat16                       # MXU operand dtype
    x = x_ref[0].astype(jnp.float32)         # (T, C) tile for this batch elem
    T, C = x.shape
    hd = C // n_head
    scale = 1.0 / math.sqrt(hd)

    # Additive causal mask bias: 0 where key <= query, -1e30 elsewhere (f32).
    qi = jax.lax.broadcasted_iota(jnp.int32, (T, T), 0)
    kj = jax.lax.broadcasted_iota(jnp.int32, (T, T), 1)
    mask_bias = jnp.where(kj <= qi, 0.0, -1e30).astype(jnp.float32)

    # ---------------- attention branch: y = c_proj(softmax(qk^T)v) ----------
    h = _layernorm(x, ln1_g_ref[...], ln1_b_ref[...])                 # f32
    qkv = jnp.dot(h.astype(cdt), w_attn_ref[...],
                  preferred_element_type=jnp.float32) + b_attn_ref[...]  # (T, 3C)

    # Split heads once; batched einsum over all heads (no per-head loop/concat).
    q = (qkv[:, :C] * scale).reshape(T, n_head, hd).swapaxes(0, 1)    # (H, T, hd)
    k = qkv[:, C:2 * C].reshape(T, n_head, hd).swapaxes(0, 1)         # (H, T, hd)
    v = qkv[:, 2 * C:].reshape(T, n_head, hd).swapaxes(0, 1)          # (H, T, hd)

    att = jnp.einsum('hqd,hkd->hqk', q.astype(cdt), k.astype(cdt),
                     preferred_element_type=jnp.float32)              # (H, T, T)
    att = att + mask_bias[None, :, :]

    # softmax in f32, EUP reciprocal instead of a divide
    m = jnp.max(att, axis=-1, keepdims=True)
    e = jnp.exp(att - m)
    p = e * pl.reciprocal(jnp.sum(e, axis=-1, keepdims=True), approx=True)

    yh = jnp.einsum('hqk,hkd->hqd', p.astype(cdt), v.astype(cdt),
                    preferred_element_type=jnp.float32)               # (H, T, hd)
    y = yh.swapaxes(0, 1).reshape(T, C)                               # (T, C)

    y = jnp.dot(y.astype(cdt), w_aproj_ref[...],
                preferred_element_type=jnp.float32) + b_aproj_ref[...]
    x1 = x + y                                                        # residual 1

    # ---------------- MLP branch: c_proj(gelu_tanh(c_fc(ln2(x)))) -----------
    h2 = _layernorm(x1, ln2_g_ref[...], ln2_b_ref[...])
    hfc = jnp.dot(h2.astype(cdt), w_fc_ref[...],
                  preferred_element_type=jnp.float32) + b_fc_ref[...]  # (T, 4C)
    hfc = _gelu_tanh(hfc)
    mlp = jnp.dot(hfc.astype(cdt), w_mproj_ref[...],
                  preferred_element_type=jnp.float32) + b_mproj_ref[...]  # (T, C)

    o_ref[0] = (x1 + mlp).astype(o_ref.dtype)                         # residual 2


# ----------------------------- wrapper --------------------------------------

def block_forward(x, params, n_head):
    """x: (B, T, C) float32.  params: list of 2-D f32 arrays (see _init_params)."""
    B, T, C = x.shape
    (ln1_g, ln1_b, w_attn, b_attn, w_aproj, b_aproj,
     ln2_g, ln2_b, w_fc, b_fc, w_mproj, b_mproj) = params

    # Weights go to the kernel as bf16 (MXU-native, halves HBM/VMEM residency);
    # biases & LayerNorm params stay f32 (added to f32 accumulators).
    kparams = [ln1_g, ln1_b,
               w_attn.astype(jnp.bfloat16), b_attn,
               w_aproj.astype(jnp.bfloat16), b_aproj,
               ln2_g, ln2_b,
               w_fc.astype(jnp.bfloat16), b_fc,
               w_mproj.astype(jnp.bfloat16), b_mproj]

    def _full2d(arr):
        # Whole array resident, same block for every grid step.
        return pl.BlockSpec(arr.shape, lambda b: (0, 0))

    in_specs = [pl.BlockSpec((1, T, C), lambda b: (b, 0, 0))]
    in_specs += [_full2d(p) for p in kparams]

    kernel = functools.partial(block_kernel, n_head=n_head)

    return pl.pallas_call(
        kernel,
        out_shape=jax.ShapeDtypeStruct((B, T, C), x.dtype),
        grid_spec=pltpu.PrefetchScalarGridSpec(
            num_scalar_prefetch=0,
            grid=(B,),
            in_specs=in_specs,
            out_specs=pl.BlockSpec((1, T, C), lambda b: (b, 0, 0)),
        ),
        compiler_params=pltpu.CompilerParams(
            dimension_semantics=("parallel",),
            vmem_limit_bytes=32 * 1024 * 1024),
    )(x, *kparams)


# ----------------------------- parameter init -------------------------------

def _init_params(key, n_embed):
    C = n_embed
    ks = jax.random.split(key, 8)
    std = 0.02
    # weights stored (in, out) so kernel computes x @ W + b
    ln1_g = jnp.ones((1, C), jnp.float32)
    ln1_b = jnp.zeros((1, C), jnp.float32)
    w_attn = jax.random.normal(ks[0], (C, 3 * C), jnp.float32) * std
    b_attn = jax.random.normal(ks[1], (1, 3 * C), jnp.float32) * std
    w_aproj = jax.random.normal(ks[2], (C, C), jnp.float32) * std
    b_aproj = jax.random.normal(ks[3], (1, C), jnp.float32) * std
    ln2_g = jnp.ones((1, C), jnp.float32)
    ln2_b = jnp.zeros((1, C), jnp.float32)
    w_fc = jax.random.normal(ks[4], (C, 4 * C), jnp.float32) * std
    b_fc = jax.random.normal(ks[5], (1, 4 * C), jnp.float32) * std
    w_mproj = jax.random.normal(ks[6], (4 * C, C), jnp.float32) * std
    b_mproj = jax.random.normal(ks[7], (1, C), jnp.float32) * std
    return [ln1_g, ln1_b, w_attn, b_attn, w_aproj, b_aproj,
            ln2_g, ln2_b, w_fc, b_fc, w_mproj, b_mproj]


# ----------------------------- pure-JAX f32 reference ------------------------

def _ref_block(x, params, n_head):
    (ln1_g, ln1_b, w_attn, b_attn, w_aproj, b_aproj,
     ln2_g, ln2_b, w_fc, b_fc, w_mproj, b_mproj) = params
    B, T, C = x.shape
    hd = C // n_head

    def ln(v, g, b):
        mu = jnp.mean(v, -1, keepdims=True)
        var = jnp.mean((v - mu) ** 2, -1, keepdims=True)
        return (v - mu) * jax.lax.rsqrt(var + 1e-5) * g + b

    h = ln(x, ln1_g, ln1_b)
    qkv = h @ w_attn + b_attn
    q, k, v = jnp.split(qkv, 3, axis=-1)
    q = q.reshape(B, T, n_head, hd).transpose(0, 2, 1, 3)
    k = k.reshape(B, T, n_head, hd).transpose(0, 2, 1, 3)
    v = v.reshape(B, T, n_head, hd).transpose(0, 2, 1, 3)
    att = (q @ jnp.swapaxes(k, -2, -1)) / math.sqrt(hd)
    mask = jnp.tril(jnp.ones((T, T), bool))
    att = jnp.where(mask, att, -jnp.inf)
    att = jax.nn.softmax(att, axis=-1)
    y = (att @ v).transpose(0, 2, 1, 3).reshape(B, T, C)
    x1 = x + (y @ w_aproj + b_aproj)
    h2 = ln(x1, ln2_g, ln2_b)
    hfc = h2 @ w_fc + b_fc
    c = math.sqrt(2.0 / math.pi)
    hfc = 0.5 * hfc * (1.0 + jnp.tanh(c * (hfc + 0.044715 * hfc ** 3)))
    return x1 + (hfc @ w_mproj + b_mproj)


# ----------------------------- main ------------------------------------------

if __name__ == "__main__":
    # Small GPT config (lane-dense: C is a multiple of 128).
    B, T, C, n_head = 2, 32, 128, 4

    key = jax.random.PRNGKey(0)
    kx, kp = jax.random.split(key)
    x = jax.random.normal(kx, (B, T, C), jnp.float32)
    params = _init_params(kp, C)

    out = jax.block_until_ready(block_forward(x, params, n_head))
    ref = _ref_block(x, params, n_head)

    assert out.shape == (B, T, C)
    # bf16 matmul operands + approx reciprocal vs. full-f32 reference.
    assert jnp.allclose(out, ref, rtol=2e-2, atol=2e-2), (
        f"mismatch vs reference, max|err|={float(jnp.max(jnp.abs(out - ref)))}")

    print("KERNEL_OK")
</pallas_src>

<mosaic_0001>
module attributes {stable_mosaic.version = 11 : i64} {
  func.func @block_kernel(%arg0: i32, %arg1: memref<1x32x128xf32, #tpu.memory_space<vmem>>, %arg2: memref<1x128xf32, #tpu.memory_space<vmem>>, %arg3: memref<1x128xf32, #tpu.memory_space<vmem>>, %arg4: memref<128x384xbf16, #tpu.memory_space<vmem>>, %arg5: memref<1x384xf32, #tpu.memory_space<vmem>>, %arg6: memref<128x128xbf16, #tpu.memory_space<vmem>>, %arg7: memref<1x128xf32, #tpu.memory_space<vmem>>, %arg8: memref<1x128xf32, #tpu.memory_space<vmem>>, %arg9: memref<1x128xf32, #tpu.memory_space<vmem>>, %arg10: memref<128x512xbf16, #tpu.memory_space<vmem>>, %arg11: memref<1x512xf32, #tpu.memory_space<vmem>>, %arg12: memref<512x128xbf16, #tpu.memory_space<vmem>>, %arg13: memref<1x128xf32, #tpu.memory_space<vmem>>, %arg14: memref<1x32x128xf32, #tpu.memory_space<vmem>>) attributes {dimension_semantics = [#tpu.dimension_semantics<parallel>], iteration_bounds = array<i64: 2>, scalar_prefetch = 0 : i64, scratch_operands = 0 : i64, tpu.core_type = #tpu.core_type<tc>, window_params = [{transform_indices = @transform_0, window_bounds = array<i64: 1, 32, 128>}, {pipeline_mode = #tpu.pipeline_mode<synchronous>, transform_indices = @transform_1, window_bounds = array<i64: 1, 128>}, {pipeline_mode = #tpu.pipeline_mode<synchronous>, transform_indices = @transform_2, window_bounds = array<i64: 1, 128>}, {pipeline_mode = #tpu.pipeline_mode<synchronous>, transform_indices = @transform_3, window_bounds = array<i64: 128, 384>}, {pipeline_mode = #tpu.pipeline_mode<synchronous>, transform_indices = @transform_4, window_bounds = array<i64: 1, 384>}, {pipeline_mode = #tpu.pipeline_mode<synchronous>, transform_indices = @transform_5, window_bounds = array<i64: 128, 128>}, {pipeline_mode = #tpu.pipeline_mode<synchronous>, transform_indices = @transform_6, window_bounds = array<i64: 1, 128>}, {pipeline_mode = #tpu.pipeline_mode<synchronous>, transform_indices = @transform_7, window_bounds = array<i64: 1, 128>}, {pipeline_mode = #tpu.pipeline_mode<synchronous>, transform_indices = @transform_8, window_bounds = array<i64: 1, 128>}, {pipeline_mode = #tpu.pipeline_mode<synchronous>, transform_indices = @transform_9, window_bounds = array<i64: 128, 512>}, {pipeline_mode = #tpu.pipeline_mode<synchronous>, transform_indices = @transform_10, window_bounds = array<i64: 1, 512>}, {pipeline_mode = #tpu.pipeline_mode<synchronous>, transform_indices = @transform_11, window_bounds = array<i64: 512, 128>}, {pipeline_mode = #tpu.pipeline_mode<synchronous>, transform_indices = @transform_12, window_bounds = array<i64: 1, 128>}, {transform_indices = @transform_13, window_bounds = array<i64: 1, 32, 128>}]} {
    %c0 = arith.constant 0 : index
    %c0_0 = arith.constant 0 : index
    %c0_1 = arith.constant 0 : index
    %0 = vector.load %arg1[%c0, %c0_0, %c0_1] : memref<1x32x128xf32, #tpu.memory_space<vmem>>, vector<1x32x128xf32>
    %1 = vector.shape_cast %0 : vector<1x32x128xf32> to vector<32x128xf32>
    %2 = tpu.iota {dimensions = array<i32: 0>} : vector<32x32xi32>
    %3 = tpu.iota {dimensions = array<i32: 1>} : vector<32x32xi32>
    %4 = arith.cmpi sle, %3, %2 : vector<32x32xi32>
    %cst = arith.constant 0.000000e+00 : f32
    %cst_2 = arith.constant -1.000000e+30 : f32
    %5 = vector.broadcast %cst : f32 to vector<32x32xf32>
    %6 = vector.broadcast %cst_2 : f32 to vector<32x32xf32>
    %7 = arith.select %4, %5, %6 : vector<32x32xi1>, vector<32x32xf32>
    %c0_3 = arith.constant 0 : index
    %c0_4 = arith.constant 0 : index
    %8 = vector.load %arg2[%c0_3, %c0_4] : memref<1x128xf32, #tpu.memory_space<vmem>>, vector<1x128xf32>
    %c0_5 = arith.constant 0 : index
    %c0_6 = arith.constant 0 : index
    %9 = vector.load %arg3[%c0_5, %c0_6] : memref<1x128xf32, #tpu.memory_space<vmem>>, vector<1x128xf32>
    %cst_7 = arith.constant dense<0.000000e+00> : vector<32xf32>
    %10 = vector.multi_reduction <add>, %1, %cst_7 [1] : vector<32x128xf32> to vector<32xf32>
    %11 = vector.shape_cast %10 : vector<32xf32> to vector<32x1xf32>
    %cst_8 = arith.constant 1.280000e+02 : f32
    %12 = vector.broadcast %cst_8 : f32 to vector<32x1xf32>
    %13 = arith.divf %11, %12 : vector<32x1xf32>
    %14 = vector.broadcast %13 : vector<32x1xf32> to vector<32x128xf32>
    %15 = arith.subf %1, %14 : vector<32x128xf32>
    %16 = arith.mulf %15, %15 : vector<32x128xf32>
    %cst_9 = arith.constant dense<0.000000e+00> : vector<32xf32>
    %17 = vector.multi_reduction <add>, %16, %cst_9 [1] : vector<32x128xf32> to vector<32xf32>
    %18 = vector.shape_cast %17 : vector<32xf32> to vector<32x1xf32>
    %cst_10 = arith.constant 1.280000e+02 : f32
    %19 = vector.broadcast %cst_10 : f32 to vector<32x1xf32>
    %20 = arith.divf %18, %19 : vector<32x1xf32>
    %21 = vector.broadcast %13 : vector<32x1xf32> to vector<32x128xf32>
    %22 = arith.subf %1, %21 : vector<32x128xf32>
    %cst_11 = arith.constant 9.99999974E-6 : f32
    %23 = vector.broadcast %cst_11 : f32 to vector<32x1xf32>
    %24 = arith.addf %20, %23 : vector<32x1xf32>
    %25 = math.rsqrt %24 : vector<32x1xf32>
    %26 = vector.broadcast %25 : vector<32x1xf32> to vector<32x128xf32>
    %27 = arith.mulf %22, %26 : vector<32x128xf32>
    %28 = vector.broadcast %8 : vector<1x128xf32> to vector<32x128xf32>
    %29 = arith.mulf %27, %28 : vector<32x128xf32>
    %30 = vector.broadcast %9 : vector<1x128xf32> to vector<32x128xf32>
    %31 = arith.addf %29, %30 : vector<32x128xf32>
    %32 = arith.truncf %31 : vector<32x128xf32> to vector<32x128xbf16>
    %c0_12 = arith.constant 0 : index
    %c0_13 = arith.constant 0 : index
    %33 = vector.load %arg4[%c0_12, %c0_13] : memref<128x384xbf16, #tpu.memory_space<vmem>>, vector<128x384xbf16>
    %cst_14 = arith.constant dense<0.000000e+00> : vector<32x384xf32>
    %34 = tpu.matmul %32, %33, %cst_14 {dimension_numbers = #tpu.dot_dimension_numbers<[1], [0], [0], [1], [0, 0, 1, 1], [], []>} : vector<32x128xbf16>, vector<128x384xbf16>, vector<32x384xf32> -> vector<32x384xf32>
    %c0_15 = arith.constant 0 : index
    %c0_16 = arith.constant 0 : index
    %35 = vector.load %arg5[%c0_15, %c0_16] : memref<1x384xf32, #tpu.memory_space<vmem>>, vector<1x384xf32>
    %36 = vector.broadcast %35 : vector<1x384xf32> to vector<32x384xf32>
    %37 = arith.addf %34, %36 : vector<32x384xf32>
    %38 = vector.extract_strided_slice %37 {offsets = [0, 0], sizes = [32, 128], strides = [1, 1]} : vector<32x384xf32> to vector<32x128xf32>
    %cst_17 = arith.constant 0.176776692 : f32
    %39 = vector.broadcast %cst_17 : f32 to vector<32x128xf32>
    %40 = arith.mulf %38, %39 : vector<32x128xf32>
    %41 = vector.shape_cast %40 : vector<32x128xf32> to vector<32x4x32xf32>
    %42 = tpu.transpose %41, [1, 0, 2] : vector<32x4x32xf32> -> vector<4x32x32xf32>
    %43 = vector.extract_strided_slice %37 {offsets = [0, 128], sizes = [32, 128], strides = [1, 1]} : vector<32x384xf32> to vector<32x128xf32>
    %44 = vector.shape_cast %43 : vector<32x128xf32> to vector<32x4x32xf32>
    %45 = tpu.transpose %44, [1, 0, 2] : vector<32x4x32xf32> -> vector<4x32x32xf32>
    %46 = vector.extract_strided_slice %37 {offsets = [0, 256], sizes = [32, 128], strides = [1, 1]} : vector<32x384xf32> to vector<32x128xf32>
    %47 = vector.shape_cast %46 : vector<32x128xf32> to vector<32x4x32xf32>
    %48 = tpu.transpose %47, [1, 0, 2] : vector<32x4x32xf32> -> vector<4x32x32xf32>
    %49 = arith.truncf %42 : vector<4x32x32xf32> to vector<4x32x32xbf16>
    %50 = arith.truncf %45 : vector<4x32x32xf32> to vector<4x32x32xbf16>
    "tpu.trace_start"() <{level = 10 : i32, message = "hqd,hkd->hqk"}> : () -> ()
    %cst_18 = arith.constant dense<0.000000e+00> : vector<4x32x32xf32>
    %51 = tpu.matmul %49, %50, %cst_18 {dimension_numbers = #tpu.dot_dimension_numbers<[2], [2], [1], [1], [0, 0, 0, 1, 1, 1], [0], [0]>} : vector<4x32x32xbf16>, vector<4x32x32xbf16>, vector<4x32x32xf32> -> vector<4x32x32xf32>
    "tpu.trace_stop"() : () -> ()
    %52 = vector.shape_cast %7 : vector<32x32xf32> to vector<1x32x32xf32>
    %53 = vector.broadcast %52 : vector<1x32x32xf32> to vector<4x32x32xf32>
    %54 = arith.addf %51, %53 : vector<4x32x32xf32>
    %cst_19 = arith.constant dense<0xFF800000> : vector<4x32xf32>
    %55 = vector.multi_reduction <maximumf>, %54, %cst_19 [2] : vector<4x32x32xf32> to vector<4x32xf32>
    %56 = vector.shape_cast %55 : vector<4x32xf32> to vector<4x32x1xf32>
    %57 = vector.broadcast %56 : vector<4x32x1xf32> to vector<4x32x32xf32>
    %58 = arith.subf %54, %57 : vector<4x32x32xf32>
    %59 = math.exp %58 : vector<4x32x32xf32>
    %cst_20 = arith.constant dense<0.000000e+00> : vector<4x32xf32>
    %60 = vector.multi_reduction <add>, %59, %cst_20 [2] : vector<4x32x32xf32> to vector<4x32xf32>
    %61 = vector.shape_cast %60 : vector<4x32xf32> to vector<4x32x1xf32>
    %62 = tpu.reciprocal %61 {approx = true} : vector<4x32x1xf32> -> vector<4x32x1xf32>
    %63 = vector.broadcast %62 : vector<4x32x1xf32> to vector<4x32x32xf32>
    %64 = arith.mulf %59, %63 : vector<4x32x32xf32>
    %65 = arith.truncf %64 : vector<4x32x32xf32> to vector<4x32x32xbf16>
    %66 = arith.truncf %48 : vector<4x32x32xf32> to vector<4x32x32xbf16>
    "tpu.trace_start"() <{level = 10 : i32, message = "hqk,hkd->hqd"}> : () -> ()
    %cst_21 = arith.constant dense<0.000000e+00> : vector<4x32x32xf32>
    %67 = tpu.matmul %65, %66, %cst_21 {dimension_numbers = #tpu.dot_dimension_numbers<[2], [1], [1], [2], [0, 0, 0, 1, 1, 2], [0], [0]>} : vector<4x32x32xbf16>, vector<4x32x32xbf16>, vector<4x32x32xf32> -> vector<4x32x32xf32>
    "tpu.trace_stop"() : () -> ()
    %68 = tpu.transpose %67, [1, 0, 2] : vector<4x32x32xf32> -> vector<32x4x32xf32>
    %69 = vector.shape_cast %68 : vector<32x4x32xf32> to vector<32x128xf32>
    %70 = arith.truncf %69 : vector<32x128xf32> to vector<32x128xbf16>
    %c0_22 = arith.constant 0 : index
    %c0_23 = arith.constant 0 : index
    %71 = vector.load %arg6[%c0_22, %c0_23] : memref<128x128xbf16, #tpu.memory_space<vmem>>, vector<128x128xbf16>
    %cst_24 = arith.constant dense<0.000000e+00> : vector<32x128xf32>
    %72 = tpu.matmul %70, %71, %cst_24 {dimension_numbers = #tpu.dot_dimension_numbers<[1], [0], [0], [1], [0, 0, 1, 1], [], []>} : vector<32x128xbf16>, vector<128x128xbf16>, vector<32x128xf32> -> vector<32x128xf32>
    %c0_25 = arith.constant 0 : index
    %c0_26 = arith.constant 0 : index
    %73 = vector.load %arg7[%c0_25, %c0_26] : memref<1x128xf32, #tpu.memory_space<vmem>>, vector<1x128xf32>
    %74 = vector.broadcast %73 : vector<1x128xf32> to vector<32x128xf32>
    %75 = arith.addf %72, %74 : vector<32x128xf32>
    %76 = arith.addf %1, %75 : vector<32x128xf32>
    %c0_27 = arith.constant 0 : index
    %c0_28 = arith.constant 0 : index
    %77 = vector.load %arg8[%c0_27, %c0_28] : memref<1x128xf32, #tpu.memory_space<vmem>>, vector<1x128xf32>
    %c0_29 = arith.constant 0 : index
    %c0_30 = arith.constant 0 : index
    %78 = vector.load %arg9[%c0_29, %c0_30] : memref<1x128xf32, #tpu.memory_space<vmem>>, vector<1x128xf32>
    %cst_31 = arith.constant dense<0.000000e+00> : vector<32xf32>
    %79 = vector.multi_reduction <add>, %76, %cst_31 [1] : vector<32x128xf32> to vector<32xf32>
    %80 = vector.shape_cast %79 : vector<32xf32> to vector<32x1xf32>
    %cst_32 = arith.constant 1.280000e+02 : f32
    %81 = vector.broadcast %cst_32 : f32 to vector<32x1xf32>
    %82 = arith.divf %80, %81 : vector<32x1xf32>
    %83 = vector.broadcast %82 : vector<32x1xf32> to vector<32x128xf32>
    %84 = arith.subf %76, %83 : vector<32x128xf32>
    %85 = arith.mulf %84, %84 : vector<32x128xf32>
    %cst_33 = arith.constant dense<0.000000e+00> : vector<32xf32>
    %86 = vector.multi_reduction <add>, %85, %cst_33 [1] : vector<32x128xf32> to vector<32xf32>
    %87 = vector.shape_cast %86 : vector<32xf32> to vector<32x1xf32>
    %cst_34 = arith.constant 1.280000e+02 : f32
    %88 = vector.broadcast %cst_34 : f32 to vector<32x1xf32>
    %89 = arith.divf %87, %88 : vector<32x1xf32>
    %90 = vector.broadcast %82 : vector<32x1xf32> to vector<32x128xf32>
    %91 = arith.subf %76, %90 : vector<32x128xf32>
    %cst_35 = arith.constant 9.99999974E-6 : f32
    %92 = vector.broadcast %cst_35 : f32 to vector<32x1xf32>
    %93 = arith.addf %89, %92 : vector<32x1xf32>
    %94 = math.rsqrt %93 : vector<32x1xf32>
    %95 = vector.broadcast %94 : vector<32x1xf32> to vector<32x128xf32>
    %96 = arith.mulf %91, %95 : vector<32x128xf32>
    %97 = vector.broadcast %77 : vector<1x128xf32> to vector<32x128xf32>
    %98 = arith.mulf %96, %97 : vector<32x128xf32>
    %99 = vector.broadcast %78 : vector<1x128xf32> to vector<32x128xf32>
    %100 = arith.addf %98, %99 : vector<32x128xf32>
    %101 = arith.truncf %100 : vector<32x128xf32> to vector<32x128xbf16>
    %c0_36 = arith.constant 0 : index
    %c0_37 = arith.constant 0 : index
    %102 = vector.load %arg10[%c0_36, %c0_37] : memref<128x512xbf16, #tpu.memory_space<vmem>>, vector<128x512xbf16>
    %cst_38 = arith.constant dense<0.000000e+00> : vector<32x512xf32>
    %103 = tpu.matmul %101, %102, %cst_38 {dimension_numbers = #tpu.dot_dimension_numbers<[1], [0], [0], [1], [0, 0, 1, 1], [], []>} : vector<32x128xbf16>, vector<128x512xbf16>, vector<32x512xf32> -> vector<32x512xf32>
    %c0_39 = arith.constant 0 : index
    %c0_40 = arith.constant 0 : index
    %104 = vector.load %arg11[%c0_39, %c0_40] : memref<1x512xf32, #tpu.memory_space<vmem>>, vector<1x512xf32>
    %105 = vector.broadcast %104 : vector<1x512xf32> to vector<32x512xf32>
    %106 = arith.addf %103, %105 : vector<32x512xf32>
    %cst_41 = arith.constant 5.000000e-01 : f32
    %107 = vector.broadcast %cst_41 : f32 to vector<32x512xf32>
    %108 = arith.mulf %107, %106 : vector<32x512xf32>
    %cst_42 = arith.constant 4.471500e-02 : f32
    %109 = vector.broadcast %cst_42 : f32 to vector<32x512xf32>
    %110 = arith.mulf %109, %106 : vector<32x512xf32>
    %111 = arith.mulf %110, %106 : vector<32x512xf32>
    %112 = arith.mulf %111, %106 : vector<32x512xf32>
    %113 = arith.addf %106, %112 : vector<32x512xf32>
    %cst_43 = arith.constant 0.797884583 : f32
    %114 = vector.broadcast %cst_43 : f32 to vector<32x512xf32>
    %115 = arith.mulf %114, %113 : vector<32x512xf32>
    %116 = math.tanh %115 : vector<32x512xf32>
    %cst_44 = arith.constant 1.000000e+00 : f32
    %117 = vector.broadcast %cst_44 : f32 to vector<32x512xf32>
    %118 = arith.addf %117, %116 : vector<32x512xf32>
    %119 = arith.mulf %108, %118 : vector<32x512xf32>
    %120 = arith.truncf %119 : vector<32x512xf32> to vector<32x512xbf16>
    %c0_45 = arith.constant 0 : index
    %c0_46 = arith.constant 0 : index
    %121 = vector.load %arg12[%c0_45, %c0_46] : memref<512x128xbf16, #tpu.memory_space<vmem>>, vector<512x128xbf16>
    %cst_47 = arith.constant dense<0.000000e+00> : vector<32x128xf32>
    %122 = tpu.matmul %120, %121, %cst_47 {dimension_numbers = #tpu.dot_dimension_numbers<[1], [0], [0], [1], [0, 0, 1, 1], [], []>} : vector<32x512xbf16>, vector<512x128xbf16>, vector<32x128xf32> -> vector<32x128xf32>
    %c0_48 = arith.constant 0 : index
    %c0_49 = arith.constant 0 : index
    %123 = vector.load %arg13[%c0_48, %c0_49] : memref<1x128xf32, #tpu.memory_space<vmem>>, vector<1x128xf32>
    %124 = vector.broadcast %123 : vector<1x128xf32> to vector<32x128xf32>
    %125 = arith.addf %122, %124 : vector<32x128xf32>
    %126 = arith.addf %76, %125 : vector<32x128xf32>
    %c0_50 = arith.constant 0 : index
    %c0_51 = arith.constant 0 : index
    %c0_52 = arith.constant 0 : index
    %127 = vector.load %arg14[%c0_50, %c0_51, %c0_52] : memref<1x32x128xf32, #tpu.memory_space<vmem>>, vector<1x32x128xf32>
    %128 = vector.shape_cast %127 : vector<1x32x128xf32> to vector<32x128xf32>
    %129 = vector.shape_cast %126 : vector<32x128xf32> to vector<1x32x128xf32>
    tpu.vector_store %arg14[%c0_50, %c0_51, %c0_52], %129 {strides = array<i32>} : memref<1x32x128xf32, #tpu.memory_space<vmem>>, vector<1x32x128xf32>,
    return
  }
  func.func @transform_0(%arg0: i32) -> (i32, i32, i32) {
    %c0_i32 = arith.constant 0 : i32
    %c0_i32_0 = arith.constant 0 : i32
    %c0_i32_1 = arith.constant 0 : i32
    return %arg0, %c0_i32, %c0_i32_0 : i32, i32, i32
  }
  func.func @transform_1(%arg0: i32) -> (i32, i32) {
    %c0_i32 = arith.constant 0 : i32
    %c0_i32_0 = arith.constant 0 : i32
    %c0_i32_1 = arith.constant 0 : i32
    return %c0_i32, %c0_i32_0 : i32, i32
  }
  func.func @transform_2(%arg0: i32) -> (i32, i32) {
    %c0_i32 = arith.constant 0 : i32
    %c0_i32_0 = arith.constant 0 : i32
    %c0_i32_1 = arith.constant 0 : i32
    return %c0_i32, %c0_i32_0 : i32, i32
  }
  func.func @transform_3(%arg0: i32) -> (i32, i32) {
    %c0_i32 = arith.constant 0 : i32
    %c0_i32_0 = arith.constant 0 : i32
    %c0_i32_1 = arith.constant 0 : i32
    return %c0_i32, %c0_i32_0 : i32, i32
  }
  func.func @transform_4(%arg0: i32) -> (i32, i32) {
    %c0_i32 = arith.constant 0 : i32
    %c0_i32_0 = arith.constant 0 : i32
    %c0_i32_1 = arith.constant 0 : i32
    return %c0_i32, %c0_i32_0 : i32, i32
  }
  func.func @transform_5(%arg0: i32) -> (i32, i32) {
    %c0_i32 = arith.constant 0 : i32
    %c0_i32_0 = arith.constant 0 : i32
    %c0_i32_1 = arith.constant 0 : i32
    return %c0_i32, %c0_i32_0 : i32, i32
  }
  func.func @transform_6(%arg0: i32) -> (i32, i32) {
    %c0_i32 = arith.constant 0 : i32
    %c0_i32_0 = arith.constant 0 : i32
    %c0_i32_1 = arith.constant 0 : i32
    return %c0_i32, %c0_i32_0 : i32, i32
  }
  func.func @transform_7(%arg0: i32) -> (i32, i32) {
    %c0_i32 = arith.constant 0 : i32
    %c0_i32_0 = arith.constant 0 : i32
    %c0_i32_1 = arith.constant 0 : i32
    return %c0_i32, %c0_i32_0 : i32, i32
  }
  func.func @transform_8(%arg0: i32) -> (i32, i32) {
    %c0_i32 = arith.constant 0 : i32
    %c0_i32_0 = arith.constant 0 : i32
    %c0_i32_1 = arith.constant 0 : i32
    return %c0_i32, %c0_i32_0 : i32, i32
  }
  func.func @transform_9(%arg0: i32) -> (i32, i32) {
    %c0_i32 = arith.constant 0 : i32
    %c0_i32_0 = arith.constant 0 : i32
    %c0_i32_1 = arith.constant 0 : i32
    return %c0_i32, %c0_i32_0 : i32, i32
  }
  func.func @transform_10(%arg0: i32) -> (i32, i32) {
    %c0_i32 = arith.constant 0 : i32
    %c0_i32_0 = arith.constant 0 : i32
    %c0_i32_1 = arith.constant 0 : i32
    return %c0_i32, %c0_i32_0 : i32, i32
  }
  func.func @transform_11(%arg0: i32) -> (i32, i32) {
    %c0_i32 = arith.constant 0 : i32
    %c0_i32_0 = arith.constant 0 : i32
    %c0_i32_1 = arith.constant 0 : i32
    return %c0_i32, %c0_i32_0 : i32, i32
  }
  func.func @transform_12(%arg0: i32) -> (i32, i32) {
    %c0_i32 = arith.constant 0 : i32
    %c0_i32_0 = arith.constant 0 : i32
    %c0_i32_1 = arith.constant 0 : i32
    return %c0_i32, %c0_i32_0 : i32, i32
  }
  func.func @transform_13(%arg0: i32) -> (i32, i32, i32) {
    %c0_i32 = arith.constant 0 : i32
    %c0_i32_0 = arith.constant 0 : i32
    %c0_i32_1 = arith.constant 0 : i32
    return %arg0, %c0_i32, %c0_i32_0 : i32, i32, i32
  }
}

</mosaic_0001>

<bundles_post_ra>
// kernel: tpu_custom_call.1
= control target key start
LH: loop header
LB: loop body
LE: loop exit
PB: predicated region body
PF: predicated region fallthrough
CT: control target
= control target key end

     0   :  { %s7742_s0 = inlined_call_operand.hbm [shape: f32[2,32,128], index: 0, kind: input, shape index: {}]   ;;  %s7743_s1 = inlined_call_operand.hbm [shape: f32[1,128], index: 1, kind: input, shape index: {}]   ;;  %s7744_s2 = inlined_call_operand.hbm [shape: f32[1,128], index: 2, kind: input, shape index: {}]   ;;  %s7745_s3 = inlined_call_operand.hbm [shape: bf16[128,384], index: 3, kind: input, shape index: {}]   ;;  %s7746_s4 = inlined_call_operand.vmem [shape: f32[1,384], index: 4, kind: input, shape index: {}]   ;;  %s7747_s5 = inlined_call_operand.hbm [shape: bf16[128,128], index: 5, kind: input, shape index: {}]   ;;  %s7748_s6 = inlined_call_operand.vmem [shape: f32[1,128], index: 6, kind: input, shape index: {}]   ;;  %s7749_s7 = inlined_call_operand.vmem [shape: f32[1,128], index: 7, kind: input, shape index: {}]   ;;  %s7750_s8 = inlined_call_operand.vmem [shape: f32[1,128], index: 8, kind: input, shape index: {}]   ;;  %s7751_s9 = inlined_call_operand.hbm [shape: bf16[128,512], index: 9, kind: input, shape index: {}]   ;;  %s7752_s10 = inlined_call_operand.vmem [shape: f32[1,512], index: 10, kind: input, shape index: {}]   ;;  %s7753_s11 = inlined_call_operand.hbm [shape: bf16[512,128], index: 11, kind: input, shape index: {}]   ;;  %s7754_s12 = inlined_call_operand.vmem [shape: f32[1,128], index: 12, kind: input, shape index: {}]   ;;  %s7755_s13 = inlined_call_operand.hbm [shape: f32[2,32,128], index: 13, kind: output, shape index: {}]  }
   0x1   :  { %7760 = sst [smem:[#allocation20_spill]] %s7743_s1 }
   0x2   :  { %7761 = sst [smem:[#allocation21_spill]] %s7745_s3 }
   0x3   :  { %7762 = sst [smem:[#allocation22_spill]] %s7749_s7 }
   0x4   :  { %7763 = sst [smem:[#allocation23_spill]] %s7750_s8 }
   0x5   :  { %7764 = sst [smem:[#allocation24_spill]] %s7752_s10 }
   0x6   :  { %7765 = sst [smem:[#allocation25_spill]] %s7754_s12 }
   0x7   :  { %7766 = sst [smem:[#allocation26_spill]] %s7755_s13 }
   0x8   :  { %18 = vsyncpa [#allocation3], 0 }
   0x9   :  { %20 = vsyncpa [#allocation3 + $0x1], 0 }
   0xa   :  { %21 = vsyncpa [#allocation6], 0 }
   0xb   :  { %22 = vsyncpa [#allocation9], 0 }
   0xc   :  { %23 = vsyncpa [#allocation12], 0 }
   0xd   :  { %24 = vsyncpa [#allocation4], 0 }
   0xe   :  { %26 = vsyncpa [#allocation4 + $0x1], 0  ;;  %s6285_s25 = smov 0   ;;  %s6287_s26 = smov 0  }
   0xf   :  { %s6289_s27 = smov 0   ;;  %s6291_s28 = smov 0  }
  0x10 LB: > { %s6190_s29 = smov [#allocation5]   ;;  %s6306_s14 = sadd.s32 4294967295, %s6188_s28   ;;  %s6188_s28 = sphi %s6291_s28, %s7796_s28   ;;  %s6184_s27 = sphi %s6289_s27, %s7795_s27   ;;  %s6180_s26 = sphi %s6287_s26, %s7794_s26   ;;  %s6176_s25 = sphi %s6285_s25, %s7793_s25  }
  0x11   : > { %s354_s30 = sshll.u32 %s6190_s29, 4  ;;  %p5125_p0 = scmp.ge.s32.totalorder %s6188_s28, 1  ;;  %s6311_s30 = int_to_ptr.vmem [resolvable:$true] %s354_s30 }
  0x12   : > { %p7757_p1 = scmp.eq.s32.totalorder %s6306_s14, 0  ;;  %p341_p2 = scmp.lt.s32.totalorder %s6188_s28, 3 }
  0x13   : > { %s6191_s16 = smov [#allocation8]   ;;  %s6192_s19 = smov [#allocation11]  }
  0x14   : > { %p6313_p3 = pnand %p5125_p0, %p341_p2  ;;  %s375_s17 = sshll.u32 %s6191_s16, 4  ;;  %s6320_s17 = int_to_ptr.vmem [resolvable:$true] %s375_s17 }
  0x15   : > { %s413_s20 = sshll.u32 %s6192_s19, 4  ;;  %s7769_s1 = sld [smem:[#allocation20_spill]]  ;;  %s6328_s20 = int_to_ptr.vmem [resolvable:$true] %s413_s20 }
  0x16   : > { %s7767_s15 = scalar_select %p6313_p3, 1, 0 }
  0x17   : > { %p5550_p5 = pneg %p6313_p3 }
  0x19   : > { %p6324_p6 = pnand %p5550_p5, %p7757_p1 }
  0x1b   : > { %s5912_s23 = scalar_lea.hbm %s7769_s1, 16  ;;  %p6338_p8 = pneg %p6324_p6 }
  0x1c   : > { %p5913_p7 = scmp.ne.s32.totalorder %s7769_s1, %s5912_s23  ;;  %p5919_p11 = scmp.lt.u32.totalorder %s5912_s23, %s7769_s1 }
  0x1e   : > { %p5915_p9 = pnand %p6338_p8, %p5913_p7 }
  0x20   : > { %p5916_p10 = pneg %p5915_p9 }
  0x22   : > { %p5921_p12 = pnand %p5919_p11, %p5916_p10 }
  0x24   : > { %5924 = shalt.err (!%p5921_p12)
}
  0x25   : > { %s5925_s21 = scalar_lea.vmem %s6311_s30, 16  ;;  %s5932_s22 = scalar_lea.vmem %s6311_s30, 32 }
  0x26   : > { %p5926_p13 = scmp.ne.s32.totalorder %s6311_s30, %s5925_s21  ;;  %p5933_p5 = scmp.lt.s32.totalorder %s6311_s30, %s6311_s30 }
  0x27   : > { %p5934_p7 = scmp.lt.s32.totalorder %s5932_s22, %s5925_s21 }
  0x28   : > { %p5928_p0 = pnand %p5926_p13, %p6338_p8 }
  0x29   : > { %p5935_p9 = por %p5934_p7, %p5933_p5 }
  0x2a   : > { %p5929_p2 = pneg %p5928_p0 }
  0x2c   : > { %p5936_p4 = pnand %p5935_p9, %p5929_p2 }
  0x2e   : > { %5939 = shalt.err (!%p5936_p4)
}
  0x2f   : > { %5553 = dma.hbm_to_vmem [thread:$0]  (!%p6324_p6), %s7769_s1, 16, %s6311_s30, [#allocation6]  }
  0x30   : > { %s7771_s3 = sld [smem:[#allocation21_spill]] }
  0x36   : > { %s5940_s19 = scalar_lea.hbm %s7771_s3, 3072 }
  0x37   : > { %p5941_p10 = scmp.ne.s32.totalorder %s7771_s3, %s5940_s19  ;;  %p5947_p4 = scmp.lt.u32.totalorder %s5940_s19, %s7771_s3 }
  0x39   : > { %p5943_p11 = pnand %p5941_p10, %p6338_p8 }
  0x3b   : > { %p5944_p12 = pneg %p5943_p11 }
  0x3d   : > { %p5949_p13 = pnand %p5947_p4, %p5944_p12 }
  0x3f   : > { %5952 = shalt.err (!%p5949_p13)
}
  0x40   : > { %s5953_s30 = scalar_lea.vmem %s6320_s17, 3072  ;;  %p5961_p7 = scmp.lt.s32.totalorder %s6320_s17, %s6320_s17 }
  0x41   : > { %p5954_p0 = scmp.ne.s32.totalorder %s6320_s17, %s5953_s30  ;;  %p5962_p9 = scmp.lt.s32.totalorder %s5953_s30, %s5953_s30 }
  0x43   : > { %p5956_p2 = pnand %p5954_p0, %p6338_p8  ;;  %p5963_p10 = por %p5962_p9, %p5961_p7 }
  0x45   : > { %p5957_p5 = pneg %p5956_p2 }
  0x47   : > { %p5964_p11 = pnand %p5963_p10, %p5957_p5 }
  0x49   : > { %5967 = shalt.err (!%p5964_p11)
}
  0x4a   : > { %s6193_s10 = smov 192   ;;  %s6194_s12 = smov 12  }
  0x4b   : > { %5559 = dma.hbm_to_vmem [thread:$0]  (!%p6324_p6), %s7771_s3, 3072, %s6320_s17, [#allocation9], %s6193_s10, %s6193_s10, %s6194_s12  }
  0x4c   : > { %s5968_s19 = scalar_lea.hbm %s7751_s9, 4096 }
  0x4d   : > { %p5969_p12 = scmp.ne.s32.totalorder %s7751_s9, %s5968_s19  ;;  %p5975_p0 = scmp.lt.u32.totalorder %s5968_s19, %s7751_s9 }
  0x4f   : > { %p5971_p4 = pnand %p5969_p12, %p6338_p8 }
  0x51   : > { %p5972_p13 = pneg %p5971_p4 }
  0x53   : > { %p5977_p2 = pnand %p5975_p0, %p5972_p13 }
  0x55   : > { %5980 = shalt.err (!%p5977_p2)
}
  0x56   : > { %s5981_s17 = scalar_lea.vmem %s6328_s20, 4096  ;;  %p5989_p10 = scmp.lt.s32.totalorder %s6328_s20, %s6328_s20 }
  0x57   : > { %p5982_p5 = scmp.ne.s32.totalorder %s6328_s20, %s5981_s17  ;;  %p5990_p11 = scmp.lt.s32.totalorder %s5981_s17, %s5981_s17 }
  0x59   : > { %p5984_p7 = pnand %p5982_p5, %p6338_p8  ;;  %p5991_p12 = por %p5990_p11, %p5989_p10 }
  0x5b   : > { %p5985_p9 = pneg %p5984_p7 }
  0x5d   : > { %p5992_p4 = pnand %p5991_p12, %p5985_p9 }
  0x5f   : > { %5995 = shalt.err (!%p5992_p4)
}
  0x60   : > { %s6195_s10 = smov 256   ;;  %s6196_s1 = smov 16  }
  0x61   : > { %5565 = dma.hbm_to_vmem [thread:$0]  (!%p6324_p6), %s7751_s9, 4096, %s6328_s20, [#allocation12], %s6195_s10, %s6195_s10, %s6196_s1  }
  0x62   : > { %s6197_s23 = smov [#allocation7]   ;;  %s6198_s29 = smov [#allocation10]  }
  0x63   : > { %s365_s24 = sshll.u32 %s6197_s23, 4  ;;  %s391_s19 = sshll.u32 %s6198_s29, 4  ;;  %s366_s24 = int_to_ptr.vmem [resolvable:$true] %s365_s24  ;;  %s392_s19 = int_to_ptr.vmem [resolvable:$true] %s391_s19 }
  0x64   : > { %s5996_s30 = scalar_lea.hbm %s7744_s2, 16 }
  0x65   : > { %p5997_p13 = scmp.ne.s32.totalorder %s7744_s2, %s5996_s30  ;;  %p6003_p5 = scmp.lt.u32.totalorder %s5996_s30, %s7744_s2 }
  0x67   : > { %p5999_p0 = pnand %p5997_p13, %p6338_p8 }
  0x69   : > { %p6000_p2 = pneg %p5999_p0 }
  0x6b   : > { %p6005_p7 = pnand %p6003_p5, %p6000_p2 }
  0x6d   : > { %6008 = shalt.err (!%p6005_p7)
}
  0x6e   : > { %s6009_s20 = scalar_lea.vmem %s366_s24, 16  ;;  %s6016_s10 = scalar_lea.vmem %s366_s24, 32 }
  0x6f   : > { %p6010_p9 = scmp.ne.s32.totalorder %s366_s24, %s6009_s20  ;;  %p6017_p12 = scmp.lt.s32.totalorder %s366_s24, %s366_s24 }
  0x70   : > { %p6018_p4 = scmp.lt.s32.totalorder %s6016_s10, %s6009_s20 }
  0x71   : > { %p6012_p10 = pnand %p6010_p9, %p6338_p8 }
  0x72   : > { %p6019_p1 = por %p6018_p4, %p6017_p12 }
  0x73   : > { %p6013_p11 = pneg %p6012_p10 }
  0x75   : > { %p6020_p3 = pnand %p6019_p1, %p6013_p11 }
  0x77   : > { %6023 = shalt.err (!%p6020_p3)
}
  0x78   : > { %5556 = dma.hbm_to_vmem [thread:$0]  (!%p6324_p6), %s7744_s2, 16, %s366_s24, [#allocation6]  }
  0x79   : > { %s6024_s12 = scalar_lea.hbm %s7747_s5, 1024 }
  0x7a   : > { %p6025_p13 = scmp.ne.s32.totalorder %s7747_s5, %s6024_s12  ;;  %p6031_p3 = scmp.lt.u32.totalorder %s6024_s12, %s7747_s5 }
  0x7c   : > { %p6027_p0 = pnand %p6025_p13, %p6338_p8 }
  0x7e   : > { %p6028_p1 = pneg %p6027_p0 }
  0x80   : > { %p6033_p2 = pnand %p6031_p3, %p6028_p1 }
  0x82   : > { %6036 = shalt.err (!%p6033_p2)
}
  0x83   : > { %s6037_s22 = scalar_lea.vmem %s392_s19, 1024  ;;  %p6045_p10 = scmp.lt.s32.totalorder %s392_s19, %s392_s19 }
  0x84   : > { %p6038_p5 = scmp.ne.s32.totalorder %s392_s19, %s6037_s22  ;;  %p6046_p11 = scmp.lt.s32.totalorder %s6037_s22, %s6037_s22 }
  0x86   : > { %p6040_p7 = pnand %p6038_p5, %p6338_p8  ;;  %p6047_p12 = por %p6046_p11, %p6045_p10 }
  0x88   : > { %p6041_p9 = pneg %p6040_p7 }
  0x8a   : > { %p6048_p4 = pnand %p6047_p12, %p6041_p9 }
  0x8c   : > { %6051 = shalt.err (!%p6048_p4)
}
  0x8d   : > { %s6199_s24 = smov 64   ;;  %s6200_s30 = smov 4  }
  0x8e   : > { %5562 = dma.hbm_to_vmem [thread:$0]  (!%p6324_p6), %s7747_s5, 1024, %s392_s19, [#allocation9], %s6199_s24, %s6199_s24, %s6200_s30  }
  0x8f   : > { %s6201_s10 = smov [#allocation13]   ;;  %s6052_s8 = scalar_lea.hbm %s7753_s11, 4096 }
  0x90   : > { %s429_s3 = sshll.u32 %s6201_s10, 4  ;;  %p6053_p13 = scmp.ne.s32.totalorder %s7753_s11, %s6052_s8  ;;  %s430_s3 = int_to_ptr.vmem [resolvable:$true] %s429_s3 }
  0x91   : > { %p6059_p3 = scmp.lt.u32.totalorder %s6052_s8, %s7753_s11 }
  0x92   : > { %p6055_p0 = pnand %p6053_p13, %p6338_p8 }
  0x94   : > { %p6056_p1 = pneg %p6055_p0 }
  0x96   : > { %p6061_p2 = pnand %p6059_p3, %p6056_p1 }
  0x98   : > { %6064 = shalt.err (!%p6061_p2)
}
  0x99   : > { %s6065_s19 = scalar_lea.vmem %s430_s3, 4096  ;;  %p6073_p10 = scmp.lt.s32.totalorder %s430_s3, %s430_s3 }
  0x9a   : > { %p6066_p5 = scmp.ne.s32.totalorder %s430_s3, %s6065_s19  ;;  %p6074_p11 = scmp.lt.s32.totalorder %s6065_s19, %s6065_s19 }
  0x9c   : > { %p6068_p7 = pnand %p6066_p5, %p6338_p8  ;;  %p6075_p12 = por %p6074_p11, %p6073_p10 }
  0x9e   : > { %p6069_p9 = pneg %p6068_p7 }
  0xa0   : > { %p6076_p4 = pnand %p6075_p12, %p6069_p9 }
  0xa2   : > { %6079 = shalt.err (!%p6076_p4)
}
  0xa3   : > { %5568 = dma.hbm_to_vmem [thread:$0]  (!%p6324_p6), %s7753_s11, 4096, %s430_s3, [#allocation12], %s6199_s24, %s6199_s24, %s6200_s30  }
  0xa4   : > { %s5124_s16 = sadd.s32 4294967294, %s6188_s28   ;;  %s6462_s18 = sadd.s32 1, %s6188_s28  }
  0xa5   : > { %s36_s17 = ssub.s32 %s6188_s28, %s6462_s18  ;;  %s39_s20 = sadd.s32 1, %s6184_s27 }
  0xa6   : > { %p37_p8 = scmp.eq.s32.totalorder %s36_s17, 0  ;;  %p46_p13 = scmp.ne.s32.totalorder %s6184_s27, %s6180_s26 }
  0xa7   : > { %p47_p0 = scmp.eq.s32.totalorder %s6188_s28, 0  ;;  %p52_p1 = scmp.ne.s32.totalorder %s6180_s26, %s6176_s25 }
  0xa8   : > { %s6473_s10 = scalar_select %p37_p8, %s6184_s27, %s39_s20  }
  0xa9   : > { %p6475_p3 = por %p47_p0, %p46_p13  ;;  %p7773_p2 = scmp.eq.s32.totalorder %s6306_s14, 0 }
  0xaa   : > { %p328_p5 = scmp.eq.s32.totalorder %s6306_s14, 1  ;;  %p334_p7 = scmp.eq.s32.totalorder %s5124_s16, 1 }
  0xab   : > { %p6481_p6 = por %p7773_p2, %p52_p1  ;;  %p5583_p9 = scmp.lt.s32.totalorder %s6188_s28, 2 }
  0xac   : > { %s446_s30 = sand.u32 1, %s6184_s27   ;;  %p6488_p10 = por %p328_p5, %p46_p13 }
  0xad   : > { %p6492_p11 = por %p334_p7, %p52_p1  ;;  %s5133_s8 = sshll.u32 %s446_s30, 5 }
  0xae   : > { %s7775_s3 = scalar_select %p6488_p10, 1, 0 }
  0xaf   : > { %s7776_s7 = scalar_select %p6492_p11, 1, 0 }
  0xb0   : > { %s5300_s12 = sshll.u32 %s6188_s28, 9  ;;  %s450_s19 = scalar_lea.vmem [#allocation2], %s5133_s8 }
  0xb1   : > { %s6500_s29 = scalar_lea.hbm %s7742_s0, %s5300_s12  ;;  %s457_s21 = sshll.u32 %s450_s19, 4  ;;  %s6502_s21 = int_to_ptr.vmem [resolvable:$true] %s457_s21 }
  0xb2   : > { %p6506_p12 = pnand %p5583_p9, %p6475_p3  ;;  %s6510_s16 = scalar_lea.sflag [#allocation3], %s446_s30 }
  0xb3   : > { %s6080_s17 = scalar_lea.hbm %s6500_s29, 512  ;;  %s6085_s1 = scalar_lea.hbm %s7742_s0, 1024 }
  0xb4   : > { %p6081_p4 = scmp.ne.s32.totalorder %s6500_s29, %s6080_s17  ;;  %p6082_p8 = pneg %p6506_p12 }
  0xb5   : > { %p6086_p1 = scmp.lt.u32.totalorder %s6500_s29, %s7742_s0  ;;  %p6087_p3 = scmp.lt.u32.totalorder %s6085_s1, %s6080_s17 }
  0xb6   : > { %p6083_p13 = pnand %p6082_p8, %p6081_p4  ;;  %p6089_p5 = scmp.lt.u32.totalorder %s6080_s17, %s6500_s29 }
  0xb7   : > { %p6088_p2 = por %p6087_p3, %p6086_p1 }
  0xb8   : > { %p6084_p0 = pneg %p6083_p13 }
  0xb9   : > { %p6090_p7 = por %p6089_p5, %p6088_p2 }
  0xbb   : > { %p6091_p9 = pnand %p6090_p7, %p6084_p0 }
  0xbd   : > { %6094 = shalt.err (!%p6091_p9)
}
  0xbe   : > { %s6095_s30 = scalar_lea.vmem %s6502_s21, 512  ;;  %s6202_s23 = smov [#allocation2]  }
  0xbf   : > { %p6096_p4 = scmp.ne.s32.totalorder %s6502_s21, %s6095_s30  ;;  %s6100_s19 = sshll.u32 %s6202_s23, 4  ;;  %s6101_s19 = int_to_ptr.vmem [resolvable:$false] %s6100_s19 }
  0xc0   : > { %s6102_s20 = scalar_lea.vmem %s6101_s19, 1024  ;;  %p6103_p10 = scmp.lt.s32.totalorder %s6502_s21, %s6101_s19 }
  0xc1   : > { %p6098_p13 = pnand %p6096_p4, %p6082_p8  ;;  %p6104_p1 = scmp.lt.s32.totalorder %s6102_s20, %s6095_s30 }
  0xc3   : > { %p6099_p11 = pneg %p6098_p13  ;;  %p6105_p3 = por %p6104_p1, %p6103_p10 }
  0xc5   : > { %p6106_p2 = pnand %p6105_p3, %p6099_p11 }
  0xc7   : > { %6109 = shalt.err (!%p6106_p2)
}
  0xc8   : > { %s6203_s17 = smov 128   ;;  %s6204_s8 = smov 8  }
  0xc9   : > { %5572 = dma.hbm_to_vmem [thread:$0]  (!%p6506_p12), %s6500_s29, 512, %s6502_s21, %s6510_s16, %s6203_s17, %s6203_s17, %s6204_s8  }
  0xca   : > { %p7778_p8 = scmp.ne.s32.totalorder %s7767_s15, 0 }
  0xcb   : > { %s6541_s1 = sand.u32 (!%p7778_p8), 1, %s6180_s26  }
  0xcc   : > { %469 = sbr.rel (%p7778_p8) target bundleno = 2938 (0xb7a), region = 72  ;;  %s5137_s12 = sshll.u32 (!%p7778_p8), %s6541_s1, 5 }
  0xcd   : > { %s472_s13 = scalar_lea.sflag (!%p7778_p8), [#allocation3], %s6541_s1  ;;  %s6547_s30 = scalar_lea.vmem (!%p7778_p8), [#allocation2], %s5137_s12 }
  0xd3   : > { %6155 = dma.done.wait (%p6481_p6), %s472_s13, 512  }
  0xd4   : > { %6157 = vsyncadd (%p6481_p6), %s472_s13, 4294966784  ;;  %p7779_p10 = scmp.eq.s32.totalorder %s6306_s14, 0 }
  0xd6   : > { %6159 = dma.done.wait (%p7779_p10), [#allocation6], 32   ;;  %p7780_p11 = pmov %p7779_p10 }
  0xd7   : > { %p7781_p12 = pmov %p7779_p10 }
  0xd8   : > { %6161 = vsyncadd (%p7780_p11), [#allocation6], 4294967264 }
  0xd9   : > { %6163 = dma.done.wait (%p7781_p12), [#allocation9], 4096   ;;  %p7782_p0 = pmov %p7779_p10 }
  0xdb   : > { %6165 = vsyncadd (%p7782_p0), [#allocation9], 4294963200  ;;  %p7783_p5 = pmov %p7782_p0 }
  0xdc   : > { %p7784_p7 = pmov %p7782_p0 }
  0xdd   : > { %6167 = dma.done.wait (%p7783_p5), [#allocation12], 8192  }
  0xde   : > { %6169 = vsyncadd (%p7784_p7), [#allocation12], 4294959104  ;;  %v543_v0 = vld [vmem:[%s6547_s30] sm:$0xff]  ;;  %v545_v1 = vld [vmem:[%s6547_s30 + $0x10] sm:$0xff]  ;;  %v6205_v39 = vmov 0   ;;  %s6206_s29 = smov 64  }
  0xdf   : > { %v544_v2 = vld [vmem:[%s6547_s30 + $0x8] sm:$0xff]  ;;  %564 = vadd.xlane.f32.xlu0 %v543_v0  ;;  %568 = vadd.xlane.f32.xlu1 %v545_v1  ;;  %v546_v3 = vld [vmem:[%s6547_s30 + $0x18] sm:$0xff]  ;;  %v5678_v5 = vld [vmem:[#allocation8] ss:$12 sps:$4 sm:$0xff]   ;;  %s6207_s21 = smov 96   ;;  %s6208_s22 = smov 32  }
  0xe0   : > { %v5676_v4 = vld [vmem:[#allocation8 + $0x4] ss:$12 sps:$4 sm:$0xff]   ;;  %v5679_v6 = vld [vmem:[#allocation8 + $0x1c] ss:$12 sps:$4 sm:$0xff]   ;;  %v5683_v25 = vld [vmem:[#allocation8 + $0x34] ss:$12 sps:$4 sm:$0xff]   ;;  %840 = vmatprep.mubr.bf16.mxu0 %v6205_v39 }
  0xe1   : > { %v5681_v7 = vld [vmem:[#allocation8 + $0x8] ss:$12 sps:$4 sm:$0xff]   ;;  %808 = vmatprep.subr.bf16.mxu0 %v5676_v4  ;;  %v5682_v24 = vld [vmem:[#allocation8 + $0x18] ss:$12 sps:$4 sm:$0xff]   ;;  %v5685_v26 = vld [vmem:[#allocation8 + $0x20] ss:$12 sps:$4 sm:$0xff]  }
  0xe2   : > { %809 = vmatpush1.bf16.msra.mxu0 %v5678_v5  ;;  %5410 = vmatprep.subr.bf16.mxu1 %v5681_v7  ;;  %v5686_v27 = vld [vmem:[#allocation8 + $0x30] ss:$12 sps:$4 sm:$0xff]   ;;  %v5687_v28 = vld [vmem:[#allocation8 + $0x4c] ss:$12 sps:$4 sm:$0xff]   ;;  %v5690_v30 = vld [vmem:[#allocation8 + $0x48] ss:$12 sps:$4 sm:$0xff]  }
  0xe3   : > { %566 = vadd.xlane.f32.xlu0 %v544_v2  ;;  %570 = vadd.xlane.f32.xlu1 %v546_v3  ;;  %v5689_v29 = vld [vmem:[#allocation8 + $0x38] ss:$12 sps:$4 sm:$0xff]   ;;  %v5693_v32 = vld [vmem:[#allocation8 + $0x50] ss:$12 sps:$4 sm:$0xff]   ;;  %v5694_v33 = vld [vmem:[#allocation8 + $0x60] ss:$12 sps:$4 sm:$0xff]  }
  0xe4   : > { %810 = vmatprep.subr.bf16.mxu0 %v5679_v6  ;;  %5411 = vmatpush3.bf16.msra.mxu1 %v5681_v7  ;;  %v5691_v31 = vld [vmem:[#allocation8 + $0x64] ss:$12 sps:$4 sm:$0xff]   ;;  %v5695_v34 = vld [vmem:[#allocation8 + $0x7c] ss:$12 sps:$4 sm:$0xff]   ;;  %v5699_v37 = vld [vmem:[#allocation8 + $0x94] ss:$12 sps:$4 sm:$0xff]  }
  0xe5   : > { %5412 = vmatprep.subr.bf16.mxu1 %v5685_v26  ;;  %v5697_v35 = vld [vmem:[#allocation8 + $0x68] ss:$12 sps:$4 sm:$0xff]   ;;  %v5698_v36 = vld [vmem:[#allocation8 + $0x78] ss:$12 sps:$4 sm:$0xff]   ;;  %v5701_v38 = vld [vmem:[#allocation8 + $0x80] ss:$12 sps:$4 sm:$0xff]  }
  0xe6   : > { %811 = vmatpush1.bf16.msra.mxu0 %v5682_v24  ;;  %v5702_v40 = vld [vmem:[#allocation8 + $0x90] ss:$12 sps:$4 sm:$0xff]   ;;  %v5703_v41 = vld [vmem:[#allocation8 + $0xac] ss:$12 sps:$4 sm:$0xff]   ;;  %v5706_v43 = vld [vmem:[#allocation8 + $0xa8] ss:$12 sps:$4 sm:$0xff]  }
  0xe7   : > { %812 = vmatprep.subr.bf16.mxu0 %v5683_v25  ;;  %v5705_v42 = vld [vmem:[#allocation8 + $0x98] ss:$12 sps:$4 sm:$0xff]   ;;  %v5707_v44 = vld [vmem:[#allocation8 + $0xb0] ss:$12 sps:$4 sm:$0xff]   ;;  %vm2682_vm0 = vcmask 261120   ;;  %vm3935_vm5 = vcmask 523264  }
  0xe8   : > { %5413 = vmatpush3.bf16.msra.mxu1 %v5685_v26  ;;  %v5145_v59 = vld [vmem:[#allocation5] ss:$0 sm:$0xff]  ;;  %vm3940_vm6 = vcmask 785408   ;;  %s7785_s17 = sld [smem:[#allocation22_spill]]  ;;  %s7788_s16 = sld [smem:[#allocation25_spill]] }
  0xe9   : > { %5414 = vmatprep.subr.bf16.mxu1 %v5689_v29  ;;  %s541_s23 = scalar_lea.vmem [#allocation14], %s5137_s12  ;;  %s5301_s12 = sshll.u32 %s6306_s14, 9 }
  0xea   : > { %813 = vmatpush1.bf16.msra.mxu0 %v5686_v27  ;;  %s4994_s19 = sshll.u32 %s541_s23, 4  ;;  %s7789_s8 = sld [smem:[#allocation26_spill]]  ;;  %s7691_s19 = int_to_ptr.vmem [resolvable:$true] %s4994_s19 }
  0xeb   : > { %814 = vmatprep.subr.bf16.mxu0 %v5687_v28  ;;  %s6110_s15 = scalar_lea.vmem %s7691_s19, 512  ;;  %p7790_p9 = scmp.ne.s32.totalorder %s7775_s3, 0 }
  0xec   : > { %5415 = vmatpush3.bf16.msra.mxu1 %v5689_v29  ;;  %p6111_p6 = scmp.ne.s32.totalorder %s7691_s19, %s6110_s15  ;;  %s6212_s14 = smov [#allocation14]  }
  0xed   : > { %5416 = vmatprep.subr.bf16.mxu1 %v5693_v32  ;;  %s6114_s24 = sshll.u32 %s6212_s14, 4  ;;  %s6115_s24 = int_to_ptr.vmem [resolvable:$false] %s6114_s24 }
  0xee   : > { %815 = vmatpush1.bf16.msra.mxu0 %v5690_v30  ;;  %p6112_p4 = pnand %p6111_p6, %p7790_p9  ;;  %p6117_p1 = scmp.lt.s32.totalorder %s7691_s19, %s6115_s24 }
  0xef   : > { %816 = vmatprep.subr.bf16.mxu0 %v5691_v31 }
  0xf0   : > { %5417 = vmatpush3.bf16.msra.mxu1 %v5693_v32  ;;  %s7697_s13 = scalar_lea.hbm %s7789_s8, %s5301_s12  ;;  %p6113_p13 = pneg %p6112_p4 }
  0xf1   : > { %5418 = vmatprep.subr.bf16.mxu1 %v5697_v35 }
  0xf2   : > { %817 = vmatpush1.bf16.msra.mxu0 %v5694_v33 }
  0xf3   : > { %818 = vmatprep.subr.bf16.mxu0 %v5695_v34 }
  0xf4   : > { %5419 = vmatpush3.bf16.msra.mxu1 %v5697_v35 }
  0xf5   : > { %5420 = vmatprep.subr.bf16.mxu1 %v5701_v38 }
  0xf6   : > { %819 = vmatpush1.bf16.msra.mxu0 %v5698_v36 }
  0xf7   : > { %820 = vmatprep.subr.bf16.mxu0 %v5699_v37 }
  0xf8   : > { %5421 = vmatpush3.bf16.msra.mxu1 %v5701_v38 }
  0xf9   : > { %5422 = vmatprep.subr.bf16.mxu1 %v5705_v42 }
  0xfa   : > { %821 = vmatpush1.bf16.msra.mxu0 %v5702_v40 }
  0xfb   : > { %822 = vmatprep.subr.bf16.mxu0 %v5703_v41 }
  0xfc   : > { %5423 = vmatpush3.bf16.msra.mxu1 %v5705_v42 }
  0xfd   : > { %5424 = vmatprep.subr.bf16.mxu1 %v5707_v44 }
  0xfe   : > { %823 = vmatpush1.bf16.msra.mxu0 %v5706_v43 }
 0x100   : > { %5425 = vmatpush3.bf16.msra.mxu1 %v5707_v44 }
 0x16c   : > { %v565_v8 = vpop.xlane.xlu0 %564  ;;  %v569_v9 = vpop.xlane.xlu1 %568 }
 0x16d   : > { %v573_v10 = vmul.f32 0.0078125, %v565_v8  ;;  %v575_v11 = vmul.f32 0.0078125, %v569_v9 }
 0x16f   : > { %v6569_v12 = vsub.f32 %v543_v0, %v573_v10  ;;  %v6571_v13 = vsub.f32 %v545_v1, %v575_v11  ;;  %v5146_v0 = vld [vmem:[#allocation7] ss:$0 sm:$0xff] }
 0x170   : > { %v567_v14 = vpop.xlane.xlu0 %566  ;;  %v571_v15 = vpop.xlane.xlu1 %570 }
 0x171   : > { %v574_v16 = vmul.f32 0.0078125, %v567_v14  ;;  %v581_v17 = vmul.f32 %v6569_v12, %v6569_v12  ;;  %v576_v18 = vmul.f32 0.0078125, %v571_v15  ;;  %v583_v21 = vmul.f32 %v6571_v13, %v6571_v13 }
 0x172   : > { %v547_v14 = vlaneseq }
 0x173   : > { %v6575_v19 = vsub.f32 %v544_v2, %v574_v16  ;;  %585 = vadd.xlane.f32.xlu0 %v581_v17  ;;  %v6577_v20 = vsub.f32 %v546_v3, %v576_v18  ;;  %v663_v16 = vld [vmem:[%s7746_s4] sm:$0x7] }
 0x175   : > { %v582_v22 = vmul.f32 %v6575_v19, %v6575_v19  ;;  %v584_v23 = vmul.f32 %v6577_v20, %v6577_v20 }
 0x177   : > { %589 = vadd.xlane.f32.xlu0 %v583_v21  ;;  %587 = vadd.xlane.f32.xlu1 %v582_v22 }
 0x17b   : > { %591 = vadd.xlane.f32.xlu1 %v584_v23 }
 0x200   : > { %v586_v45 = vpop.xlane.xlu0 %585 }
 0x201   : > { %v593_v46 = vmul.f32 0.0078125, %v586_v45 }
 0x203   : > { %v597_v47 = vadd.f32 1e-05, %v593_v46 }
 0x204   : > { %v588_v48 = vpop.xlane.xlu1 %587  ;;  %v590_v49 = vpop.xlane.xlu0 %589 }
 0x205   : > { %5796 = vrsqrt.f32 %v597_v47  ;;  %v594_v50 = vmul.f32 0.0078125, %v588_v48  ;;  %v595_v51 = vmul.f32 0.0078125, %v590_v49 }
 0x207   : > { %v598_v52 = vadd.f32 1e-05, %v594_v50  ;;  %v599_v53 = vadd.f32 1e-05, %v595_v51  ;;  %v6209_v51 = vmov 1983009808  }
 0x208   : > { %v592_v54 = vpop.xlane.xlu1 %591 }
 0x209   : > { %5798 = vrsqrt.f32 %v598_v52  ;;  %v596_v55 = vmul.f32 0.0078125, %v592_v54  ;;  %v957_v52 = vunpack.c.l.s4 %v6209_v51 }
 0x20a   : > { %5800 = vrsqrt.f32 %v599_v53 }
 0x20b   : > { %v600_v56 = vadd.f32 1e-05, %v596_v55  ;;  %v958_v53 = vunpack.c.0.s8 %v957_v52 }
 0x20d   : > { %5802 = vrsqrt.f32 %v600_v56  ;;  %v6210_v56 = vmov 1934713408  }
 0x20f   : > { %v5797_v57 = vpop.eup %5796 }
 0x210   : > { %v605_v58 = vmul.f32 %v5797_v57, %v6569_v12  ;;  %v989_v57 = vunpack.c.l.s4 %v6210_v56 }
 0x212   : > { %v615_v63 = vmul.f32 %v5145_v59, %v605_v58 }
 0x213   : > { %v5799_v60 = vpop.eup %5798 }
 0x214   : > { %v5801_v61 = vpop.eup %5800  ;;  %v606_v62 = vmul.f32 %v5799_v60, %v6575_v19  ;;  %v625_v4 = vadd.f32 %v5146_v0, %v615_v63 }
 0x215   : > { %v607_v1 = vmul.f32 %v5801_v61, %v6571_v13  ;;  %v6592_v13 = vshrl.u32 %v547_v14, 7 }
 0x216   : > { %v616_v2 = vmul.f32 %v5145_v59, %v606_v62  ;;  %v990_v62 = vunpack.c.0.s8 %v989_v57 }
 0x217   : > { %v5803_v3 = vpop.eup %5802  ;;  %v617_v7 = vmul.f32 %v5145_v59, %v607_v1  ;;  %v671_v15 = vsub.s32 1, %v6592_v13  ;;  %v675_v17 = vsub.s32 2, %v6592_v13  ;;  %v667_v18 = vsub.s32 0, %v6592_v13 }
 0x218   : > { %v626_v5 = vadd.f32 %v5146_v0, %v616_v2  ;;  %v608_v6 = vmul.f32 %v5803_v3, %v6577_v20  ;;  %v6689_v58 = vsub.s32 %v958_v53, %v6592_v13 }
 0x219   : > { %v627_v10 = vadd.f32 %v5146_v0, %v617_v7  ;;  %v672_v19 = vrot.slane %v663_v16, %v671_v15  ;;  %v676_v22 = vrot.slane %v663_v16, %v675_v17  ;;  %v668_v23 = vrot.slane %v663_v16, %v667_v18 }
 0x21a   : > { %v629_v8 = vpack.c.bf16 %v626_v5, %v625_v4  ;;  %v618_v9 = vmul.f32 %v5145_v59, %v608_v6  ;;  %v6697_v7 = vsub.s32 %v990_v62, %v6592_v13 }
 0x21c   : > { %841 = vmatmul.mubr.bf16.vlgmr.msra.gmra.mrb[0].mxu0 %v629_v8  ;;  %5426 = vmatprep.mubr.bf16.mxu1 %v629_v8  ;;  %v628_v11 = vadd.f32 %v5146_v0, %v618_v9 }
 0x21d   : > { %850 = vmatprep.mubr.bf16.mxu0 %v6205_v39 }
 0x21e   : > { %v630_v12 = vpack.c.bf16 %v628_v11, %v627_v10 }
 0x220   : > { %5427 = vmatmul.mubr.bf16.vlgmr.msra.gmra.mrb[0].mxu1 %v630_v12 }
 0x224   : > { %851 = vmatmul.mubr.bf16.gmra.mrb[4].mxu0 %v630_v12 }
 0x2ef   : > { %v842_v20 = vpop.f32.mrb[0].mxu0 }
 0x2f0   : > { %v844_v21 = vpop.f32.mrb[1].mxu0  ;;  %v843_v30 = vadd.f32 %v842_v20, %v668_v23 }
 0x2f1   : > { %v6606_v24 = vadd.f32 %v844_v21, %v672_v19  ;;  %v846_v25 = vpop.f32.mrb[2].mxu0 }
 0x2f2   : > { %v848_v26 = vpop.f32.mrb[3].mxu0  ;;  %v6622_v37 = vmul.f32 0.17677669, %v843_v30  ;;  %v847_v41 = vadd.f32 %v846_v25, %v668_v23 }
 0x2f3   : > { %1514 = vrot.lane.b32.xlu1 %v6606_v24, %s6206_s29  ;;  %1502 = vrot.lane.b32.xlu0 %v6606_v24, %s6207_s21  ;;  %v5428_v27 = vpop.f32.mrb[0].mxu1  ;;  %v6614_v31 = vadd.f32 %v848_v26, %v672_v19 }
 0x2f4   : > { %v6612_v28 = vadd.f32 %v5428_v27, %v676_v22  ;;  %v895_v29 = vpop.f32.mrb[1].mxu1  ;;  %v6632_v42 = vmul.f32 0.17677669, %v847_v41 }
 0x2f5   : > { %v5429_v32 = vpop.f32.mrb[2].mxu1  ;;  %v6670_v49 = vadd.f32 %v895_v29, %v676_v22 }
 0x2f6   : > { %v6616_v33 = vadd.f32 %v5429_v32, %v676_v22  ;;  %v898_v34 = vpop.f32.mrb[3].mxu1 }
 0x2f7   : > { %1504 = vrot.lane.b32.xlu1 %v6614_v31, %s6207_s21  ;;  %1526 = vrot.lane.b32.xlu0 %v6606_v24, %s6208_s22  ;;  %v852_v35 = vpop.f32.mrb[4].mxu0  ;;  %v6680_v50 = vadd.f32 %v898_v34, %v676_v22 }
 0x2f8   : > { %v854_v36 = vpop.f32.mrb[5].mxu0  ;;  %v853_v44 = vadd.f32 %v852_v35, %v668_v23 }
 0x2f9   : > { %v856_v38 = vpop.f32.mrb[6].mxu0  ;;  %v6638_v43 = vadd.f32 %v854_v36, %v672_v19 }
 0x2fa   : > { %v858_v40 = vpop.f32.mrb[7].mxu0  ;;  %v6654_v46 = vmul.f32 0.17677669, %v853_v44  ;;  %v857_v47 = vadd.f32 %v856_v38, %v668_v23 }
 0x2fb   : > { %1516 = vrot.lane.b32.xlu1 %v6614_v31, %s6206_s29  ;;  %918 = vrot.lane.b32.xlu0 %v6622_v37, %s6207_s21  ;;  %v6648_v45 = vadd.f32 %v858_v40, %v672_v19 }
 0x2fc   : > { %v6664_v48 = vmul.f32 0.17677669, %v857_v47 }
 0x2ff   : > { %1528 = vrot.lane.b32.xlu1 %v6614_v31, %s6208_s22  ;;  %930 = vrot.lane.b32.xlu0 %v6622_v37, %s6206_s29 }
 0x303   : > { %920 = vrot.lane.b32.xlu1 %v6632_v42, %s6207_s21  ;;  %942 = vrot.lane.b32.xlu0 %v6622_v37, %s6208_s22 }
 0x307   : > { %932 = vrot.lane.b32.xlu1 %v6632_v42, %s6206_s29  ;;  %1506 = vrot.lane.b32.xlu0 %v6638_v43, %s6207_s21 }
 0x30b   : > { %944 = vrot.lane.b32.xlu1 %v6632_v42, %s6208_s22  ;;  %1518 = vrot.lane.b32.xlu0 %v6638_v43, %s6206_s29 }
 0x30f   : > { %1508 = vrot.lane.b32.xlu1 %v6648_v45, %s6207_s21  ;;  %1530 = vrot.lane.b32.xlu0 %v6638_v43, %s6208_s22 }
 0x313   : > { %1520 = vrot.lane.b32.xlu1 %v6648_v45, %s6206_s29  ;;  %922 = vrot.lane.b32.xlu0 %v6654_v46, %s6207_s21 }
 0x317   : > { %1532 = vrot.lane.b32.xlu1 %v6648_v45, %s6208_s22  ;;  %934 = vrot.lane.b32.xlu0 %v6654_v46, %s6206_s29 }
 0x31b   : > { %924 = vrot.lane.b32.xlu1 %v6664_v48, %s6207_s21  ;;  %946 = vrot.lane.b32.xlu0 %v6654_v46, %s6208_s22 }
 0x31f   : > { %936 = vrot.lane.b32.xlu1 %v6664_v48, %s6206_s29  ;;  %2086 = vrot.lane.b32.xlu0 %v6670_v49, %s6207_s21 }
 0x323   : > { %948 = vrot.lane.b32.xlu1 %v6664_v48, %s6208_s22  ;;  %2110 = vrot.lane.b32.xlu0 %v6670_v49, %s6208_s22 }
 0x327   : > { %2088 = vrot.lane.b32.xlu1 %v6680_v50, %s6207_s21 }
 0x32b   : > { %2098 = vrot.lane.b32.xlu1 %v6670_v49, %s6206_s29 }
 0x32f   : > { %2100 = vrot.lane.b32.xlu1 %v6680_v50, %s6206_s29 }
 0x365   : > { %v1515_v54 = vpop.permute.xlu1 %1514  ;;  %v1503_v55 = vpop.permute.xlu0 %1502 }
 0x366   : > { %v1538_v59 = vcombine.low %v6606_v24, %v1515_v54  ;;  %v1539_v1 = vcombine.high %v6606_v24, %v1515_v54 }
 0x368   : > { %v1546_v2 = vrot.slane %v1538_v59, %v6689_v58  ;;  %v1553_v10 = vrot.slane %v1539_v1, %v6689_v58 }
 0x369   : > { %v1505_v60 = vpop.permute.xlu1 %1504  ;;  %v1527_v61 = vpop.permute.xlu0 %1526 }
 0x36a   : > { %v1554_v63 = vcombine.low %v1503_v55, %v1527_v61  ;;  %v1555_v0 = vcombine.high %v1503_v55, %v1527_v61 }
 0x36c   : > { %v1562_v3 = vrot.slane %v1554_v63, %v6689_v58  ;;  %v1569_v4 = vrot.slane %v1555_v0, %v6689_v58 }
 0x36d   : > { %v1517_v5 = vpop.permute.xlu1 %1516  ;;  %v919_v6 = vpop.permute.xlu0 %918 }
 0x36e   : > { %v1570_v8 = vcombine.low %v1546_v2, %v1562_v3  ;;  %v1571_v9 = vcombine.high %v1546_v2, %v1562_v3  ;;  %v1586_v11 = vcombine.low %v1553_v10, %v1569_v4  ;;  %v1587_v12 = vcombine.high %v1553_v10, %v1569_v4 }
 0x36f   : > { %v1606_v26 = vcombine.low %v6614_v31, %v1517_v5  ;;  %v1607_v27 = vcombine.high %v6614_v31, %v1517_v5 }
 0x370   : > { %v1578_v20 = vrot.slane %v1570_v8, %v6697_v7  ;;  %v1585_v21 = vrot.slane %v1571_v9, %v6697_v7  ;;  %v1594_v24 = vrot.slane %v1586_v11, %v6697_v7  ;;  %v1601_v25 = vrot.slane %v1587_v12, %v6697_v7 }
 0x371   : > { %v1529_v16 = vpop.permute.xlu1 %1528  ;;  %v931_v19 = vpop.permute.xlu0 %930  ;;  %v1614_v51 = vrot.slane %v1606_v26, %v6689_v58  ;;  %v1621_v52 = vrot.slane %v1607_v27, %v6689_v58 }
 0x372   : > { %v1622_v22 = vcombine.low %v1505_v60, %v1529_v16  ;;  %v1623_v23 = vcombine.high %v1505_v60, %v1529_v16  ;;  %v1810_v32 = vcombine.low %v1578_v20, %v1585_v21  ;;  %v5179_v34 = vcombine.high %v1578_v20, %v1585_v21 }
 0x373   : > { %v954_v40 = vcombine.low %v6622_v37, %v931_v19  ;;  %v1826_v44 = vcombine.low %v1594_v24, %v1601_v25  ;;  %v5180_v47 = vcombine.high %v1594_v24, %v1601_v25  ;;  %v955_v56 = vcombine.high %v6622_v37, %v931_v19 }
 0x374   : > { %v1630_v36 = vrot.slane %v1622_v22, %v6689_v58  ;;  %v1637_v38 = vrot.slane %v1623_v23, %v6689_v58  ;;  %v6714_v54 = vrot.slane %v1810_v32, %v6689_v58  ;;  %v6717_v55 = vrot.slane %v5179_v34, %v6689_v58 }
 0x375   : > { %v6706_v29 = vpop.permute.xlu1 %920  ;;  %v943_v30 = vpop.permute.xlu0 %942  ;;  %v962_v63 = vrot.slane %v954_v40, %v6689_v58  ;;  %v6724_v1 = vrot.slane %v1826_v44, %v6689_v58  ;;  %v6727_v2 = vrot.slane %v5180_v47, %v6689_v58  ;;  %v969_v37 = vrot.slane %v955_v56, %v6689_v58 }
 0x376   : > { %v970_v35 = vcombine.low %v919_v6, %v943_v30  ;;  %v971_v41 = vcombine.high %v919_v6, %v943_v30  ;;  %v1638_v59 = vcombine.low %v1614_v51, %v1630_v36  ;;  %v1639_v60 = vcombine.high %v1614_v51, %v1630_v36 }
 0x377   : > { %v1654_v61 = vcombine.low %v1621_v52, %v1637_v38  ;;  %v1655_v62 = vcombine.high %v1621_v52, %v1637_v38  ;;  %v1842_v8 = vcombine.low %v6714_v54, %v6717_v55  ;;  %v1858_v22 = vcombine.low %v6724_v1, %v6727_v2 }
 0x378   : > { %v978_v57 = vrot.slane %v970_v35, %v6689_v58  ;;  %v985_v0 = vrot.slane %v971_v41, %v6689_v58  ;;  %v1646_v9 = vrot.slane %v1638_v59, %v6697_v7  ;;  %v1653_v10 = vrot.slane %v1639_v60, %v6697_v7 }
 0x379   : > { %v933_v31 = vpop.permute.xlu1 %932  ;;  %v1507_v53 = vpop.permute.xlu0 %1506  ;;  %v1662_v11 = vrot.slane %v1654_v61, %v6697_v7  ;;  %v1669_v12 = vrot.slane %v1655_v62, %v6697_v7  ;;  %v6743_v26 = vrot.slane %v1842_v8, %v6697_v7  ;;  %v6757_v52 = vrot.slane %v1858_v22, %v6697_v7 }
 0x37a   : > { %v986_v5 = vcombine.low %v962_v63, %v978_v57  ;;  %v987_v6 = vcombine.high %v962_v63, %v978_v57  ;;  %v1002_v16 = vcombine.low %v969_v37, %v985_v0  ;;  %v1003_v19 = vcombine.high %v969_v37, %v985_v0 }
 0x37b   : > { %v1022_v25 = vcombine.low %v6632_v42, %v933_v31  ;;  %v1878_v27 = vcombine.low %v1646_v9, %v1653_v10  ;;  %v5181_v30 = vcombine.high %v1646_v9, %v1653_v10  ;;  %v1894_v32 = vcombine.low %v1662_v11, %v1669_v12 }
 0x37c   : > { %v994_v23 = vrot.slane %v986_v5, %v6697_v7  ;;  %v1001_v24 = vrot.slane %v987_v6, %v6697_v7  ;;  %v6749_v36 = vrot.slane %v1002_v16, %v6697_v7  ;;  %v6752_v38 = vrot.slane %v1003_v19, %v6697_v7 }
 0x37d   : > { %v945_v3 = vpop.permute.xlu1 %944  ;;  %v1519_v4 = vpop.permute.xlu0 %1518  ;;  %v5182_v44 = vcombine.high %v1662_v11, %v1669_v12  ;;  %v1023_v47 = vcombine.high %v6632_v42, %v933_v31  ;;  %v1030_v57 = vrot.slane %v1022_v25, %v6689_v58  ;;  %v1885_v60 = vrot.slane %v1878_v27, %v6689_v58 }
 0x37e   : > { %v1038_v20 = vcombine.low %v6706_v29, %v945_v3  ;;  %v1039_v34 = vcombine.high %v6706_v29, %v945_v3  ;;  %v1226_v56 = vcombine.low %v994_v23, %v1001_v24  ;;  %v5171_v29 = vcombine.high %v994_v23, %v1001_v24 }
 0x37f   : > { %v1674_v59 = vcombine.low %v6638_v43, %v1519_v4  ;;  %v1893_v61 = vrot.slane %v5181_v30, %v6689_v58  ;;  %v1675_v63 = vcombine.high %v6638_v43, %v1519_v4  ;;  %v1901_v42 = vrot.slane %v1894_v32, %v6689_v58 }
 0x380   : > { %v1046_v40 = vrot.slane %v1038_v20, %v6689_v58  ;;  %v1053_v62 = vrot.slane %v1039_v34, %v6689_v58  ;;  %v1242_v31 = vcombine.low %v6749_v36, %v6752_v38  ;;  %v1909_v37 = vrot.slane %v5182_v44, %v6689_v58 }
 0x381   : > { %v1531_v21 = vpop.permute.xlu0 %1530  ;;  %v6746_v35 = vpop.permute.xlu1 %1508  ;;  %v5172_v5 = vcombine.high %v6749_v36, %v6752_v38  ;;  %v1037_v6 = vrot.slane %v1023_v47, %v6689_v58  ;;  %v6779_v4 = vrot.slane %v1226_v56, %v6689_v58  ;;  %v6782_v9 = vrot.slane %v5171_v29, %v6689_v58 }
 0x382   : > { %v1690_v41 = vcombine.low %v1507_v53, %v1531_v21  ;;  %v1691_v51 = vcombine.high %v1507_v53, %v1531_v21  ;;  %v1054_v53 = vcombine.low %v1030_v57, %v1046_v40  ;;  %v1055_v10 = vcombine.high %v1030_v57, %v1046_v40 }
 0x383   : > { %v1682_v11 = vrot.slane %v1674_v59, %v6689_v58  ;;  %v1070_v12 = vcombine.low %v1037_v6, %v1053_v62  ;;  %v1071_v16 = vcombine.high %v1037_v6, %v1053_v62  ;;  %v1689_v19 = vrot.slane %v1675_v63, %v6689_v58 }
 0x384   : > { %v1698_v3 = vrot.slane %v1690_v41, %v6689_v58  ;;  %v1705_v8 = vrot.slane %v1691_v51, %v6689_v58  ;;  %v1910_v20 = vcombine.low %v1885_v60, %v1893_v61  ;;  %v6787_v21 = vrot.slane %v1242_v31, %v6689_v58 }
 0x385   : > { %v6765_v0 = vpop.permute.xlu0 %922  ;;  %v6776_v43 = vpop.permute.xlu1 %1520  ;;  %v1062_v22 = vrot.slane %v1054_v53, %v6697_v7  ;;  %v1926_v32 = vcombine.low %v1901_v42, %v1909_v37  ;;  %v1843_v36 = vcombine.high %v6714_v54, %v6717_v55  ;;  %v1859_v38 = vcombine.high %v6724_v1, %v6727_v2 }
 0x386   : > { %v1706_v23 = vcombine.low %v1682_v11, %v1698_v3  ;;  %v1707_v24 = vcombine.high %v1682_v11, %v1698_v3  ;;  %v1722_v25 = vcombine.low %v1689_v19, %v1705_v8  ;;  %v1723_v27 = vcombine.high %v1689_v19, %v1705_v8 }
 0x387   : > { %v6791_v30 = vrot.slane %v1910_v20, %v6697_v7  ;;  %v1911_v40 = vcombine.high %v1885_v60, %v1893_v61  ;;  %v1927_v41 = vcombine.high %v1901_v42, %v1909_v37  ;;  %v1069_v44 = vrot.slane %v1055_v10, %v6697_v7 }
 0x388   : > { %v1078_v47 = vrot.slane %v1070_v12, %v6697_v7  ;;  %v1085_v51 = vrot.slane %v1071_v16, %v6697_v7  ;;  %v6803_v56 = vrot.slane %v1926_v32, %v6697_v7  ;;  %v6806_v57 = vrot.slane %v1843_v36, %v6697_v7 }
 0x389   : > { %v6793_v34 = vpop.permute.xlu0 %934  ;;  %v1533_v29 = vpop.permute.xlu1 %1532  ;;  %v6809_v54 = vrot.slane %v1859_v38, %v6697_v7  ;;  %v6812_v55 = vrot.slane %v1911_v40, %v6697_v7  ;;  %v6815_v1 = vrot.slane %v1927_v41, %v6697_v7  ;;  %v1714_v2 = vrot.slane %v1706_v23, %v6697_v7 }
 0x38a   : > { %v1721_v59 = vrot.slane %v1707_v24, %v6697_v7  ;;  %v1874_v60 = vcombine.low %v6743_v26, %v6757_v52  ;;  %v1942_v61 = vcombine.low %v6791_v30, %v6803_v56  ;;  %v1730_v62 = vrot.slane %v1722_v25, %v6697_v7 }
 0x38b   : > { %v1737_v63 = vrot.slane %v1723_v27, %v6697_v7  ;;  %v1876_v42 = vcombine.low %v6806_v57, %v6809_v54  ;;  %v1944_v31 = vcombine.low %v6812_v55, %v6815_v1  ;;  %v6830_v53 = vrot.slane %v5172_v5, %v6689_v58 }
 0x38c   : > { %v1294_v3 = vcombine.low %v1062_v22, %v1069_v44  ;;  %v2674_v37 = vpack.c.bf16 %v1942_v61, %v1874_v60  ;;  %v1758_v6 = vcombine.low %v6746_v35, %v1533_v29  ;;  %v5173_v10 = vcombine.high %v1062_v22, %v1069_v44 }
 0x38d   : > { %v947_v8 = vpop.permute.xlu0 %946  ;;  %v1310_v11 = vcombine.low %v1078_v47, %v1085_v51  ;;  %v5174_v12 = vcombine.high %v1078_v47, %v1085_v51  ;;  %v2678_v16 = vpack.c.bf16 %v1944_v31, %v1876_v42  ;;  %v1946_v19 = vcombine.low %v1714_v2, %v1721_v59  ;;  %v6838_v24 = vpop.permute.xlu1 %924 }
 0x38e   : > { %v1742_v20 = vcombine.low %v6648_v45, %v6776_v43  ;;  %5514 = vmatprep.subr.msk.bf16.mxu1 %vm2682_vm0, %v2674_v37  ;;  %v2690_v23 = vsel %vm2682_vm0, %v2674_v37, 0  ;;  %v1759_v5 = vcombine.high %v6746_v35, %v1533_v29  ;;  %v5183_v25 = vcombine.high %v1714_v2, %v1721_v59 }
 0x38f   : > { %v1962_v27 = vcombine.low %v1730_v62, %v1737_v63  ;;  %5518 = vmatprep.subr.msk.bf16.mxu0 %vm2682_vm0, %v2678_v16  ;;  %5431 = vmatpush3.bf16.xpose.msra.mxu1 %v2690_v23  ;;  %v2812_v22 = vsel %vm2682_vm0, %v2678_v16, 0  ;;  %v1106_v32 = vcombine.low %v6765_v0, %v947_v8  ;;  %v5184_v36 = vcombine.high %v1730_v62, %v1737_v63 }
 0x390   : > { %v1743_v38 = vcombine.high %v6648_v45, %v6776_v43  ;;  %5447 = vmatpush3.bf16.xpose.msra.mxu0 %v2812_v22  ;;  %v1766_v40 = vrot.slane %v1758_v6, %v6689_v58  ;;  %v1090_v35 = vcombine.low %v6654_v46, %v6793_v34  ;;  %v1301_v41 = vrot.slane %v1294_v3, %v6689_v58 }
 0x391   : > { %v1309_v44 = vrot.slane %v5173_v10, %v6689_v58  ;;  %v1317_v47 = vrot.slane %v1310_v11, %v6689_v58  ;;  %v1107_v51 = vcombine.high %v6765_v0, %v947_v8  ;;  %v1325_v29 = vrot.slane %v5174_v12, %v6689_v58  ;;  %v937_v3 = vpop.permute.xlu1 %936 }
 0x392   : > { %v6854_v2 = vrot.slane %v1946_v19, %v6689_v58  ;;  %v1750_v45 = vrot.slane %v1742_v20, %v6689_v58  ;;  %v1773_v43 = vrot.slane %v1759_v5, %v6689_v58  ;;  %v6859_v59 = vrot.slane %v5183_v25, %v6689_v58 }
 0x393   : > { %v6862_v60 = vrot.slane %v1962_v27, %v6689_v58  ;;  %v1091_v61 = vcombine.high %v6654_v46, %v6793_v34  ;;  %v1114_v0 = vrot.slane %v1106_v32, %v6689_v58  ;;  %v6868_v62 = vrot.slane %v5184_v36, %v6689_v58 }
 0x394   : > { %v1757_v63 = vrot.slane %v1743_v38, %v6689_v58  ;;  %v1774_v42 = vcombine.low %v1750_v45, %v1766_v40  ;;  %v1098_v31 = vrot.slane %v1090_v35, %v6689_v58  ;;  %v1775_v37 = vcombine.high %v1750_v45, %v1766_v40 }
 0x395   : > { %v1121_v6 = vrot.slane %v1107_v51, %v6689_v58  ;;  %v1258_v8 = vcombine.low %v6779_v4, %v6782_v9  ;;  %v1274_v46 = vcombine.low %v6787_v21, %v6830_v53  ;;  %v1326_v11 = vcombine.low %v1301_v41, %v1309_v44 }
 0x396   : > { %v1790_v34 = vcombine.low %v1757_v63, %v1773_v43  ;;  %v1791_v10 = vcombine.high %v1757_v63, %v1773_v43  ;;  %v1342_v12 = vcombine.low %v1317_v47, %v1325_v29  ;;  %v1105_v16 = vrot.slane %v1091_v61, %v6689_v58  ;;  %v949_v61 = vpop.permute.xlu1 %948 }
 0x397   : > { %v1122_v19 = vcombine.low %v1098_v31, %v1114_v0  ;;  %v6879_v20 = vrot.slane %v1258_v8, %v6697_v7  ;;  %v6882_v23 = vrot.slane %v1274_v46, %v6697_v7  ;;  %v1782_v5 = vrot.slane %v1774_v42, %v6697_v7 }
 0x398   : > { %v1123_v25 = vcombine.high %v1098_v31, %v1114_v0  ;;  %v6886_v27 = vrot.slane %v1326_v11, %v6697_v7  ;;  %v6889_v22 = vrot.slane %v1342_v12, %v6697_v7  ;;  %v1789_v32 = vrot.slane %v1775_v37, %v6697_v7 }
 0x399   : > { %v1138_v36 = vcombine.low %v1105_v16, %v1121_v6  ;;  %v1158_v38 = vcombine.low %v6664_v48, %v937_v3  ;;  %v1259_v40 = vcombine.high %v6779_v4, %v6782_v9  ;;  %v1139_v35 = vcombine.high %v1105_v16, %v1121_v6 }
 0x39a   : > { %v1290_v51 = vcombine.low %v6879_v20, %v6882_v23  ;;  %v1358_v45 = vcombine.low %v6886_v27, %v6889_v22  ;;  %v1275_v43 = vcombine.high %v6787_v21, %v6830_v53  ;;  %v1798_v0 = vrot.slane %v1790_v34, %v6697_v7 }
 0x39b   : > { %v1130_v63 = vrot.slane %v1122_v19, %v6697_v7  ;;  %v1159_v42 = vcombine.high %v6664_v48, %v937_v3  ;;  %v1327_v31 = vcombine.high %v1301_v41, %v1309_v44  ;;  %v1137_v4 = vrot.slane %v1123_v25, %v6697_v7 }
 0x39c   : > { %v2666_v9 = vpack.c.bf16 %v1358_v45, %v1290_v51  ;;  %v6906_v37 = vrot.slane %v1259_v40, %v6697_v7  ;;  %v6909_v6 = vrot.slane %v1275_v43, %v6697_v7  ;;  %v1343_v21 = vcombine.high %v1317_v47, %v1325_v29 }
 0x39d   : > { %v6912_v8 = vrot.slane %v1327_v31, %v6697_v7  ;;  %v1174_v53 = vcombine.low %v6838_v24, %v949_v61  ;;  %v1175_v46 = vcombine.high %v6838_v24, %v949_v61  ;;  %v1805_v48 = vrot.slane %v1791_v10, %v6697_v7 }
 0x39e   : > { %v1146_v41 = vrot.slane %v1138_v36, %v6697_v7  ;;  %v1153_v44 = vrot.slane %v1139_v35, %v6697_v7  ;;  %v1166_v3 = vrot.slane %v1158_v38, %v6689_v58  ;;  %5434 = vmatprep.mubr.msk.bf16.mxu1 %vm2682_vm0, %v2666_v9  ;;  %v1173_v34 = vrot.slane %v1159_v42, %v6689_v58 }
 0x39f   : > { %v6923_v11 = vrot.slane %v1343_v21, %v6697_v7  ;;  %v1182_v47 = vrot.slane %v1174_v53, %v6689_v58  ;;  %v1189_v29 = vrot.slane %v1175_v46, %v6689_v58  ;;  %v2014_v24 = vcombine.low %v1782_v5, %v1789_v32 }
 0x3a0   : > { %v5185_v12 = vcombine.high %v1782_v5, %v1789_v32  ;;  %v1362_v10 = vcombine.low %v1130_v63, %v1137_v4  ;;  %v1292_v16 = vcombine.low %v6906_v37, %v6909_v6  ;;  %v5175_v40 = vcombine.high %v1130_v63, %v1137_v4 }
 0x3a1   : > { %v1360_v19 = vcombine.low %v6912_v8, %v6923_v11  ;;  %v1190_v25 = vcombine.low %v1166_v3, %v1182_v47  ;;  %v1191_v36 = vcombine.high %v1166_v3, %v1182_v47  ;;  %v1206_v38 = vcombine.low %v1173_v34, %v1189_v29 }
 0x3a2   : > { %v1378_v35 = vcombine.low %v1146_v41, %v1153_v44  ;;  %v5176_v51 = vcombine.high %v1146_v41, %v1153_v44  ;;  %v1207_v45 = vcombine.high %v1173_v34, %v1189_v29  ;;  %v2030_v32 = vcombine.low %v1798_v0, %v1805_v48 }
 0x3a3   : > { %v2670_v43 = vpack.c.bf16 %v1360_v19, %v1292_v16  ;;  %v1198_v61 = vrot.slane %v1190_v25, %v6697_v7  ;;  %v1205_v42 = vrot.slane %v1191_v36, %v6697_v7  ;;  %v1214_v5 = vrot.slane %v1206_v38, %v6697_v7 }
 0x3a4   : > { %v5186_v31 = vcombine.high %v1798_v0, %v1805_v48  ;;  %v1221_v9 = vrot.slane %v1207_v45, %v6697_v7  ;;  %v2021_v21 = vrot.slane %v2014_v24, %v6689_v58  ;;  %v2029_v53 = vrot.slane %v5185_v12, %v6689_v58 }
 0x3a5   : > { %5450 = vmatprep.mubr.msk.bf16.mxu0 %vm2682_vm0, %v2670_v43  ;;  %v1430_v63 = vcombine.low %v1198_v61, %v1205_v42  ;;  %v5177_v4 = vcombine.high %v1198_v61, %v1205_v42  ;;  %v1369_v46 = vrot.slane %v1362_v10, %v6689_v58  ;;  %v1377_v41 = vrot.slane %v5175_v40, %v6689_v58 }
 0x3a6   : > { %v1446_v44 = vcombine.low %v1214_v5, %v1221_v9  ;;  %v5178_v3 = vcombine.high %v1214_v5, %v1221_v9  ;;  %v1385_v34 = vrot.slane %v1378_v35, %v6689_v58  ;;  %v1393_v0 = vrot.slane %v5176_v51, %v6689_v58 }
 0x3a7   : > { %v1978_v48 = vcombine.low %v6854_v2, %v6859_v59  ;;  %v1994_v47 = vcombine.low %v6862_v60, %v6868_v62  ;;  %v1437_v29 = vrot.slane %v1430_v63, %v6689_v58  ;;  %v1445_v24 = vrot.slane %v5177_v4, %v6689_v58 }
 0x3a8   : > { %v1453_v12 = vrot.slane %v1446_v44, %v6689_v58  ;;  %v1461_v10 = vrot.slane %v5178_v3, %v6689_v58  ;;  %v2037_v16 = vrot.slane %v2030_v32, %v6689_v58  ;;  %v2045_v19 = vrot.slane %v5186_v31, %v6689_v58 }
 0x3a9   : > { %v1394_v25 = vcombine.low %v1369_v46, %v1377_v41  ;;  %v1410_v36 = vcombine.low %v1385_v34, %v1393_v0  ;;  %v1986_v38 = vrot.slane %v1978_v48, %v6697_v7  ;;  %v1462_v40 = vcombine.low %v1437_v29, %v1445_v24 }
 0x3aa   : > { %v1478_v35 = vcombine.low %v1453_v12, %v1461_v10  ;;  %v2002_v51 = vrot.slane %v1994_v47, %v6697_v7  ;;  %v2046_v45 = vcombine.low %v2021_v21, %v2029_v53  ;;  %v2062_v43 = vcombine.low %v2037_v16, %v2045_v19 }
 0x3ab   : > { %v1979_v61 = vcombine.high %v6854_v2, %v6859_v59  ;;  %v1995_v42 = vcombine.high %v6862_v60, %v6868_v62  ;;  %v2047_v5 = vcombine.high %v2021_v21, %v2029_v53  ;;  %v1463_v32 = vcombine.high %v1437_v29, %v1445_v24 }
 0x3ac   : > { %v1479_v9 = vcombine.high %v1453_v12, %v1461_v10  ;;  %v2054_v31 = vrot.slane %v2046_v45, %v6697_v7  ;;  %v2063_v63 = vcombine.high %v2037_v16, %v2045_v19  ;;  %v2070_v4 = vrot.slane %v2062_v43, %v6697_v7 }
 0x3ad   : > { %v6961_v44 = vrot.slane %v1979_v61, %v6697_v7  ;;  %v6964_v3 = vrot.slane %v1995_v42, %v6697_v7  ;;  %v6967_v48 = vrot.slane %v2047_v5, %v6697_v7  ;;  %v1395_v2 = vcombine.high %v1369_v46, %v1377_v41 }
 0x3ae   : > { %v1411_v59 = vcombine.high %v1385_v34, %v1393_v0  ;;  %v1470_v60 = vrot.slane %v1462_v40, %v6697_v7  ;;  %v2077_v62 = vrot.slane %v2063_v63, %v6697_v7  ;;  %v1486_v21 = vrot.slane %v1478_v35, %v6697_v7 }
 0x3af   : > { %v2010_v53 = vcombine.low %v1986_v38, %v2002_v51  ;;  %v2078_v47 = vcombine.low %v2054_v31, %v2070_v4  ;;  %v1943_v29 = vcombine.high %v6791_v30, %v6803_v56  ;;  %v1477_v24 = vrot.slane %v1463_v32, %v6697_v7 }
 0x3b0   : > { %v1493_v12 = vrot.slane %v1479_v9, %v6697_v7  ;;  %v2012_v10 = vcombine.low %v6961_v44, %v6964_v3  ;;  %v2080_v46 = vcombine.low %v6967_v48, %v2077_v62  ;;  %v1402_v41 = vrot.slane %v1394_v25, %v6697_v7 }
 0x3b1   : > { %v1418_v34 = vrot.slane %v1410_v36, %v6697_v7  ;;  %v2675_v0 = vpack.c.bf16 %v2078_v47, %v2010_v53  ;;  %v1875_v16 = vcombine.high %v6743_v26, %v6757_v52  ;;  %v1409_v19 = vrot.slane %v1395_v2, %v6697_v7 }
 0x3b2   : > { %v1425_v30 = vrot.slane %v1411_v59, %v6697_v7  ;;  %v2679_v56 = vpack.c.bf16 %v2080_v46, %v2012_v10  ;;  %v1494_v45 = vcombine.low %v1470_v60, %v1486_v21  ;;  %v1496_v43 = vcombine.low %v1477_v24, %v1493_v12 }
 0x3b3   : > { %5515 = vmatprep.subr.msk.bf16.mxu1 %vm2682_vm0, %v2675_v0  ;;  %v2693_v40 = vsel %vm2682_vm0, %v2675_v0, 0  ;;  %v2676_v35 = vpack.c.bf16 %v1943_v29, %v1875_v16  ;;  %v1426_v26 = vcombine.low %v1402_v41, %v1418_v34  ;;  %v2079_v61 = vcombine.high %v2054_v31, %v2070_v4 }
 0x3b4   : > { %5519 = vmatprep.subr.msk.bf16.mxu0 %vm2682_vm0, %v2679_v56  ;;  %5433 = vmatpush3.bf16.xpose.msra.mxu1 %v2693_v40  ;;  %v2815_v25 = vsel %vm2682_vm0, %v2679_v56, 0  ;;  %v1428_v52 = vcombine.low %v1409_v19, %v1425_v30  ;;  %v1359_v42 = vcombine.high %v6886_v27, %v6889_v22  ;;  %v2011_v32 = vcombine.high %v1986_v38, %v2002_v51 }
 0x3b5   : > { %5449 = vmatpush3.bf16.xpose.msra.mxu0 %v2815_v25  ;;  %5516 = vmatprep.subr.msk.bf16.mxu1 %vm2682_vm0, %v2676_v35  ;;  %v2667_v36 = vpack.c.bf16 %v1494_v45, %v1426_v26  ;;  %v1291_v9 = vcombine.high %v6879_v20, %v6882_v23  ;;  %v2751_v63 = vsel %vm2682_vm0, %v2676_v35, 0  ;;  %v1945_v27 = vcombine.high %v6812_v55, %v6815_v1 }
 0x3b6   : > { %v2671_v5 = vpack.c.bf16 %v1496_v43, %v1428_v52  ;;  %v2677_v2 = vpack.c.bf16 %v2079_v61, %v2011_v32  ;;  %v1877_v22 = vcombine.high %v6806_v57, %v6809_v54  ;;  %v1495_v38 = vcombine.high %v1470_v60, %v1486_v21 }
 0x3b7   : > { %v2668_v59 = vpack.c.bf16 %v1359_v42, %v1291_v9  ;;  %v1361_v51 = vcombine.high %v6912_v8, %v6923_v11  ;;  %v1427_v31 = vcombine.high %v1402_v41, %v1418_v34  ;;  %v2081_v4 = vcombine.high %v6967_v48, %v2077_v62 }
 0x3b8   : > { %v2754_v20 = vsel %vm2682_vm0, %v2677_v2, 0  ;;  %v2680_v23 = vpack.c.bf16 %v1945_v27, %v1877_v22  ;;  %v1293_v53 = vcombine.high %v6906_v37, %v6909_v6  ;;  %v2013_v57 = vcombine.high %v6961_v44, %v6964_v3 }
 0x3b9   : > { %v2669_v55 = vpack.c.bf16 %v1495_v38, %v1427_v31  ;;  %v1497_v11 = vcombine.high %v1477_v24, %v1493_v12  ;;  %v1429_v37 = vcombine.high %v1409_v19, %v1425_v30  ;;  %v550_v44 = vadd.s32 16, %v6592_v13 }
 0x3ba   : > { %v2672_v54 = vpack.c.bf16 %v1361_v51, %v1293_v53  ;;  %v2873_v1 = vsel %vm2682_vm0, %v2680_v23, 0  ;;  %v2681_v47 = vpack.c.bf16 %v2081_v4, %v2013_v57  ;;  %v553_v3 = vand.u32 127, %v547_v14 }
 0x3bb   : > { %5435 = vmatmul.mubr.msk.bf16.vlgmr.msra.gmra.mrb[4].mxu1 %vm2682_vm0, %v2667_v36  ;;  %v2673_v6 = vpack.c.bf16 %v1497_v11, %v1429_v37  ;;  %v551_v48 = vadd.s32 24, %v6592_v13  ;;  %v6211_v60 = vmov -1e+30   ;;  %v549_v21 = vadd.s32 8, %v6592_v13 }
 0x3bc   : > { %5439 = vmatpush3.bf16.xpose.msra.mxu1 %v2751_v63  ;;  %5451 = vmatmul.mubr.msk.bf16.vlgmr.msra.gmra.mrb[8].mxu0 %vm2682_vm0, %v2671_v5  ;;  %v2876_v8 = vsel %vm2682_vm0, %v2681_v47, 0  ;;  %vm556_vm1 = vcmp.le.s32.totalorder %v553_v3, %v550_v44  ;;  %vm554_vm3 = vcmp.le.s32.totalorder %v553_v3, %v6592_v13 }
 0x3bd   : > { %5517 = vmatprep.subr.msk.bf16.mxu1 %vm2682_vm0, %v2677_v2  ;;  %5442 = vmatprep.mubr.msk.bf16.mxu1 %vm2682_vm0, %v2668_v59  ;;  %vm557_vm2 = vcmp.le.s32.totalorder %v553_v3, %v551_v48  ;;  %v560_v62 = vsel %vm556_vm1, 0.0, %v6211_v60  ;;  %vm555_vm4 = vcmp.le.s32.totalorder %v553_v3, %v549_v21  ;;  %v558_v56 = vsel %vm554_vm3, 0.0, %v6211_v60  ;;  %v2087_v21 = vpop.permute.xlu0 %2086 }
 0x3be   : > { %v561_v10 = vsel %vm557_vm2, 0.0, %v6211_v60  ;;  %v559_v43 = vsel %vm555_vm4, 0.0, %v6211_v60 }
 0x3c4   : > { %5441 = vmatpush3.bf16.xpose.msra.mxu1 %v2754_v20 }
 0x3c5   : > { %5520 = vmatprep.subr.msk.bf16.mxu1 %vm2682_vm0, %v2680_v23 }
 0x3cb   : > { %5443 = vmatmul.mubr.msk.bf16.vlgmr.msra.gmra.mrb[8].mxu1 %vm2682_vm0, %v2669_v55 }
 0x3cc   : > { %5455 = vmatpush3.bf16.xpose.msra.mxu1 %v2873_v1  ;;  %5458 = vmatprep.mubr.msk.bf16.mxu1 %vm2682_vm0, %v2672_v54 }
 0x3cd   : > { %5521 = vmatprep.subr.msk.bf16.mxu1 %vm2682_vm0, %v2681_v47 }
 0x3d4   : > { %5457 = vmatpush3.bf16.xpose.msra.mxu1 %v2876_v8 }
 0x3db   : > { %5459 = vmatmul.mubr.msk.bf16.vlgmr.msra.gmra.mrb[12].mxu1 %vm2682_vm0, %v2673_v6 }
 0x48e   : > { %v5436_v29 = vpop.f32.mrb[4].mxu1 }
 0x48f   : > { %v7022_v46 = vadd.f32 %v5436_v29, %v560_v62  ;;  %v5452_v24 = vpop.f32.mrb[8].mxu0  ;;  %v2729_v12 = vpop.f32.mrb[5].mxu1 }
 0x490   : > { %v2851_v41 = vpop.f32.mrb[9].mxu0  ;;  %v5437_v34 = vpop.f32.mrb[6].mxu1  ;;  %v7025_v0 = vadd.f32 %v5452_v24, %v560_v62  ;;  %v7035_v25 = vadd.f32 %v2729_v12, %v558_v56 }
 0x491   : > { %v7027_v14 = vadd.f32 %v5437_v34, %v561_v10  ;;  %v5453_v16 = vpop.f32.mrb[10].mxu0  ;;  %v2732_v19 = vpop.f32.mrb[7].mxu1  ;;  %v2933_v30 = vsel %vm2682_vm0, %v7022_v46, -inf  ;;  %v7043_v61 = vadd.f32 %v2851_v41, %v558_v56 }
 0x492   : > { %v2854_v40 = vpop.f32.mrb[11].mxu0  ;;  %2934 = vmax.xlane.f32.xlu0 %v2933_v30  ;;  %v7031_v35 = vadd.f32 %v5453_v16, %v561_v10  ;;  %v2957_v26 = vsel %vm2682_vm0, %v7025_v0, -inf  ;;  %v7039_v52 = vadd.f32 %v2732_v19, %v559_v43  ;;  %v2927_v42 = vsel %vm2682_vm0, %v7035_v25, -inf }
 0x493   : > { %v2936_v45 = vsel %vm2682_vm0, %v7027_v14, -inf  ;;  %v7047_v5 = vadd.f32 %v2854_v40, %v559_v43  ;;  %v2951_v9 = vsel %vm2682_vm0, %v7043_v61, -inf }
 0x494   : > { %2937 = vmax.xlane.f32.xlu1 %v2936_v45  ;;  %v2960_v36 = vsel %vm2682_vm0, %v7031_v35, -inf  ;;  %v2930_v32 = vsel %vm2682_vm0, %v7039_v52, -inf }
 0x495   : > { %v2954_v27 = vsel %vm2682_vm0, %v7047_v5, -inf }
 0x496   : > { %2958 = vmax.xlane.f32.xlu0 %v2957_v26 }
 0x498   : > { %2961 = vmax.xlane.f32.xlu1 %v2960_v36 }
 0x49a   : > { %2928 = vmax.xlane.f32.xlu0 %v2927_v42 }
 0x49c   : > { %2931 = vmax.xlane.f32.xlu1 %v2930_v32 }
 0x49e   : > { %v5444_v63 = vpop.f32.mrb[8].mxu1  ;;  %2952 = vmax.xlane.f32.xlu0 %v2951_v9 }
 0x49f   : > { %v7053_v2 = vadd.f32 %v5444_v63, %v560_v62  ;;  %v2790_v59 = vpop.f32.mrb[9].mxu1 }
 0x4a0   : > { %v5445_v22 = vpop.f32.mrb[10].mxu1  ;;  %2955 = vmax.xlane.f32.xlu1 %v2954_v27  ;;  %v7057_v20 = vadd.f32 %v2790_v59, %v558_v56 }
 0x4a1   : > { %v7059_v23 = vadd.f32 %v5445_v22, %v561_v10  ;;  %v2793_v38 = vpop.f32.mrb[11].mxu1  ;;  %v2945_v51 = vsel %vm2682_vm0, %v7053_v2, -inf }
 0x4a2   : > { %2946 = vmax.xlane.f32.xlu0 %v2945_v51  ;;  %v7065_v4 = vadd.f32 %v2793_v38, %v559_v43  ;;  %v2939_v53 = vsel %vm2682_vm0, %v7057_v20, -inf }
 0x4a3   : > { %v2948_v31 = vsel %vm2682_vm0, %v7059_v23, -inf }
 0x4a4   : > { %2949 = vmax.xlane.f32.xlu1 %v2948_v31  ;;  %v2942_v55 = vsel %vm2682_vm0, %v7065_v4, -inf }
 0x4a6   : > { %2940 = vmax.xlane.f32.xlu0 %v2939_v53 }
 0x4aa   : > { %2943 = vmax.xlane.f32.xlu0 %v2942_v55 }
 0x4ae   : > { %v5460_v57 = vpop.f32.mrb[12].mxu1 }
 0x4af   : > { %v7071_v54 = vadd.f32 %v5460_v57, %v560_v62  ;;  %v2912_v1 = vpop.f32.mrb[13].mxu1  ;;  %v7101_v62 = vpop.permute.xlu1 %2088 }
 0x4b0   : > { %v5461_v47 = vpop.f32.mrb[14].mxu1  ;;  %v7073_v8 = vadd.f32 %v2912_v1, %v558_v56 }
 0x4b1   : > { %v7075_v11 = vadd.f32 %v5461_v47, %v561_v10  ;;  %v2915_v37 = vpop.f32.mrb[15].mxu1  ;;  %v2969_v6 = vsel %vm2682_vm0, %v7071_v54, -inf  ;;  %v2111_v10 = vpop.permute.xlu0 %2110 }
 0x4b2   : > { %2970 = vmax.xlane.f32.xlu0 %v2969_v6  ;;  %v7079_v44 = vadd.f32 %v2915_v37, %v559_v43  ;;  %v2963_v48 = vsel %vm2682_vm0, %v7073_v8, -inf  ;;  %v2138_v51 = vcombine.low %v2087_v21, %v2111_v10  ;;  %v2139_v47 = vcombine.high %v2087_v21, %v2111_v10 }
 0x4b3   : > { %v2972_v3 = vsel %vm2682_vm0, %v7075_v11, -inf  ;;  %v2099_v29 = vpop.permute.xlu1 %2098 }
 0x4b4   : > { %2973 = vmax.xlane.f32.xlu1 %v2972_v3  ;;  %v2966_v60 = vsel %vm2682_vm0, %v7079_v44, -inf  ;;  %v2153_v21 = vrot.slane %v2139_v47, %v6689_v58 }
 0x4b6   : > { %2964 = vmax.xlane.f32.xlu0 %v2963_v48 }
 0x4b7   : > { %v7103_v24 = vpop.permute.xlu1 %2100 }
 0x4b8   : > { %2967 = vmax.xlane.f32.xlu1 %v2966_v60 }
 0x4c9   : > { %2112 = vrot.lane.b32.xlu1 %v6680_v50, %s6208_s22 }
 0x4cc   : > { %2090 = vrot.lane.b32.xlu0 %v6612_v28, %s6207_s21 }
 0x4cd   : > { %2092 = vrot.lane.b32.xlu1 %v6616_v33, %s6207_s21 }
 0x4d0   : > { %2102 = vrot.lane.b32.xlu0 %v6612_v28, %s6206_s29 }
 0x4d1   : > { %2104 = vrot.lane.b32.xlu1 %v6616_v33, %s6206_s29 }
 0x4d4   : > { %2114 = vrot.lane.b32.xlu0 %v6612_v28, %s6208_s22 }
 0x4d5   : > { %2116 = vrot.lane.b32.xlu1 %v6616_v33, %s6208_s22 }
 0x51f   : > { %v2935_v12 = vpop.xlane.xlu0 %2934 }
 0x520   : > { %v2977_v41 = vsub.f32 %v7022_v46, %v2935_v12 }
 0x521   : > { %v2938_v34 = vpop.xlane.xlu1 %2937 }
 0x522   : > { %v2995_v16 = vmul.f32 1.442695, %v2977_v41  ;;  %v2978_v19 = vsub.f32 %v7027_v14, %v2938_v34 }
 0x523   : > { %v2959_v30 = vpop.xlane.xlu0 %2958 }
 0x524   : > { %5804 = vpow2.f32 %v2995_v16  ;;  %v2997_v56 = vmul.f32 1.442695, %v2978_v19  ;;  %v2985_v55 = vsub.f32 %v7025_v0, %v2959_v30 }
 0x525   : > { %v7107_v40 = vpop.xlane.xlu1 %2961 }
 0x526   : > { %5806 = vpow2.f32 %v2997_v56 }
 0x527   : > { %v2929_v45 = vpop.xlane.xlu0 %2928 }
 0x528   : > { %v2975_v43 = vsub.f32 %v7035_v25, %v2929_v45  ;;  %v2122_v25 = vcombine.low %v6670_v49, %v2099_v29  ;;  %v2986_v45 = vsub.f32 %v7031_v35, %v7107_v40 }
 0x529   : > { %v2932_v26 = vpop.xlane.xlu1 %2931 }
 0x52a   : > { %v2991_v36 = vmul.f32 1.442695, %v2975_v43  ;;  %v2976_v42 = vsub.f32 %v7039_v52, %v2932_v26  ;;  %v2130_v6 = vrot.slane %v2122_v25, %v6689_v58 }
 0x52b   : > { %v2953_v32 = vpop.xlane.xlu0 %2952 }
 0x52c   : > { %5808 = vpow2.f32 %v2991_v36  ;;  %v2993_v46 = vmul.f32 1.442695, %v2976_v42  ;;  %v2983_v9 = vsub.f32 %v7043_v61, %v2953_v32  ;;  %v2123_v61 = vcombine.high %v6670_v49, %v2099_v29 }
 0x52d   : > { %v2956_v63 = vpop.xlane.xlu1 %2955  ;;  %v2146_v49 = vrot.slane %v2138_v51, %v6689_v58  ;;  %v3011_v29 = vmul.f32 1.442695, %v2985_v55 }
 0x52e   : > { %v7112_v14 = vpop.eup %5804  ;;  %5810 = vpow2.f32 %v2993_v46  ;;  %v3007_v59 = vmul.f32 1.442695, %v2983_v9  ;;  %v2137_v48 = vrot.slane %v2123_v61, %v6689_v58  ;;  %v2984_v0 = vsub.f32 %v7047_v5, %v2956_v63 }
 0x52f   : > { %v2947_v27 = vpop.xlane.xlu0 %2946  ;;  %v3029_v22 = vsel %vm2682_vm0, %v7112_v14, 0.0  ;;  %v2155_v34 = vcombine.high %v2130_v6, %v2146_v49  ;;  %v3013_v63 = vmul.f32 1.442695, %v2986_v45 }
 0x530   : > { %v7116_v38 = vpop.eup %5806  ;;  %5812 = vpow2.f32 %v3007_v59  ;;  %v2981_v52 = vsub.f32 %v7053_v2, %v2947_v27  ;;  %3030 = vadd.xlane.f32.xlu0 %v3029_v22  ;;  %v2170_v19 = vcombine.low %v2137_v48, %v2153_v21  ;;  %v2171_v30 = vcombine.high %v2137_v48, %v2153_v21 }
 0x531   : > { %v2950_v31 = vpop.xlane.xlu1 %2949  ;;  %v3032_v53 = vsel %vm2682_vm0, %v7116_v38, 0.0  ;;  %v3009_v43 = vmul.f32 1.442695, %v2984_v0  ;;  %v2169_v42 = vrot.slane %v2155_v34, %v6697_v7  ;;  %v2190_v0 = vcombine.low %v6680_v50, %v7103_v24 }
 0x532   : > { %v3003_v57 = vmul.f32 1.442695, %v2981_v52  ;;  %v2982_v1 = vsub.f32 %v7059_v23, %v2950_v31  ;;  %3033 = vadd.xlane.f32.xlu1 %v3032_v53  ;;  %v2178_v32 = vrot.slane %v2170_v19, %v6697_v7  ;;  %v2185_v46 = vrot.slane %v2171_v30, %v6697_v7 }
 0x533   : > { %v2941_v37 = vpop.xlane.xlu0 %2940  ;;  %v2198_v45 = vrot.slane %v2190_v0, %v6689_v58 }
 0x534   : > { %5814 = vpow2.f32 %v3003_v57  ;;  %v3005_v2 = vmul.f32 1.442695, %v2982_v1  ;;  %v2979_v3 = vsub.f32 %v7057_v20, %v2941_v37  ;;  %v2154_v20 = vcombine.low %v2130_v6, %v2146_v49 }
 0x535   : > { %v2410_v52 = vcombine.low %v2178_v32, %v2185_v46  ;;  %v5188_v51 = vcombine.high %v2178_v32, %v2185_v46 }
 0x536   : > { %v7129_v60 = vpop.eup %5808  ;;  %5816 = vpow2.f32 %v3005_v2  ;;  %v2999_v23 = vmul.f32 1.442695, %v2979_v3 }
 0x537   : > { %v2944_v10 = vpop.xlane.xlu0 %2943  ;;  %v3023_v12 = vsel %vm2682_vm0, %v7129_v60, 0.0  ;;  %v2417_v49 = vrot.slane %v2410_v52, %v6689_v58 }
 0x538   : > { %v7135_v41 = vpop.eup %5810  ;;  %5818 = vpow2.f32 %v2999_v23  ;;  %v2980_v16 = vsub.f32 %v7065_v4, %v2944_v10  ;;  %3024 = vadd.xlane.f32.xlu0 %v3023_v12  ;;  %v2162_v4 = vrot.slane %v2154_v20, %v6697_v7 }
 0x539   : > { %v3026_v5 = vsel %vm2682_vm0, %v7135_v41, 0.0  ;;  %5820 = vpow2.f32 %v3011_v29 }
 0x53a   : > { %v7140_v56 = vpop.eup %5812  ;;  %v3001_v26 = vmul.f32 1.442695, %v2980_v16  ;;  %3027 = vadd.xlane.f32.xlu1 %v3026_v5  ;;  %v2394_v27 = vcombine.low %v2162_v4, %v2169_v42  ;;  %v5187_v25 = vcombine.high %v2162_v4, %v2169_v42 }
 0x53b   : > { %v3047_v36 = vsel %vm2682_vm0, %v7140_v56, 0.0 }
 0x53c   : > { %5822 = vpow2.f32 %v3001_v26  ;;  %3048 = vadd.xlane.f32.xlu0 %v3047_v36  ;;  %v2401_v2 = vrot.slane %v2394_v27, %v6689_v58  ;;  %v2409_v3 = vrot.slane %v5187_v25, %v6689_v58 }
 0x53d   : > { %5824 = vpow2.f32 %v3009_v43 }
 0x53e   : > { %v7150_v9 = vpop.eup %5814  ;;  %5826 = vpow2.f32 %v3013_v63  ;;  %v2426_v30 = vcombine.low %v2401_v2, %v2409_v3 }
 0x53f   : > { %v2971_v35 = vpop.xlane.xlu0 %2970  ;;  %v3041_v40 = vsel %vm2682_vm0, %v7150_v9, 0.0 }
 0x540   : > { %v7154_v59 = vpop.eup %5816  ;;  %v2989_v22 = vsub.f32 %v7071_v54, %v2971_v35  ;;  %3042 = vadd.xlane.f32.xlu0 %v3041_v40  ;;  %v7199_v40 = vrot.slane %v2426_v30, %v6697_v7 }
 0x541   : > { %v2974_v61 = vpop.xlane.xlu1 %2973  ;;  %v3044_v31 = vsel %vm2682_vm0, %v7154_v59, 0.0 }
 0x542   : > { %v7159_v53 = vpop.eup %5818  ;;  %v3019_v55 = vmul.f32 1.442695, %v2989_v22  ;;  %v2990_v57 = vsub.f32 %v7075_v11, %v2974_v61  ;;  %3045 = vadd.xlane.f32.xlu1 %v3044_v31  ;;  %v2425_v11 = vrot.slane %v5188_v51, %v6689_v58 }
 0x543   : > { %v2965_v1 = vpop.xlane.xlu0 %2964  ;;  %v3035_v47 = vsel %vm2682_vm0, %v7159_v53, 0.0  ;;  %v7164_v54 = vpop.eup %5820 }
 0x544   : > { %5828 = vpow2.f32 %v3019_v55  ;;  %v3021_v37 = vmul.f32 1.442695, %v2990_v57  ;;  %v2987_v6 = vsub.f32 %v7073_v8, %v2965_v1  ;;  %3036 = vadd.xlane.f32.xlu0 %v3035_v47  ;;  %v2191_v8 = vcombine.high %v6680_v50, %v7103_v24 }
 0x545   : > { %v2968_v48 = vpop.xlane.xlu1 %2967  ;;  %v3053_v12 = vsel %vm2682_vm0, %v7164_v54, 0.0  ;;  %v2442_v5 = vcombine.low %v2417_v49, %v2425_v11  ;;  %v2443_v4 = vcombine.high %v2417_v49, %v2425_v11 }
 0x546   : > { %v7171_v29 = vpop.eup %5822  ;;  %5830 = vpow2.f32 %v3021_v37  ;;  %v3015_v23 = vmul.f32 1.442695, %v2987_v6  ;;  %v2988_v21 = vsub.f32 %v7079_v44, %v2968_v48  ;;  %v2427_v44 = vcombine.high %v2401_v2, %v2409_v3 }
 0x547   : > { %v2091_v10 = vpop.permute.xlu0 %2090  ;;  %v3038_v20 = vsel %vm2682_vm0, %v7171_v29, 0.0  ;;  %v7182_v34 = vpop.eup %5824  ;;  %v2205_v43 = vrot.slane %v2191_v8, %v6689_v58  ;;  %v7202_v27 = vrot.slane %v2442_v5, %v6697_v7  ;;  %v7214_v47 = vrot.slane %v2443_v4, %v6697_v7 }
 0x548   : > { %v3017_v16 = vmul.f32 1.442695, %v2988_v21  ;;  %3054 = vadd.xlane.f32.xlu0 %v3053_v12  ;;  %3039 = vadd.xlane.f32.xlu1 %v3038_v20  ;;  %5832 = vpow2.f32 %v3015_v23  ;;  %v3050_v36 = vsel %vm2682_vm0, %v7182_v34, 0.0  ;;  %v7190_v42 = vpop.eup %5826  ;;  %v7205_v22 = vrot.slane %v2427_v44, %v6697_v7 }
 0x549   : > { %v2113_v19 = vpop.permute.xlu1 %2112  ;;  %v3056_v1 = vsel %vm2682_vm0, %v7190_v42, 0.0 }
 0x54a   : > { %v2206_v50 = vcombine.low %v7101_v62, %v2113_v19  ;;  %v2207_v24 = vcombine.high %v7101_v62, %v2113_v19  ;;  %5834 = vpow2.f32 %v3017_v16 }
 0x54b   : > { %v2103_v26 = vpop.permute.xlu0 %2102 }
 0x54c   : > { %v2214_v32 = vrot.slane %v2206_v50, %v6689_v58  ;;  %v2221_v46 = vrot.slane %v2207_v24, %v6689_v58  ;;  %v2258_v63 = vcombine.low %v6612_v28, %v2103_v26  ;;  %v2259_v35 = vcombine.high %v6612_v28, %v2103_v26  ;;  %3051 = vadd.xlane.f32.xlu1 %v3050_v36 }
 0x54d   : > { %v7196_v62 = vpop.permute.xlu1 %2092 }
 0x54e   : > { %v7207_v25 = vpop.eup %5828  ;;  %v2222_v52 = vcombine.low %v2198_v45, %v2214_v32  ;;  %v2223_v51 = vcombine.high %v2198_v45, %v2214_v32  ;;  %v2238_v61 = vcombine.low %v2205_v43, %v2221_v46  ;;  %v2239_v31 = vcombine.high %v2205_v43, %v2221_v46 }
 0x54f   : > { %v2266_v28 = vrot.slane %v2258_v63, %v6689_v58  ;;  %v2273_v55 = vrot.slane %v2259_v35, %v6689_v58  ;;  %v2115_v57 = vpop.permute.xlu0 %2114  ;;  %v3065_v21 = vsel %vm2682_vm0, %v7207_v25, 0.0 }
 0x550   : > { %v7216_v37 = vpop.eup %5830  ;;  %v2230_v6 = vrot.slane %v2222_v52, %v6697_v7  ;;  %v2237_v2 = vrot.slane %v2223_v51, %v6697_v7  ;;  %v2246_v3 = vrot.slane %v2238_v61, %v6697_v7  ;;  %v2253_v49 = vrot.slane %v2239_v31, %v6697_v7  ;;  %3057 = vadd.xlane.f32.xlu1 %v3056_v1 }
 0x551   : > { %v2274_v11 = vcombine.low %v2091_v10, %v2115_v57  ;;  %v2275_v48 = vcombine.high %v2091_v10, %v2115_v57  ;;  %v2105_v0 = vpop.permute.xlu1 %2104  ;;  %v3068_v23 = vsel %vm2682_vm0, %v7216_v37, 0.0 }
 0x552   : > { %v2462_v8 = vcombine.low %v2230_v6, %v2237_v2  ;;  %v5189_v12 = vcombine.high %v2230_v6, %v2237_v2  ;;  %v2478_v20 = vcombine.low %v2246_v3, %v2253_v49  ;;  %v5190_v16 = vcombine.high %v2246_v3, %v2253_v49  ;;  %v7226_v19 = vpop.eup %5832 }
 0x553   : > { %v2282_v30 = vrot.slane %v2274_v11, %v6689_v58  ;;  %v2289_v5 = vrot.slane %v2275_v48, %v6689_v58  ;;  %v2326_v44 = vcombine.low %v6616_v33, %v2105_v0  ;;  %v2327_v10 = vcombine.high %v6616_v33, %v2105_v0 }
 0x554   : > { %v2469_v45 = vrot.slane %v2462_v8, %v6689_v58  ;;  %v2477_v50 = vrot.slane %v5189_v12, %v6689_v58  ;;  %v7235_v24 = vrot.slane %v2478_v20, %v6689_v58  ;;  %v7238_v43 = vrot.slane %v5190_v16, %v6689_v58  ;;  %3069 = vadd.xlane.f32.xlu1 %v3068_v23  ;;  %v7240_v26 = vpop.eup %5834 }
 0x555   : > { %v2290_v36 = vcombine.low %v2266_v28, %v2282_v30  ;;  %v2291_v4 = vcombine.high %v2266_v28, %v2282_v30  ;;  %v2306_v32 = vcombine.low %v2273_v55, %v2289_v5  ;;  %v2307_v46 = vcombine.high %v2273_v55, %v2289_v5  ;;  %v2117_v63 = vpop.permute.xlu1 %2116 }
 0x556   : > { %v2334_v33 = vrot.slane %v2326_v44, %v6689_v58  ;;  %v2341_v35 = vrot.slane %v2327_v10, %v6689_v58  ;;  %v3059_v52 = vsel %vm2682_vm0, %v7226_v19, 0.0  ;;  %v2342_v51 = vcombine.low %v7196_v62, %v2117_v63 }
 0x557   : > { %v2298_v61 = vrot.slane %v2290_v36, %v6697_v7  ;;  %v2305_v31 = vrot.slane %v2291_v4, %v6697_v7  ;;  %v2314_v57 = vrot.slane %v2306_v32, %v6697_v7  ;;  %v2321_v28 = vrot.slane %v2307_v46, %v6697_v7  ;;  %3060 = vadd.xlane.f32.xlu0 %v3059_v52 }
 0x558   : > { %v2343_v55 = vcombine.high %v7196_v62, %v2117_v63  ;;  %v2350_v1 = vrot.slane %v2342_v51, %v6689_v58  ;;  %v3062_v6 = vsel %vm2682_vm0, %v7240_v26, 0.0  ;;  %v2494_v2 = vcombine.low %v2469_v45, %v2477_v50 }
 0x559   : > { %v2530_v3 = vcombine.low %v2298_v61, %v2305_v31  ;;  %v5191_v49 = vcombine.high %v2298_v61, %v2305_v31  ;;  %v2546_v11 = vcombine.low %v2314_v57, %v2321_v28  ;;  %v5192_v48 = vcombine.high %v2314_v57, %v2321_v28 }
 0x55a   : > { %v2357_v0 = vrot.slane %v2343_v55, %v6689_v58  ;;  %v2358_v23 = vcombine.low %v2334_v33, %v2350_v1  ;;  %v2359_v8 = vcombine.high %v2334_v33, %v2350_v1  ;;  %v2502_v12 = vrot.slane %v2494_v2, %v6697_v7 }
 0x55b   : > { %v2537_v20 = vrot.slane %v2530_v3, %v6689_v58  ;;  %v2545_v62 = vrot.slane %v5191_v49, %v6689_v58  ;;  %v2553_v16 = vrot.slane %v2546_v11, %v6689_v58  ;;  %v2561_v30 = vrot.slane %v5192_v48, %v6689_v58  ;;  %3063 = vadd.xlane.f32.xlu0 %v3062_v6 }
 0x55c   : > { %v2366_v5 = vrot.slane %v2358_v23, %v6697_v7  ;;  %v2373_v44 = vrot.slane %v2359_v8, %v6697_v7  ;;  %v2374_v10 = vcombine.low %v2341_v35, %v2357_v0  ;;  %v2375_v36 = vcombine.high %v2341_v35, %v2357_v0 }
 0x55d   : > { %v2510_v4 = vcombine.low %v7235_v24, %v7238_v43  ;;  %v2562_v32 = vcombine.low %v2537_v20, %v2545_v62  ;;  %v2578_v46 = vcombine.low %v2553_v16, %v2561_v30  ;;  %v2495_v63 = vcombine.high %v2469_v45, %v2477_v50 }
 0x55e   : > { %v2382_v33 = vrot.slane %v2374_v10, %v6697_v7  ;;  %v2389_v52 = vrot.slane %v2375_v36, %v6697_v7  ;;  %v2598_v51 = vcombine.low %v2366_v5, %v2373_v44  ;;  %v5193_v61 = vcombine.high %v2366_v5, %v2373_v44 }
 0x55f   : > { %3066 = vadd.xlane.f32.xlu0 %v3065_v21  ;;  %v2458_v31 = vcombine.low %v7199_v40, %v7202_v27  ;;  %v2518_v57 = vrot.slane %v2510_v4, %v6697_v7  ;;  %v2459_v35 = vcombine.high %v7199_v40, %v7202_v27  ;;  %v2570_v28 = vrot.slane %v2562_v32, %v6697_v7 }
 0x560   : > { %v2605_v55 = vrot.slane %v2598_v51, %v6689_v58  ;;  %v2613_v45 = vrot.slane %v5193_v61, %v6689_v58  ;;  %v2614_v50 = vcombine.low %v2382_v33, %v2389_v52  ;;  %v5194_v1 = vcombine.high %v2382_v33, %v2389_v52 }
 0x561   : > { %v2526_v6 = vcombine.low %v2502_v12, %v2518_v57  ;;  %v2527_v2 = vcombine.high %v2502_v12, %v2518_v57  ;;  %v2586_v21 = vrot.slane %v2578_v46, %v6697_v7  ;;  %v2509_v3 = vrot.slane %v2495_v63, %v6697_v7 }
 0x562   : > { %v2621_v49 = vrot.slane %v2614_v50, %v6689_v58  ;;  %v2629_v11 = vrot.slane %v5194_v1, %v6689_v58  ;;  %v2630_v48 = vcombine.low %v2605_v55, %v2613_v45  ;;  %v2511_v40 = vcombine.high %v7235_v24, %v7238_v43 }
 0x563   : > { %v3111_v27 = vpack.c.bf16 %v2526_v6, %v2458_v31  ;;  %v3113_v0 = vpack.c.bf16 %v2527_v2, %v2459_v35  ;;  %v2563_v23 = vcombine.high %v2537_v20, %v2545_v62  ;;  %v2579_v8 = vcombine.high %v2553_v16, %v2561_v30 }
 0x564   : > { %v2638_v5 = vrot.slane %v2630_v48, %v6697_v7  ;;  %v2646_v44 = vcombine.low %v2621_v49, %v2629_v11  ;;  %v2525_v12 = vrot.slane %v2511_v40, %v6697_v7  ;;  %v2631_v10 = vcombine.high %v2605_v55, %v2613_v45 }
 0x565   : > { %5462 = vmatprep.subr.bf16.mxu0 %v3111_v27  ;;  %5470 = vmatprep.subr.bf16.mxu1 %v3113_v0  ;;  %v2577_v36 = vrot.slane %v2563_v23, %v6697_v7  ;;  %v2593_v4 = vrot.slane %v2579_v8, %v6697_v7  ;;  %v2647_v32 = vcombine.high %v2621_v49, %v2629_v11 }
 0x566   : > { %5463 = vmatpush3.bf16.msra.mxu0 %v3111_v27  ;;  %5471 = vmatpush3.bf16.msra.mxu1 %v3113_v0  ;;  %v2594_v24 = vcombine.low %v2570_v28, %v2586_v21  ;;  %v2654_v43 = vrot.slane %v2646_v44, %v6697_v7  ;;  %v2595_v20 = vcombine.high %v2570_v28, %v2586_v21 }
 0x567   : > { %v2596_v62 = vcombine.low %v2577_v36, %v2593_v4  ;;  %v2645_v16 = vrot.slane %v2631_v10, %v6697_v7  ;;  %v2661_v30 = vrot.slane %v2647_v32, %v6697_v7  ;;  %v2597_v46 = vcombine.high %v2577_v36, %v2593_v4 }
 0x568   : > { %v2662_v63 = vcombine.low %v2638_v5, %v2654_v43  ;;  %v2663_v33 = vcombine.high %v2638_v5, %v2654_v43  ;;  %v2528_v52 = vcombine.low %v2509_v3, %v2525_v12  ;;  %v2529_v51 = vcombine.high %v2509_v3, %v2525_v12 }
 0x569   : > { %v2664_v61 = vcombine.low %v2645_v16, %v2661_v30  ;;  %v2665_v31 = vcombine.high %v2645_v16, %v2661_v30  ;;  %v2460_v55 = vcombine.low %v7205_v22, %v7214_v47  ;;  %v2461_v28 = vcombine.high %v7205_v22, %v7214_v47 }
 0x56a   : > { %v3112_v57 = vpack.c.bf16 %v2662_v63, %v2594_v24  ;;  %v3114_v35 = vpack.c.bf16 %v2663_v33, %v2595_v20 }
 0x56b   : > { %v3116_v45 = vpack.c.bf16 %v2664_v61, %v2596_v62  ;;  %v7292_v50 = vpack.c.bf16 %v2665_v31, %v2597_v46  ;;  %v3115_v1 = vpack.c.bf16 %v2528_v52, %v2460_v55  ;;  %v3117_v6 = vpack.c.bf16 %v2529_v51, %v2461_v28 }
 0x56c   : > { %5464 = vmatprep.subr.bf16.mxu0 %v3112_v57  ;;  %5472 = vmatprep.subr.bf16.mxu1 %v3114_v35 }
 0x56d   : > { %5465 = vmatpush3.bf16.msra.mxu0 %v3112_v57  ;;  %5473 = vmatpush3.bf16.msra.mxu1 %v3114_v35 }
 0x56e   : > { %5478 = vmatprep.subr.bf16.mxu0 %v3115_v1  ;;  %5486 = vmatprep.subr.bf16.mxu1 %v3117_v6 }
 0x5bd   : > { %v3031_v2 = vpop.xlane.xlu0 %3030 }
 0x5bf   : > { %v3034_v21 = vpop.xlane.xlu1 %3033 }
 0x5c0   : > { %5836 = vrcp.f32 %v3034_v21 }
 0x5c5   : > { %v3025_v3 = vpop.xlane.xlu0 %3024 }
 0x5c6   : > { %5838 = vrcp.f32 %v3025_v3 }
 0x5c7   : > { %5840 = vrcp.f32 %v3031_v2  ;;  %v3028_v49 = vpop.xlane.xlu1 %3027 }
 0x5c8   : > { %5842 = vrcp.f32 %v3028_v49  ;;  %v5708_v49 = vld [vmem:[#allocation10] sm:$0xff]  }
 0x5c9   : > { %v3049_v22 = vpop.xlane.xlu0 %3048 }
 0x5ca   : > { %v5837_v11 = vpop.eup %5836 }
 0x5cb   : > { %v3090_v8 = vmul.f32 %v5837_v11, %v7116_v38 }
 0x5cd   : > { %v3043_v47 = vpop.xlane.xlu0 %3042 }
 0x5cf   : > { %v3046_v40 = vpop.xlane.xlu1 %3045 }
 0x5d0   : > { %v5839_v48 = vpop.eup %5838  ;;  %5844 = vrcp.f32 %v3046_v40 }
 0x5d1   : > { %v5841_v27 = vpop.eup %5840  ;;  %v3037_v0 = vpop.xlane.xlu0 %3036  ;;  %v3087_v5 = vmul.f32 %v5839_v48, %v7129_v60 }
 0x5d2   : > { %v5843_v23 = vpop.eup %5842  ;;  %v3089_v12 = vmul.f32 %v5841_v27, %v7112_v14  ;;  %5846 = vrcp.f32 %v3037_v0 }
 0x5d3   : > { %v3088_v44 = vmul.f32 %v5843_v23, %v7135_v41  ;;  %5848 = vrcp.f32 %v3043_v47 }
 0x5d4   : > { %v3104_v4 = vpack.c.bf16 %v3090_v8, %v3089_v12 }
 0x5d5   : > { %v3040_v10 = vpop.xlane.xlu1 %3039  ;;  %v3103_v36 = vpack.c.bf16 %v3088_v44, %v3087_v5  ;;  %v3055_v32 = vpop.xlane.xlu0 %3054 }
 0x5d6   : > { %5850 = vrcp.f32 %v3040_v10 }
 0x5d7   : > { %5466 = vmatprep.mubr.msk.bf16.mxu0 %vm2682_vm0, %v3103_v36  ;;  %5852 = vrcp.f32 %v3049_v22  ;;  %v5709_v22 = vld [vmem:[#allocation10 + $0x8] sm:$0xff]  }
 0x5d8   : > { %5467 = vmatmul.mubr.msk.bf16.vlgmr.msra.gmra.mrb[12].mxu0 %vm2682_vm0, %v3104_v4 }
 0x5d9   : > { %5479 = vmatpush3.bf16.msra.mxu0 %v3115_v1  ;;  %v3052_v38 = vpop.xlane.xlu1 %3051 }
 0x5da   : > { %5854 = vrcp.f32 %v3052_v38  ;;  %5480 = vmatprep.subr.bf16.mxu0 %v3116_v45  ;;  %v5845_v60 = vpop.eup %5844 }
 0x5db   : > { %5856 = vrcp.f32 %v3055_v32  ;;  %v3094_v20 = vmul.f32 %v5845_v60, %v7154_v59 }
 0x5dc   : > { %v5847_v41 = vpop.eup %5846 }
 0x5dd   : > { %5481 = vmatpush3.bf16.msra.mxu0 %v3116_v45  ;;  %v3058_v14 = vpop.xlane.xlu1 %3057  ;;  %v5849_v24 = vpop.eup %5848  ;;  %v3091_v62 = vmul.f32 %v5847_v41, %v7159_v53 }
 0x5de   : > { %5858 = vrcp.f32 %v3058_v14  ;;  %v3093_v46 = vmul.f32 %v5849_v24, %v7150_v9  ;;  %5494 = vmatprep.subr.bf16.mxu0 %v5708_v49 }
 0x5e0   : > { %v5851_v43 = vpop.eup %5850  ;;  %v3106_v51 = vpack.c.bf16 %v3094_v20, %v3093_v46 }
 0x5e1   : > { %v3092_v16 = vmul.f32 %v5851_v43, %v7171_v29  ;;  %v5853_v30 = vpop.eup %5852  ;;  %v3070_v29 = vpop.xlane.xlu1 %3069 }
 0x5e2   : > { %v3095_v61 = vmul.f32 %v5853_v30, %v7140_v56 }
 0x5e3   : > { %v3105_v63 = vpack.c.bf16 %v3092_v16, %v3091_v62 }
 0x5e4   : > { %v5855_v33 = vpop.eup %5854  ;;  %v3061_v52 = vpop.xlane.xlu0 %3060 }
 0x5e5   : > { %5474 = vmatprep.mubr.msk.bf16.mxu1 %vm2682_vm0, %v3105_v63  ;;  %v3096_v31 = vmul.f32 %v5855_v33, %v7182_v34  ;;  %v5857_v57 = vpop.eup %5856  ;;  %5860 = vrcp.f32 %v3061_v52 }
 0x5e6   : > { %5475 = vmatmul.mubr.msk.bf16.vlgmr.msra.gmra.mrb[16].mxu1 %vm2682_vm0, %v3106_v51  ;;  %v3097_v9 = vmul.f32 %v5857_v57, %v7164_v54 }
 0x5e7   : > { %5487 = vmatpush3.bf16.msra.mxu1 %v3117_v6  ;;  %v3107_v59 = vpack.c.bf16 %v3096_v31, %v3095_v61 }
 0x5e8   : > { %v5859_v53 = vpop.eup %5858  ;;  %v3064_v35 = vpop.xlane.xlu0 %3063  ;;  %5488 = vmatprep.subr.bf16.mxu1 %v7292_v50 }
 0x5e9   : > { %v3098_v55 = vmul.f32 %v5859_v53, %v7190_v42  ;;  %5862 = vrcp.f32 %v3064_v35  ;;  %5482 = vmatprep.mubr.msk.bf16.mxu0 %vm2682_vm0, %v3107_v59 }
 0x5ea   : > { %5864 = vrcp.f32 %v3070_v29 }
 0x5eb   : > { %5489 = vmatpush3.bf16.msra.mxu1 %v7292_v50  ;;  %v3108_v56 = vpack.c.bf16 %v3098_v55, %v3097_v9 }
 0x5ec   : > { %v3067_v34 = vpop.xlane.xlu0 %3066 }
 0x5ed   : > { %5866 = vrcp.f32 %v3067_v34  ;;  %5483 = vmatmul.mubr.msk.bf16.vlgmr.msra.gmra.mrb[16].mxu0 %vm2682_vm0, %v3108_v56 }
 0x5ee   : > { %5495 = vmatpush3.bf16.msra.mxu0 %v5708_v49 }
 0x5ef   : > { %v5861_v28 = vpop.eup %5860  ;;  %5496 = vmatprep.subr.bf16.mxu0 %v5709_v22 }
 0x5f0   : > { %v3099_v1 = vmul.f32 %v5861_v28, %v7226_v19  ;;  %v5710_v19 = vld [vmem:[#allocation10 + $0x10] sm:$0xff]  }
 0x5f2   : > { %5497 = vmatpush3.bf16.msra.mxu0 %v5709_v22 }
 0x5f3   : > { %v5863_v45 = vpop.eup %5862  ;;  %5498 = vmatprep.subr.bf16.mxu0 %v5710_v19 }
 0x5f4   : > { %v3100_v6 = vmul.f32 %v5863_v45, %v7240_v26  ;;  %v5865_v54 = vpop.eup %5864  ;;  %v5711_v26 = vld [vmem:[#allocation10 + $0x18] sm:$0xff]  }
 0x5f5   : > { %v3102_v21 = vmul.f32 %v5865_v54, %v7216_v37 }
 0x5f6   : > { %v3109_v2 = vpack.c.bf16 %v3100_v6, %v3099_v1  ;;  %5499 = vmatpush3.bf16.msra.mxu0 %v5710_v19 }
 0x5f7   : > { %v5867_v42 = vpop.eup %5866  ;;  %5500 = vmatprep.subr.bf16.mxu0 %v5711_v26 }
 0x5f8   : > { %v3101_v3 = vmul.f32 %v5867_v42, %v7207_v25  ;;  %5490 = vmatprep.mubr.msk.bf16.mxu1 %vm2682_vm0, %v3109_v2 }
 0x5fa   : > { %v3110_v50 = vpack.c.bf16 %v3102_v21, %v3101_v3  ;;  %5501 = vmatpush3.bf16.msra.mxu0 %v5711_v26 }
 0x5fc   : > { %5491 = vmatmul.mubr.msk.bf16.vlgmr.msra.gmra.mrb[20].mxu1 %vm2682_vm0, %v3110_v50 }
 0x5fd   : > { %4385 = vmatprep.mubr.bf16.mxu1 %v6205_v39 }
 0x6ab   : > { %v5468_v25 = vpop.f32.mrb[12].mxu0 }
 0x6ac   : > { %v3159_v37 = vpop.f32.mrb[13].mxu0 }
 0x6ad   : > { %v5469_v47 = vpop.f32.mrb[14].mxu0 }
 0x6ae   : > { %v3162_v11 = vpop.f32.mrb[15].mxu0 }
 0x6b9   : > { %v5476_v48 = vpop.f32.mrb[16].mxu1 }
 0x6ba   : > { %v3214_v40 = vpop.f32.mrb[17].mxu1 }
 0x6bb   : > { %v7321_v27 = vpop.f32.mrb[18].mxu1 }
 0x6bc   : > { %v7323_v0 = vpop.f32.mrb[19].mxu1 }
 0x6c0   : > { %v5484_v23 = vpop.f32.mrb[16].mxu0 }
 0x6c1   : > { %v3475_v8 = vcombine.low %v5468_v25, %v5484_v23  ;;  %v3476_v5 = vcombine.high %v5468_v25, %v5484_v23  ;;  %v3269_v44 = vpop.f32.mrb[17].mxu0 }
 0x6c2   : > { %v3339_v12 = vcombine.low %v3159_v37, %v3269_v44  ;;  %v3340_v10 = vcombine.high %v3159_v37, %v3269_v44  ;;  %v5485_v36 = vpop.f32.mrb[18].mxu0 }
 0x6c3   : > { %v3543_v4 = vcombine.low %v5469_v47, %v5485_v36  ;;  %v3544_v32 = vcombine.high %v5469_v47, %v5485_v36  ;;  %v3272_v38 = vpop.f32.mrb[19].mxu0  ;;  %v3483_v41 = vrot.slane %v3475_v8, %v6689_v58  ;;  %v3490_v24 = vrot.slane %v3476_v5, %v6689_v58 }
 0x6c4   : > { %v3407_v60 = vcombine.low %v3162_v11, %v3272_v38  ;;  %v3408_v14 = vcombine.high %v3162_v11, %v3272_v38  ;;  %v3347_v43 = vrot.slane %v3339_v12, %v6689_v58  ;;  %v3354_v20 = vrot.slane %v3340_v10, %v6689_v58 }
 0x6c5   : > { %v7330_v16 = vrot.slane %v3543_v4, %v6689_v58  ;;  %v7333_v30 = vrot.slane %v3544_v32, %v6689_v58 }
 0x6c6   : > { %v7336_v52 = vrot.slane %v3407_v60, %v6689_v58  ;;  %v7339_v51 = vrot.slane %v3408_v14, %v6689_v58 }
 0x6cf   : > { %v5492_v62 = vpop.f32.mrb[20].mxu1 }
 0x6d0   : > { %v3491_v46 = vcombine.low %v5476_v48, %v5492_v62  ;;  %v3492_v63 = vcombine.high %v5476_v48, %v5492_v62  ;;  %v3324_v33 = vpop.f32.mrb[21].mxu1 }
 0x6d1   : > { %v3355_v61 = vcombine.low %v3214_v40, %v3324_v33  ;;  %v3356_v31 = vcombine.high %v3214_v40, %v3324_v33  ;;  %v5493_v57 = vpop.f32.mrb[22].mxu1 }
 0x6d2   : > { %v3499_v59 = vrot.slane %v3491_v46, %v6689_v58  ;;  %v3506_v53 = vrot.slane %v3492_v63, %v6689_v58  ;;  %v3559_v29 = vcombine.low %v7321_v27, %v5493_v57  ;;  %v3560_v35 = vcombine.high %v7321_v27, %v5493_v57  ;;  %v3327_v9 = vpop.f32.mrb[23].mxu1 }
 0x6d3   : > { %v3363_v55 = vrot.slane %v3355_v61, %v6689_v58  ;;  %v3370_v56 = vrot.slane %v3356_v31, %v6689_v58  ;;  %v3423_v34 = vcombine.low %v7323_v0, %v3327_v9  ;;  %v3424_v28 = vcombine.high %v7323_v0, %v3327_v9 }
 0x6d4   : > { %v3507_v45 = vcombine.low %v3483_v41, %v3499_v59  ;;  %v3508_v1 = vcombine.high %v3483_v41, %v3499_v59  ;;  %v3523_v6 = vcombine.low %v3490_v24, %v3506_v53  ;;  %v3524_v54 = vcombine.high %v3490_v24, %v3506_v53 }
 0x6d5   : > { %v3371_v2 = vcombine.low %v3347_v43, %v3363_v55  ;;  %v3372_v42 = vcombine.high %v3347_v43, %v3363_v55  ;;  %v3387_v21 = vcombine.low %v3354_v20, %v3370_v56  ;;  %v3388_v3 = vcombine.high %v3354_v20, %v3370_v56 }
 0x6d6   : > { %v3515_v50 = vrot.slane %v3507_v45, %v6697_v7  ;;  %v3522_v49 = vrot.slane %v3508_v1, %v6697_v7  ;;  %v3531_v22 = vrot.slane %v3523_v6, %v6697_v7  ;;  %v3538_v19 = vrot.slane %v3524_v54, %v6697_v7 }
 0x6d7   : > { %v3379_v26 = vrot.slane %v3371_v2, %v6697_v7  ;;  %v3386_v25 = vrot.slane %v3372_v42, %v6697_v7  ;;  %v3395_v37 = vrot.slane %v3387_v21, %v6697_v7  ;;  %v3402_v47 = vrot.slane %v3388_v3, %v6697_v7 }
 0x6d8   : > { %v3747_v11 = vcombine.low %v3515_v50, %v3522_v49  ;;  %v5215_v48 = vcombine.high %v3515_v50, %v3522_v49  ;;  %v3763_v40 = vcombine.low %v3531_v22, %v3538_v19  ;;  %v5216_v27 = vcombine.high %v3531_v22, %v3538_v19  ;;  %v5712_v19 = vld [vmem:[#allocation10 + $0x20] sm:$0xff]  }
 0x6d9   : > { %v3611_v0 = vcombine.low %v3379_v26, %v3386_v25  ;;  %v5211_v23 = vcombine.high %v3379_v26, %v3386_v25  ;;  %v3627_v8 = vcombine.low %v3395_v37, %v3402_v47  ;;  %v5212_v5 = vcombine.high %v3395_v37, %v3402_v47  ;;  %5502 = vmatprep.subr.bf16.mxu0 %v5712_v19 }
 0x6da   : > { %v7358_v44 = vrot.slane %v3747_v11, %v6689_v58  ;;  %v7361_v12 = vrot.slane %v5215_v48, %v6689_v58  ;;  %v7364_v10 = vrot.slane %v3763_v40, %v6689_v58  ;;  %v7367_v36 = vrot.slane %v5216_v27, %v6689_v58  ;;  %5503 = vmatpush3.bf16.msra.mxu0 %v5712_v19 }
 0x6db   : > { %v7370_v4 = vrot.slane %v3611_v0, %v6689_v58  ;;  %v7373_v32 = vrot.slane %v5211_v23, %v6689_v58  ;;  %v7376_v38 = vrot.slane %v3627_v8, %v6689_v58  ;;  %v7379_v60 = vrot.slane %v5212_v5, %v6689_v58 }
 0x6dc   : > { %v3567_v14 = vrot.slane %v3559_v29, %v6689_v58  ;;  %v3574_v41 = vrot.slane %v3560_v35, %v6689_v58  ;;  %v3431_v24 = vrot.slane %v3423_v34, %v6689_v58  ;;  %v3438_v43 = vrot.slane %v3424_v28, %v6689_v58 }
 0x6dd   : > { %v3779_v20 = vcombine.low %v7358_v44, %v7361_v12  ;;  %v3795_v62 = vcombine.low %v7364_v10, %v7367_v36  ;;  %v3643_v46 = vcombine.low %v7370_v4, %v7373_v32  ;;  %v3659_v63 = vcombine.low %v7376_v38, %v7379_v60 }
 0x6de   : > { %v3575_v33 = vcombine.low %v7330_v16, %v3567_v14  ;;  %v3576_v61 = vcombine.high %v7330_v16, %v3567_v14  ;;  %v3591_v31 = vcombine.low %v7333_v30, %v3574_v41  ;;  %v3592_v57 = vcombine.high %v7333_v30, %v3574_v41 }
 0x6df   : > { %v3439_v59 = vcombine.low %v7336_v52, %v3431_v24  ;;  %v3440_v53 = vcombine.high %v7336_v52, %v3431_v24  ;;  %v3455_v29 = vcombine.low %v7339_v51, %v3438_v43  ;;  %v3456_v35 = vcombine.high %v7339_v51, %v3438_v43 }
 0x6e0   : > { %v3583_v9 = vrot.slane %v3575_v33, %v6697_v7  ;;  %v3590_v55 = vrot.slane %v3576_v61, %v6697_v7  ;;  %v3599_v56 = vrot.slane %v3591_v31, %v6697_v7  ;;  %v3606_v16 = vrot.slane %v3592_v57, %v6697_v7 }
 0x6e1   : > { %v3447_v34 = vrot.slane %v3439_v59, %v6697_v7  ;;  %v3454_v30 = vrot.slane %v3440_v53, %v6697_v7  ;;  %v3463_v28 = vrot.slane %v3455_v29, %v6697_v7  ;;  %v3470_v52 = vrot.slane %v3456_v35, %v6697_v7 }
 0x6e2   : > { %v3815_v45 = vcombine.low %v3583_v9, %v3590_v55  ;;  %v5217_v1 = vcombine.high %v3583_v9, %v3590_v55  ;;  %v3831_v6 = vcombine.low %v3599_v56, %v3606_v16  ;;  %v5218_v51 = vcombine.high %v3599_v56, %v3606_v16 }
 0x6e3   : > { %v3679_v54 = vcombine.low %v3447_v34, %v3454_v30  ;;  %v5213_v2 = vcombine.high %v3447_v34, %v3454_v30  ;;  %v3695_v42 = vcombine.low %v3463_v28, %v3470_v52  ;;  %v5214_v21 = vcombine.high %v3463_v28, %v3470_v52 }
 0x6e4   : > { %v3822_v3 = vrot.slane %v3815_v45, %v6689_v58  ;;  %v3830_v50 = vrot.slane %v5217_v1, %v6689_v58  ;;  %v3838_v49 = vrot.slane %v3831_v6, %v6689_v58  ;;  %v3846_v22 = vrot.slane %v5218_v51, %v6689_v58 }
 0x6e5   : > { %v3686_v26 = vrot.slane %v3679_v54, %v6689_v58  ;;  %v3694_v25 = vrot.slane %v5213_v2, %v6689_v58  ;;  %v3702_v37 = vrot.slane %v3695_v42, %v6689_v58  ;;  %v3710_v47 = vrot.slane %v5214_v21, %v6689_v58  ;;  %v5715_v21 = vld [vmem:[#allocation10 + $0x38] sm:$0xff]  }
 0x6e6   : > { %v7418_v11 = vrot.slane %v3779_v20, %v6697_v7  ;;  %v7421_v48 = vrot.slane %v3795_v62, %v6697_v7  ;;  %v3847_v40 = vcombine.low %v3822_v3, %v3830_v50  ;;  %v3863_v27 = vcombine.low %v3838_v49, %v3846_v22 }
 0x6e7   : > { %v7424_v0 = vrot.slane %v3643_v46, %v6697_v7  ;;  %v7427_v23 = vrot.slane %v3659_v63, %v6697_v7  ;;  %v3711_v8 = vcombine.low %v3686_v26, %v3694_v25  ;;  %v3727_v5 = vcombine.low %v3702_v37, %v3710_v47  ;;  %v5713_v63 = vld [vmem:[#allocation10 + $0x28] sm:$0xff]  }
 0x6e8   : > { %v3811_v58 = vcombine.low %v7418_v11, %v7421_v48  ;;  %v3812_v14 = vcombine.high %v7418_v11, %v7421_v48  ;;  %v7434_v41 = vrot.slane %v3847_v40, %v6697_v7  ;;  %v7437_v24 = vrot.slane %v3863_v27, %v6697_v7  ;;  %5504 = vmatprep.subr.bf16.mxu0 %v5713_v63 }
 0x6e9   : > { %v3675_v43 = vcombine.low %v7424_v0, %v7427_v23  ;;  %v3676_v20 = vcombine.high %v7424_v0, %v7427_v23  ;;  %v7444_v62 = vrot.slane %v3711_v8, %v6697_v7  ;;  %v7447_v46 = vrot.slane %v3727_v5, %v6697_v7  ;;  %5505 = vmatpush3.bf16.msra.mxu0 %v5713_v63 }
 0x6ea   : > { %v3880_v33 = vcombine.high %v7434_v41, %v7437_v24  ;;  %v3879_v61 = vcombine.low %v7434_v41, %v7437_v24  ;;  %v3780_v31 = vcombine.high %v7358_v44, %v7361_v12  ;;  %v3796_v57 = vcombine.high %v7364_v10, %v7367_v36  ;;  %v5714_v12 = vld [vmem:[#allocation10 + $0x30] sm:$0xff]   ;;  %v5219_v41 = vld [vmem:[%s7748_s6] ss:$0 sm:$0xff] }
 0x6eb   : > { %v3744_v59 = vcombine.high %v7444_v62, %v7447_v46  ;;  %v3743_v53 = vcombine.low %v7444_v62, %v7447_v46  ;;  %v3848_v29 = vcombine.high %v3822_v3, %v3830_v50  ;;  %v3864_v35 = vcombine.high %v3838_v49, %v3846_v22  ;;  %5506 = vmatprep.subr.bf16.mxu0 %v5714_v12 }
 0x6ec   : > { %v5646_v9 = vpack.i.bf16 %v3880_v33, %v3812_v14  ;;  %v3794_v55 = vrot.slane %v3780_v31, %v6697_v7  ;;  %v3810_v56 = vrot.slane %v3796_v57, %v6697_v7  ;;  %v3644_v44 = vcombine.high %v7370_v4, %v7373_v32 }
 0x6ed   : > { %v5656_v10 = vpack.i.bf16 %v3744_v59, %v3676_v20  ;;  %v3862_v36 = vrot.slane %v3848_v29, %v6697_v7  ;;  %v3878_v16 = vrot.slane %v3864_v35, %v6697_v7  ;;  %v3660_v34 = vcombine.high %v7376_v38, %v7379_v60  ;;  %5507 = vmatpush3.bf16.msra.mxu0 %v5714_v12 }
 0x6ee   : > { %5647 = vrot.lane.b32.xlu1 %v5646_v9, %s6208_s22  ;;  %v3813_v30 = vcombine.low %v3794_v55, %v3810_v56  ;;  %v3658_v28 = vrot.slane %v3644_v44, %v6697_v7  ;;  %v3712_v52 = vcombine.high %v3686_v26, %v3694_v25  ;;  %v3728_v45 = vcombine.high %v3702_v37, %v3710_v47 }
 0x6ef   : > { %5657 = vrot.lane.b32.xlu0 %v5656_v10, %s6208_s22  ;;  %v3881_v4 = vcombine.low %v3862_v36, %v3878_v16  ;;  %v3674_v32 = vrot.slane %v3660_v34, %v6697_v7  ;;  %v3814_v1 = vcombine.high %v3794_v55, %v3810_v56  ;;  %v3882_v6 = vcombine.high %v3862_v36, %v3878_v16  ;;  %v5908_v34 = vld [vmem:[%s6547_s30] sm:$0xff] }
 0x6f0   : > { %v3726_v51 = vrot.slane %v3712_v52, %v6697_v7  ;;  %v3742_v54 = vrot.slane %v3728_v45, %v6697_v7  ;;  %5508 = vmatprep.subr.bf16.mxu0 %v5715_v21  ;;  %v5909_v52 = vld [vmem:[%s6547_s30 + $0x8] sm:$0xff] }
 0x6f1   : > { %v5651_v38 = vpack.i.bf16 %v3881_v4, %v3813_v30  ;;  %v3678_v60 = vcombine.high %v3658_v28, %v3674_v32  ;;  %v3677_v2 = vcombine.low %v3658_v28, %v3674_v32  ;;  %v5671_v42 = vpack.i.bf16 %v3882_v6, %v3814_v1  ;;  %5509 = vmatpush3.bf16.msra.mxu0 %v5715_v21  ;;  %v5910_v4 = vld [vmem:[%s6547_s30 + $0x10] sm:$0xff]  ;;  %v5911_v6 = vld [vmem:[%s6547_s30 + $0x18] sm:$0xff]  ;;  %s7786_s30 = sld [smem:[#allocation23_spill]] }
 0x6f2   : > { %v3746_v3 = vcombine.high %v3726_v51, %v3742_v54  ;;  %v3745_v50 = vcombine.low %v3726_v51, %v3742_v54  ;;  %v5716_v54 = vld [vmem:[#allocation11] ss:$16 sps:$4 sm:$0xff]   ;;  %v5727_v21 = vld [vmem:[#allocation11 + $0x2c] ss:$16 sps:$4 sm:$0xff]  }
 0x6f3   : > { %5652 = vrot.lane.b32.xlu1 %v5651_v38, %s6206_s29  ;;  %v5718_v38 = vld [vmem:[#allocation11 + $0x4] ss:$16 sps:$4 sm:$0xff]  }
 0x6f4   : > { %v5666_v49 = vpack.i.bf16 %v3746_v3, %v3678_v60  ;;  %v5661_v22 = vpack.i.bf16 %v3745_v50, %v3677_v2  ;;  %v5719_v60 = vld [vmem:[#allocation11 + $0x8] ss:$16 sps:$4 sm:$0xff]   ;;  %v5721_v2 = vld [vmem:[#allocation11 + $0xc] ss:$16 sps:$4 sm:$0xff]   ;;  %4353 = vmatprep.subr.bf16.mxu1 %v5718_v38  ;;  %v5722_v3 = vld [vmem:[#allocation11 + $0x20] ss:$16 sps:$4 sm:$0xff]  }
 0x6f5   : > { %4406 = vmatprep.subr.bf16.mxu0 %v5721_v2  ;;  %4354 = vmatpush1.bf16.msra.mxu1 %v5716_v54  ;;  %v5725_v50 = vld [vmem:[#allocation11 + $0x28] ss:$16 sps:$4 sm:$0xff]  }
 0x6f6   : > { %5667 = vrot.lane.b32.xlu0 %v5666_v49, %s6207_s21 }
 0x6f7   : > { %5662 = vrot.lane.b32.xlu1 %v5661_v22, %s6206_s29  ;;  %s7787_s29 = sld [smem:[#allocation24_spill]] }
 0x6fb   : > { %5672 = vrot.lane.b32.xlu1 %v5671_v42, %s6207_s21  ;;  %v5724_v42 = vld [vmem:[#allocation11 + $0x24] ss:$16 sps:$4 sm:$0xff]  }
 0x6fc   : > { %4355 = vmatprep.subr.bf16.mxu1 %v5724_v42 }
 0x6fd   : > { %4356 = vmatpush1.bf16.msra.mxu1 %v5722_v3  ;;  %v5228_v3 = vld [vmem:[%s7785_s17] ss:$0 sm:$0xff] }
 0x760   : > { %v5648_v7 = vpop.permute.xlu1 %5647 }
 0x761   : > { %v5658_v19 = vpop.permute.xlu0 %5657  ;;  %v5650_v40 = vunpack.i.h.bf16 %v5648_v7  ;;  %v5649_v27 = vunpack.i.l.bf16 %v5648_v7 }
 0x762   : > { %v5660_v25 = vunpack.i.h.bf16 %v5658_v19  ;;  %v5659_v37 = vunpack.i.l.bf16 %v5658_v19 }
 0x763   : > { %v3933_v29 = vsel %vm2682_vm0, %v3811_v58, %v5649_v27 }
 0x764   : > { %v3931_v5 = vsel %vm2682_vm0, %v3675_v43, %v5659_v37  ;;  %v3932_v14 = vsel %vm2682_vm0, %v3743_v53, %v5660_v25  ;;  %v3934_v53 = vsel %vm2682_vm0, %v3879_v61, %v5650_v40 }
 0x765   : > { %v5653_v26 = vpop.permute.xlu1 %5652 }
 0x766   : > { %v5655_v46 = vunpack.i.h.bf16 %v5653_v26  ;;  %v5654_v63 = vunpack.i.l.bf16 %v5653_v26 }
 0x768   : > { %v5668_v47 = vpop.permute.xlu0 %5667  ;;  %v3938_v56 = vsel %vm3935_vm5, %v3933_v29, %v5654_v63  ;;  %v3939_v11 = vsel %vm3935_vm5, %v3934_v53, %v5655_v46  ;;  %v5728_v63 = vld [vmem:[#allocation11 + $0x40] ss:$16 sps:$4 sm:$0xff]   ;;  %v5745_v53 = vld [vmem:[#allocation11 + $0x8c] ss:$16 sps:$4 sm:$0xff]  }
 0x769   : > { %v5663_v8 = vpop.permute.xlu1 %5662  ;;  %v5670_v33 = vunpack.i.h.bf16 %v5668_v47  ;;  %v5669_v31 = vunpack.i.l.bf16 %v5668_v47  ;;  %v5734_v29 = vld [vmem:[#allocation11 + $0x60] ss:$16 sps:$4 sm:$0xff]  }
 0x76a   : > { %v5665_v20 = vunpack.i.h.bf16 %v5663_v8  ;;  %v5664_v62 = vunpack.i.l.bf16 %v5663_v8 }
 0x76c   : > { %v3936_v57 = vsel %vm3935_vm5, %v3931_v5, %v5664_v62  ;;  %v3937_v59 = vsel %vm3935_vm5, %v3932_v14, %v5665_v20 }
 0x76d   : > { %v5673_v0 = vpop.permute.xlu1 %5672  ;;  %v3941_v23 = vsel %vm3940_vm6, %v3936_v57, %v5669_v31  ;;  %v3942_v43 = vsel %vm3940_vm6, %v3937_v59, %v5670_v33  ;;  %v5730_v33 = vld [vmem:[#allocation11 + $0x44] ss:$16 sps:$4 sm:$0xff]   ;;  %v5731_v31 = vld [vmem:[#allocation11 + $0x48] ss:$16 sps:$4 sm:$0xff]   ;;  %v5733_v57 = vld [vmem:[#allocation11 + $0x4c] ss:$16 sps:$4 sm:$0xff]  }
 0x76e   : > { %v5675_v35 = vunpack.i.h.bf16 %v5673_v0  ;;  %v5674_v9 = vunpack.i.l.bf16 %v5673_v0  ;;  %v3945_v55 = vpack.c.bf16 %v3942_v43, %v3941_v23  ;;  %4357 = vmatprep.subr.bf16.mxu1 %v5730_v33  ;;  %v5736_v59 = vld [vmem:[#allocation11 + $0x64] ss:$16 sps:$4 sm:$0xff]   ;;  %v5739_v0 = vld [vmem:[#allocation11 + $0x6c] ss:$16 sps:$4 sm:$0xff]   ;;  %v5737_v23 = vld [vmem:[#allocation11 + $0x68] ss:$16 sps:$4 sm:$0xff]  }
 0x76f   : > { %4358 = vmatpush1.bf16.msra.mxu1 %v5728_v63  ;;  %v5742_v43 = vld [vmem:[#allocation11 + $0x84] ss:$16 sps:$4 sm:$0xff]  }
 0x770   : > { %v3944_v48 = vsel %vm3940_vm6, %v3939_v11, %v5675_v35  ;;  %v3943_v58 = vsel %vm3940_vm6, %v3938_v56, %v5674_v9  ;;  %5510 = vmatprep.mubr.bf16.mxu0 %v3945_v55  ;;  %4359 = vmatprep.subr.bf16.mxu1 %v5736_v59  ;;  %v5740_v35 = vld [vmem:[#allocation11 + $0x80] ss:$16 sps:$4 sm:$0xff]   ;;  %v5743_v9 = vld [vmem:[#allocation11 + $0x88] ss:$16 sps:$4 sm:$0xff]   ;;  %v5748_v55 = vld [vmem:[#allocation11 + $0xa4] ss:$16 sps:$4 sm:$0xff]  }
 0x771   : > { %v3946_v44 = vpack.c.bf16 %v3944_v48, %v3943_v58  ;;  %v5751_v56 = vld [vmem:[#allocation11 + $0xac] ss:$16 sps:$4 sm:$0xff]   ;;  %v5746_v11 = vld [vmem:[#allocation11 + $0xa0] ss:$16 sps:$4 sm:$0xff]   ;;  %v5749_v48 = vld [vmem:[#allocation11 + $0xa8] ss:$16 sps:$4 sm:$0xff]  }
 0x772   : > { %v5754_v58 = vld [vmem:[#allocation11 + $0xc4] ss:$16 sps:$4 sm:$0xff]  }
 0x773   : > { %5511 = vmatmul.mubr.bf16.vlgmr.msra.gmra.mrb[20].mxu0 %v3946_v44  ;;  %4360 = vmatpush1.bf16.msra.mxu1 %v5734_v29  ;;  %v5757_v44 = vld [vmem:[#allocation11 + $0xcc] ss:$16 sps:$4 sm:$0xff]   ;;  %v5765_v59 = vld [vmem:[#allocation13 + $0xc0] sm:$0xff]  }
 0x774   : > { %4438 = vmatprep.mubr.bf16.mxu0 %v6205_v39  ;;  %4407 = vmatpush1.bf16.msra.mxu0 %v5719_v60  ;;  %v5767_v29 = vld [vmem:[#allocation13 + $0x80] sm:$0xff]  }
 0x775   : > { %4408 = vmatprep.subr.bf16.mxu0 %v5727_v21  ;;  %4361 = vmatprep.subr.bf16.mxu1 %v5742_v43  ;;  %v5771_v43 = vld [vmem:[#allocation13 + $0x88] sm:$0xff]  }
 0x777   : > { %4362 = vmatpush1.bf16.msra.mxu1 %v5740_v35  ;;  %v5774_v35 = vld [vmem:[#allocation13 + $0x10] sm:$0xff]  }
 0x778   : > { %4409 = vmatpush1.bf16.msra.mxu0 %v5725_v50  ;;  %4363 = vmatprep.subr.bf16.mxu1 %v5748_v55  ;;  %v5776_v55 = vld [vmem:[#allocation13 + $0x58] sm:$0xff]  }
 0x779   : > { %4410 = vmatprep.subr.bf16.mxu0 %v5733_v57  ;;  %v5764_v57 = vld [vmem:[#allocation13 + $0x40] sm:$0xff]  }
 0x77b   : > { %4364 = vmatpush1.bf16.msra.mxu1 %v5746_v11  ;;  %v5778_v11 = vld [vmem:[#allocation13 + $0x18] sm:$0xff]  }
 0x77c   : > { %4411 = vmatpush1.bf16.msra.mxu0 %v5731_v31  ;;  %4365 = vmatprep.subr.bf16.mxu1 %v5754_v58  ;;  %v5780_v58 = vld [vmem:[#allocation13 + $0x60] sm:$0xff]  }
 0x77d   : > { %4412 = vmatprep.subr.bf16.mxu0 %v5739_v0  ;;  %v5768_v0 = vld [vmem:[#allocation13 + $0x48] sm:$0xff]  }
 0x780   : > { %4413 = vmatpush1.bf16.msra.mxu0 %v5737_v23  ;;  %v5769_v23 = vld [vmem:[#allocation13 + $0xc8] sm:$0xff]  }
 0x781   : > { %4414 = vmatprep.subr.bf16.mxu0 %v5745_v53  ;;  %v5773_v53 = vld [vmem:[#allocation13 + $0xd0] sm:$0xff]  }
 0x784   : > { %4415 = vmatpush1.bf16.msra.mxu0 %v5743_v9  ;;  %v5775_v9 = vld [vmem:[#allocation13 + $0x90] sm:$0xff]  }
 0x785   : > { %4416 = vmatprep.subr.bf16.mxu0 %v5751_v56  ;;  %v5777_v56 = vld [vmem:[#allocation13 + $0xd8] sm:$0xff]  }
 0x788   : > { %4417 = vmatpush1.bf16.msra.mxu0 %v5749_v48  ;;  %v5779_v48 = vld [vmem:[#allocation13 + $0x98] sm:$0xff]  }
 0x789   : > { %4418 = vmatprep.subr.bf16.mxu0 %v5757_v44  ;;  %v5781_v44 = vld [vmem:[#allocation13 + $0xe0] sm:$0xff]  }
 0x846   : > { %v5512_v24 = vpop.f32.mrb[20].mxu0 }
 0x847   : > { %v4052_v61 = vpop.f32.mrb[21].mxu0  ;;  %v4061_v16 = vadd.f32 %v5512_v24, %v5219_v41  ;;  %v5755_v24 = vld [vmem:[#allocation11 + $0xc8] ss:$16 sps:$4 sm:$0xff]  }
 0x848   : > { %v4053_v12 = vadd.f32 %v5219_v41, %v4052_v61  ;;  %v5513_v10 = vpop.f32.mrb[22].mxu0  ;;  %v5760_v61 = vld [vmem:[#allocation11 + $0xe4] ss:$16 sps:$4 sm:$0xff]   ;;  %4419 = vmatpush1.bf16.msra.mxu0 %v5755_v24 }
 0x849   : > { %v4055_v36 = vpop.f32.mrb[23].mxu0  ;;  %v7512_v32 = vadd.f32 %v5910_v4, %v4061_v16  ;;  %v4064_v1 = vadd.f32 %v5513_v10, %v5219_v41  ;;  %v5758_v10 = vld [vmem:[#allocation11 + $0xe0] ss:$16 sps:$4 sm:$0xff]  }
 0x84a   : > { %v7505_v30 = vadd.f32 %v5908_v34, %v4053_v12  ;;  %v4056_v28 = vadd.f32 %v5219_v41, %v4055_v36  ;;  %v5752_v41 = vld [vmem:[#allocation11 + $0xc0] ss:$16 sps:$4 sm:$0xff]   ;;  %v5763_v12 = vld [vmem:[#allocation11 + $0xec] ss:$16 sps:$4 sm:$0xff]   ;;  %v5761_v36 = vld [vmem:[#allocation11 + $0xe8] ss:$16 sps:$4 sm:$0xff]  }
 0x84b   : > { %v7517_v51 = vadd.f32 %v5911_v6, %v4064_v1  ;;  %4366 = vmatpush1.bf16.msra.mxu1 %v5752_v41  ;;  %4420 = vmatprep.subr.bf16.mxu0 %v5763_v12  ;;  %v5782_v41 = vld [vmem:[#allocation13 + $0x20] sm:$0xff]   ;;  %v5785_v12 = vld [vmem:[#allocation13 + $0xe8] sm:$0xff]  }
 0x84c   : > { %v7508_v45 = vadd.f32 %v5909_v52, %v4056_v28  ;;  %4073 = vadd.xlane.f32.xlu0 %v7505_v30  ;;  %4367 = vmatprep.subr.bf16.mxu1 %v5760_v61  ;;  %v5783_v24 = vld [vmem:[#allocation13 + $0xa0] sm:$0xff]   ;;  %v5784_v61 = vld [vmem:[#allocation13 + $0x68] sm:$0xff]  }
 0x84d   : > { %4421 = vmatpush1.bf16.msra.mxu0 %v5761_v36  ;;  %v5787_v36 = vld [vmem:[#allocation13 + $0xa8] sm:$0xff]  }
 0x84e   : > { %4075 = vadd.xlane.f32.xlu1 %v7508_v45  ;;  %5382 = vmatprep.subr.bf16.mxu0 %v5765_v59 }
 0x84f   : > { %4368 = vmatpush1.bf16.msra.mxu1 %v5758_v10  ;;  %v5786_v10 = vld [vmem:[#allocation13 + $0x28] sm:$0xff]  }
 0x850   : > { %4077 = vadd.xlane.f32.xlu0 %v7512_v32  ;;  %5354 = vmatprep.subr.bf16.mxu1 %v5764_v57 }
 0x854   : > { %4079 = vadd.xlane.f32.xlu0 %v7517_v51 }
 0x8d9   : > { %v4074_v49 = vpop.xlane.xlu0 %4073 }
 0x8da   : > { %v4081_v22 = vmul.f32 0.0078125, %v4074_v49 }
 0x8db   : > { %v4076_v7 = vpop.xlane.xlu1 %4075 }
 0x8dc   : > { %v7521_v19 = vsub.f32 %v7505_v30, %v4081_v22  ;;  %v4082_v26 = vmul.f32 0.0078125, %v4076_v7 }
 0x8dd   : > { %v4078_v25 = vpop.xlane.xlu0 %4077 }
 0x8de   : > { %v7524_v37 = vsub.f32 %v7508_v45, %v4082_v26  ;;  %v4083_v47 = vmul.f32 0.0078125, %v4078_v25  ;;  %v4089_v40 = vmul.f32 %v7521_v19, %v7521_v19  ;;  %v5229_v25 = vld [vmem:[%s7786_s30] ss:$0 sm:$0xff]  ;;  %s4981_s30 = scalar_lea.sflag [#allocation4], %s6541_s1 }
 0x8e0   : > { %v7529_v27 = vsub.f32 %v7512_v32, %v4083_v47  ;;  %4093 = vadd.xlane.f32.xlu0 %v4089_v40  ;;  %v4090_v8 = vmul.f32 %v7524_v37, %v7524_v37 }
 0x8e1   : > { %v4080_v5 = vpop.xlane.xlu0 %4079 }
 0x8e2   : > { %v4084_v14 = vmul.f32 0.0078125, %v4080_v5  ;;  %4095 = vadd.xlane.f32.xlu1 %v4090_v8  ;;  %v4091_v20 = vmul.f32 %v7529_v27, %v7529_v27 }
 0x8e4   : > { %v7536_v62 = vsub.f32 %v7517_v51, %v4084_v14  ;;  %4097 = vadd.xlane.f32.xlu0 %v4091_v20 }
 0x8e6   : > { %v4092_v46 = vmul.f32 %v7536_v62, %v7536_v62 }
 0x8e8   : > { %4099 = vadd.xlane.f32.xlu1 %v4092_v46 }
 0x96d   : > { %v4094_v16 = vpop.xlane.xlu0 %4093 }
 0x96e   : > { %v4101_v34 = vmul.f32 0.0078125, %v4094_v16  ;;  %v5788_v16 = vld [vmem:[#allocation13 + $0x70] sm:$0xff]  }
 0x96f   : > { %v4096_v28 = vpop.xlane.xlu1 %4095 }
 0x970   : > { %v4105_v52 = vadd.f32 1e-05, %v4101_v34  ;;  %v4102_v4 = vmul.f32 0.0078125, %v4096_v28  ;;  %v5789_v34 = vld [vmem:[#allocation13 + $0xf0] sm:$0xff]  }
 0x971   : > { %v4098_v1 = vpop.xlane.xlu0 %4097  ;;  %v5790_v28 = vld [vmem:[#allocation13 + $0x30] sm:$0xff]  }
 0x972   : > { %5868 = vrsqrt.f32 %v4105_v52  ;;  %v4106_v6 = vadd.f32 1e-05, %v4102_v4  ;;  %v4103_v54 = vmul.f32 0.0078125, %v4098_v1  ;;  %v5791_v52 = vld [vmem:[#allocation13 + $0xb0] sm:$0xff]   ;;  %v5792_v4 = vld [vmem:[#allocation13 + $0x78] sm:$0xff]  }
 0x973   : > { %v5793_v1 = vld [vmem:[#allocation13 + $0xf8] sm:$0xff]  }
 0x974   : > { %5870 = vrsqrt.f32 %v4106_v6  ;;  %v4107_v38 = vadd.f32 1e-05, %v4103_v54  ;;  %v5794_v6 = vld [vmem:[#allocation13 + $0x38] sm:$0xff]  }
 0x975   : > { %v4100_v60 = vpop.xlane.xlu1 %4099  ;;  %v5795_v54 = vld [vmem:[#allocation13 + $0xb8] sm:$0xff]  }
 0x976   : > { %5872 = vrsqrt.f32 %v4107_v38  ;;  %v4104_v2 = vmul.f32 0.0078125, %v4100_v60  ;;  %v4171_v38 = vld [vmem:[%s7787_s29] sm:$0xf]  ;;  %s6116_s29 = scalar_lea.vmem %s6115_s24, 1024 }
 0x977   : > { %v7557_v60 = vrot.slane %v4171_v38, %v667_v18  ;;  %p6118_p3 = scmp.lt.s32.totalorder %s6116_s29, %s6110_s15 }
 0x978   : > { %v4108_v42 = vadd.f32 1e-05, %v4104_v2  ;;  %v7561_v2 = vrot.slane %v4171_v38, %v675_v17 }
 0x979   : > { %p6119_p2 = por %p6118_p3, %p6117_p1 }
 0x97a   : > { %5874 = vrsqrt.f32 %v4108_v42  ;;  %v4187_v42 = vsub.s32 3, %v6592_v13 }
 0x97b   : > { %p6120_p8 = pnand %p6119_p2, %p6113_p13 }
 0x97c   : > { %v5869_v21 = vpop.eup %5868  ;;  %v7570_v18 = vrot.slane %v4171_v38, %v4187_v42 }
 0x97d   : > { %v4113_v50 = vmul.f32 %v5869_v21, %v7521_v19 }
 0x97e   : > { %v5871_v49 = vpop.eup %5870 }
 0x97f   : > { %v4114_v22 = vmul.f32 %v5871_v49, %v7524_v37  ;;  %v4123_v7 = vmul.f32 %v5228_v3, %v4113_v50  ;;  %v7566_v50 = vrot.slane %v4171_v38, %v671_v15 }
 0x980   : > { %v5873_v26 = vpop.eup %5872 }
 0x981   : > { %v4124_v47 = vmul.f32 %v5228_v3, %v4114_v22  ;;  %v4133_v40 = vadd.f32 %v5229_v25, %v4123_v7  ;;  %v4115_v5 = vmul.f32 %v5873_v26, %v7529_v27  ;;  %v5766_v27 = vld [vmem:[#allocation13] sm:$0xff]  }
 0x983   : > { %v4134_v8 = vadd.f32 %v5229_v25, %v4124_v47  ;;  %v4125_v19 = vmul.f32 %v5228_v3, %v4115_v5 }
 0x984   : > { %v5875_v14 = vpop.eup %5874 }
 0x985   : > { %v4137_v20 = vpack.c.bf16 %v4134_v8, %v4133_v40  ;;  %v4116_v46 = vmul.f32 %v5875_v14, %v7536_v62  ;;  %v4135_v33 = vadd.f32 %v5229_v25, %v4125_v19  ;;  %v5770_v62 = vld [vmem:[#allocation13 + $0x8] sm:$0xff]  }
 0x987   : > { %4386 = vmatmul.mubr.bf16.vlgmr.msra.gmra.mrb[24].mxu1 %v4137_v20  ;;  %4439 = vmatmul.mubr.bf16.vlgmr.msra.gmra.mrb[24].mxu0 %v4137_v20  ;;  %v4126_v63 = vmul.f32 %v5228_v3, %v4116_v46 }
 0x988   : > { %4395 = vmatprep.mubr.bf16.mxu1 %v6205_v39  ;;  %4448 = vmatprep.mubr.bf16.mxu0 %v6205_v39  ;;  %v5772_v39 = vld [vmem:[#allocation13 + $0x50] sm:$0xff]  }
 0x989   : > { %v4136_v37 = vadd.f32 %v5229_v25, %v4126_v63  ;;  %5355 = vmatpush3.bf16.msra.mxu1 %v5766_v27  ;;  %5383 = vmatpush3.bf16.msra.mxu0 %v5767_v29 }
 0x98a   : > { %5356 = vmatprep.subr.bf16.mxu1 %v5768_v0  ;;  %5384 = vmatprep.subr.bf16.mxu0 %v5769_v23 }
 0x98b   : > { %v4138_v31 = vpack.c.bf16 %v4136_v37, %v4135_v33 }
 0x98d   : > { %5357 = vmatpush3.bf16.msra.mxu1 %v5770_v62  ;;  %5385 = vmatpush3.bf16.msra.mxu0 %v5771_v43 }
 0x98e   : > { %5358 = vmatprep.subr.bf16.mxu1 %v5772_v39  ;;  %5386 = vmatprep.subr.bf16.mxu0 %v5773_v53 }
 0x98f   : > { %4396 = vmatmul.mubr.bf16.gmra.mrb[28].mxu1 %v4138_v31  ;;  %4449 = vmatmul.mubr.bf16.gmra.mrb[28].mxu0 %v4138_v31 }
 0x991   : > { %5359 = vmatpush3.bf16.msra.mxu1 %v5774_v35  ;;  %5387 = vmatpush3.bf16.msra.mxu0 %v5775_v9 }
 0x992   : > { %5360 = vmatprep.subr.bf16.mxu1 %v5776_v55  ;;  %5388 = vmatprep.subr.bf16.mxu0 %v5777_v56 }
 0x995   : > { %5361 = vmatpush3.bf16.msra.mxu1 %v5778_v11  ;;  %5389 = vmatpush3.bf16.msra.mxu0 %v5779_v48 }
 0x996   : > { %5362 = vmatprep.subr.bf16.mxu1 %v5780_v58  ;;  %5390 = vmatprep.subr.bf16.mxu0 %v5781_v44 }
 0x999   : > { %5363 = vmatpush3.bf16.msra.mxu1 %v5782_v41  ;;  %5391 = vmatpush3.bf16.msra.mxu0 %v5783_v24 }
 0x99a   : > { %5364 = vmatprep.subr.bf16.mxu1 %v5784_v61  ;;  %5392 = vmatprep.subr.bf16.mxu0 %v5785_v12 }
 0x99d   : > { %5365 = vmatpush3.bf16.msra.mxu1 %v5786_v10  ;;  %5393 = vmatpush3.bf16.msra.mxu0 %v5787_v36 }
 0x99e   : > { %5366 = vmatprep.subr.bf16.mxu1 %v5788_v16  ;;  %5394 = vmatprep.subr.bf16.mxu0 %v5789_v34 }
 0x9a1   : > { %5367 = vmatpush3.bf16.msra.mxu1 %v5790_v28  ;;  %5395 = vmatpush3.bf16.msra.mxu0 %v5791_v52 }
 0x9a2   : > { %5368 = vmatprep.subr.bf16.mxu1 %v5792_v4  ;;  %5396 = vmatprep.subr.bf16.mxu0 %v5793_v1 }
 0x9a5   : > { %5369 = vmatpush3.bf16.msra.mxu1 %v5794_v6  ;;  %5397 = vmatpush3.bf16.msra.mxu0 %v5795_v54 }
 0xa5a   : > { %v4387_v21 = vpop.f32.mrb[24].mxu1  ;;  %v4440_v3 = vpop.f32.mrb[24].mxu0 }
 0xa5b   : > { %v4388_v49 = vadd.f32 %v4387_v21, %v7557_v60  ;;  %v4441_v22 = vadd.f32 %v4440_v3, %v7561_v2  ;;  %v4389_v7 = vpop.f32.mrb[25].mxu1  ;;  %v4442_v26 = vpop.f32.mrb[25].mxu0 }
 0xa5c   : > { %v4391_v25 = vpop.f32.mrb[26].mxu1  ;;  %v4444_v47 = vpop.f32.mrb[26].mxu0  ;;  %v7573_v8 = vadd.f32 %v4389_v7, %v7566_v50  ;;  %v7583_v63 = vadd.f32 %v4442_v26, %v7570_v18 }
 0xa5d   : > { %v4475_v17 = vmul.f32 0.044715, %v4388_v49  ;;  %v4477_v40 = vmul.f32 0.044715, %v4441_v22  ;;  %v4392_v5 = vadd.f32 %v4391_v25, %v7557_v60  ;;  %v7577_v13 = vadd.f32 %v4444_v47, %v7561_v2  ;;  %v4393_v15 = vpop.f32.mrb[27].mxu1  ;;  %v4446_v14 = vpop.f32.mrb[27].mxu0 }
 0xa5e   : > { %v7580_v19 = vadd.f32 %v4393_v15, %v7566_v50  ;;  %v7586_v33 = vadd.f32 %v4446_v14, %v7570_v18  ;;  %v7588_v31 = vmul.f32 0.5, %v4388_v49  ;;  %v4476_v29 = vmul.f32 0.044715, %v7573_v8 }
 0xa5f   : > { %v4491_v20 = vmul.f32 %v4475_v17, %v4388_v49  ;;  %v4493_v46 = vmul.f32 %v4477_v40, %v4441_v22  ;;  %v4479_v37 = vmul.f32 0.044715, %v4392_v5  ;;  %v4481_v27 = vmul.f32 0.044715, %v7577_v13 }
 0xa60   : > { %v4480_v23 = vmul.f32 0.044715, %v7580_v19  ;;  %v7593_v53 = vmul.f32 0.5, %v4441_v22  ;;  %v4478_v11 = vmul.f32 0.044715, %v7583_v63  ;;  %v4492_v34 = vmul.f32 %v4476_v29, %v7573_v8 }
 0xa61   : > { %v4507_v57 = vmul.f32 %v4491_v20, %v4388_v49  ;;  %v4509_v59 = vmul.f32 %v4493_v46, %v4441_v22  ;;  %v4495_v0 = vmul.f32 %v4479_v37, %v4392_v5  ;;  %v4497_v9 = vmul.f32 %v4481_v27, %v7577_v13 }
 0xa62   : > { %v4397_v62 = vpop.f32.mrb[28].mxu1  ;;  %v4450_v43 = vpop.f32.mrb[28].mxu0  ;;  %v4482_v58 = vmul.f32 0.044715, %v7586_v33  ;;  %v4496_v52 = vmul.f32 %v4480_v23, %v7580_v19  ;;  %v4494_v38 = vmul.f32 %v4478_v11, %v7583_v63  ;;  %v4508_v26 = vmul.f32 %v4492_v34, %v7573_v8 }
 0xa63   : > { %v4523_v39 = vadd.f32 %v4507_v57, %v4388_v49  ;;  %v4525_v35 = vadd.f32 %v4509_v59, %v4441_v22  ;;  %v4399_v55 = vpop.f32.mrb[29].mxu1  ;;  %v4452_v56 = vpop.f32.mrb[29].mxu0  ;;  %v4511_v48 = vmul.f32 %v4495_v0, %v4392_v5  ;;  %v7599_v44 = vadd.f32 %v4397_v62, %v7557_v60 }
 0xa64   : > { %v4401_v41 = vpop.f32.mrb[30].mxu1  ;;  %v4454_v24 = vpop.f32.mrb[30].mxu0  ;;  %v4513_v10 = vmul.f32 %v4497_v9, %v7577_v13  ;;  %v7605_v4 = vadd.f32 %v4450_v43, %v7561_v2  ;;  %v7610_v54 = vadd.f32 %v4399_v55, %v7566_v50  ;;  %v4498_v21 = vmul.f32 %v4482_v58, %v7586_v33 }
 0xa65   : > { %v4539_v61 = vmul.f32 0.7978846, %v4523_v39  ;;  %v4541_v12 = vmul.f32 0.7978846, %v4525_v35  ;;  %v4403_v36 = vpop.f32.mrb[31].mxu1  ;;  %v4456_v16 = vpop.f32.mrb[31].mxu0  ;;  %v4527_v28 = vadd.f32 %v4511_v48, %v4392_v5  ;;  %v7616_v22 = vadd.f32 %v4452_v56, %v7570_v18 }
 0xa66   : > { %v4529_v1 = vadd.f32 %v4513_v10, %v7577_v13  ;;  %v4483_v6 = vmul.f32 0.044715, %v7599_v44  ;;  %v4484_v49 = vmul.f32 0.044715, %v7610_v54  ;;  %v7619_v7 = vadd.f32 %v4401_v41, %v7557_v60 }
 0xa67   : > { %5876 = vtanh.f32 %v4539_v61  ;;  %v4543_v42 = vmul.f32 0.7978846, %v4527_v28  ;;  %v4512_v25 = vmul.f32 %v4496_v52, %v7580_v19  ;;  %v7624_v47 = vadd.f32 %v4454_v24, %v7561_v2 }
 0xa68   : > { %5878 = vtanh.f32 %v4541_v12  ;;  %v4545_v3 = vmul.f32 0.7978846, %v4529_v1  ;;  %v4499_v17 = vmul.f32 %v4483_v6, %v7599_v44  ;;  %v4485_v40 = vmul.f32 0.044715, %v7605_v4 }
 0xa69   : > { %5880 = vtanh.f32 %v4543_v42  ;;  %v4486_v15 = vmul.f32 0.044715, %v7616_v22  ;;  %v4463_v14 = vmul.f32 0.5, %v4392_v5  ;;  %v4500_v20 = vmul.f32 %v4484_v49, %v7610_v54 }
 0xa6a   : > { %5882 = vtanh.f32 %v4545_v3  ;;  %v7631_v60 = vadd.f32 %v4403_v36, %v7566_v50  ;;  %v7634_v46 = vadd.f32 %v4456_v16, %v7570_v18  ;;  %v4510_v37 = vmul.f32 %v4494_v38, %v7583_v63 }
 0xa6b   : > { %v4514_v2 = vmul.f32 %v4498_v21, %v7586_v33  ;;  %v4487_v57 = vmul.f32 0.044715, %v7619_v7  ;;  %v4489_v59 = vmul.f32 0.044715, %v7624_v47  ;;  %v4502_v27 = vmul.f32 %v4486_v15, %v7616_v22 }
 0xa6c   : > { %v4488_v5 = vmul.f32 0.044715, %v7631_v60  ;;  %v4490_v29 = vmul.f32 0.044715, %v7634_v46  ;;  %v4524_v50 = vadd.f32 %v4508_v26, %v7573_v8  ;;  %v4465_v0 = vmul.f32 0.5, %v7577_v13 }
 0xa6d   : > { %v4515_v18 = vmul.f32 %v4499_v17, %v7599_v44  ;;  %v4501_v23 = vmul.f32 %v4485_v40, %v7605_v4  ;;  %v4528_v62 = vadd.f32 %v4512_v25, %v7580_v19  ;;  %v4516_v43 = vmul.f32 %v4500_v20, %v7610_v54 }
 0xa6e   : > { %v4504_v39 = vmul.f32 %v4488_v5, %v7631_v60  ;;  %v4506_v35 = vmul.f32 %v4490_v29, %v7634_v46  ;;  %v4540_v9 = vmul.f32 0.7978846, %v4524_v50  ;;  %v4503_v56 = vmul.f32 %v4487_v57, %v7619_v7 }
 0xa6f   : > { %v4544_v11 = vmul.f32 0.7978846, %v4528_v62  ;;  %v4526_v48 = vadd.f32 %v4510_v37, %v7583_v63  ;;  %v4530_v13 = vadd.f32 %v4514_v2, %v7586_v33  ;;  %v4518_v41 = vmul.f32 %v4502_v27, %v7616_v22 }
 0xa70   : > { %v4505_v24 = vmul.f32 %v4489_v59, %v7624_v47  ;;  %v4520_v61 = vmul.f32 %v4504_v39, %v7631_v60  ;;  %5884 = vtanh.f32 %v4540_v9  ;;  %v4517_v34 = vmul.f32 %v4501_v23, %v7605_v4 }
 0xa71   : > { %v5877_v55 = vpop.eup %5876  ;;  %5886 = vtanh.f32 %v4544_v11  ;;  %v4542_v12 = vmul.f32 0.7978846, %v4526_v48  ;;  %v4546_v10 = vmul.f32 0.7978846, %v4530_v13  ;;  %v4522_v28 = vmul.f32 %v4506_v35, %v7634_v46 }
 0xa72   : > { %v5879_v58 = vpop.eup %5878  ;;  %v4571_v36 = vadd.f32 1.0, %v5877_v55  ;;  %v4532_v1 = vadd.f32 %v4516_v43, %v7610_v54  ;;  %v4519_v38 = vmul.f32 %v4503_v56, %v7619_v7  ;;  %v4536_v21 = vadd.f32 %v4520_v61, %v7631_v60 }
 0xa73   : > { %v5881_v16 = vpop.eup %5880  ;;  %v4573_v52 = vadd.f32 1.0, %v5879_v58  ;;  %5888 = vtanh.f32 %v4542_v12  ;;  %v4521_v3 = vmul.f32 %v4505_v24, %v7624_v47  ;;  %v4534_v15 = vadd.f32 %v4518_v41, %v7616_v22 }
 0xa74   : > { %v5883_v6 = vpop.eup %5882  ;;  %v4575_v42 = vadd.f32 1.0, %v5881_v16  ;;  %5890 = vtanh.f32 %v4546_v10  ;;  %v4548_v26 = vmul.f32 0.7978846, %v4532_v1  ;;  %v4587_v25 = vmul.f32 %v4571_v36, %v7588_v31 }
 0xa75   : > { %v4577_v49 = vadd.f32 1.0, %v5883_v6  ;;  %v4552_v40 = vmul.f32 0.7978846, %v4536_v21  ;;  %v4589_v20 = vmul.f32 %v4573_v52, %v7593_v53  ;;  %v4538_v2 = vadd.f32 %v4522_v28, %v7634_v46 }
 0xa76   : > { %v4591_v17 = vmul.f32 %v4575_v42, %v4463_v14  ;;  %5892 = vtanh.f32 %v4548_v26  ;;  %v4550_v59 = vmul.f32 0.7978846, %v4534_v15  ;;  %v4531_v29 = vadd.f32 %v4515_v18, %v7599_v44 }
 0xa77   : > { %v4593_v37 = vmul.f32 %v4577_v49, %v4465_v0  ;;  %5894 = vtanh.f32 %v4552_v40  ;;  %v4554_v5 = vmul.f32 0.7978846, %v4538_v2  ;;  %v4535_v50 = vadd.f32 %v4519_v38, %v7619_v7 }
 0xa78   : > { %v4603_v57 = vpack.c.bf16 %v4591_v17, %v4587_v25  ;;  %5896 = vtanh.f32 %v4550_v59  ;;  %v4533_v31 = vadd.f32 %v4517_v34, %v7605_v4  ;;  %v4547_v23 = vmul.f32 0.7978846, %v4531_v29 }
 0xa79   : > { %v4605_v27 = vpack.c.bf16 %v4593_v37, %v4589_v20  ;;  %5898 = vtanh.f32 %v4554_v5  ;;  %v4551_v53 = vmul.f32 0.7978846, %v4535_v50  ;;  %v4537_v0 = vadd.f32 %v4521_v3, %v7624_v47 }
 0xa7a   : > { %v5885_v14 = vpop.eup %5884  ;;  %v4460_v43 = vmul.f32 0.5, %v7573_v8  ;;  %v4549_v35 = vmul.f32 0.7978846, %v4533_v31  ;;  %v4464_v9 = vmul.f32 0.5, %v7580_v19  ;;  %5900 = vtanh.f32 %v4547_v23 }
 0xa7b   : > { %v5887_v62 = vpop.eup %5886  ;;  %v4572_v39 = vadd.f32 1.0, %v5885_v14  ;;  %v4553_v18 = vmul.f32 0.7978846, %v4537_v0  ;;  %5902 = vtanh.f32 %v4551_v53  ;;  %v4462_v41 = vmul.f32 0.5, %v7583_v63 }
 0xa7c   : > { %v4576_v55 = vadd.f32 1.0, %v5887_v62  ;;  %5904 = vtanh.f32 %v4549_v35  ;;  %v4466_v24 = vmul.f32 0.5, %v7586_v33  ;;  %v4468_v34 = vmul.f32 0.5, %v7610_v54 }
 0xa7d   : > { %v5889_v56 = vpop.eup %5888  ;;  %v4588_v48 = vmul.f32 %v4572_v39, %v4460_v43  ;;  %5906 = vtanh.f32 %v4553_v18  ;;  %v4472_v28 = vmul.f32 0.5, %v7631_v60  ;;  %v4470_v21 = vmul.f32 0.5, %v7616_v22 }
 0xa7e   : > { %v5891_v11 = vpop.eup %5890  ;;  %v4592_v13 = vmul.f32 %v4576_v55, %v4464_v9  ;;  %v4574_v58 = vadd.f32 1.0, %v5889_v56  ;;  %v4474_v3 = vmul.f32 0.5, %v7634_v46  ;;  %v4467_v20 = vmul.f32 0.5, %v7599_v44 }
 0xa7f   : > { %v4578_v61 = vadd.f32 1.0, %v5891_v11  ;;  %v4471_v37 = vmul.f32 0.5, %v7619_v7  ;;  %v4469_v22 = vmul.f32 0.5, %v7605_v4  ;;  %v5262_v7 = vld [vmem:[%s7788_s16] ss:$0 sm:$0xff] }
 0xa80   : > { %v5893_v8 = vpop.eup %5892  ;;  %v4604_v12 = vpack.c.bf16 %v4592_v13, %v4588_v48  ;;  %v4590_v19 = vmul.f32 %v4574_v58, %v4462_v41 }
 0xa81   : > { %v5895_v10 = vpop.eup %5894  ;;  %v4594_v36 = vmul.f32 %v4578_v61, %v4466_v24  ;;  %v4580_v16 = vadd.f32 1.0, %v5893_v8 }
 0xa82   : > { %4906 = vmatprep.mubr.bf16.mxu1 %v4604_v12  ;;  %v4584_v52 = vadd.f32 1.0, %v5895_v10  ;;  %v5897_v1 = vpop.eup %5896 }
 0xa83   : > { %v4606_v6 = vpack.c.bf16 %v4594_v36, %v4590_v19  ;;  %4907 = vmatmul.mubr.bf16.vlgmr.msra.gmra.mrb[32].mxu1 %v4603_v57  ;;  %v5899_v63 = vpop.eup %5898  ;;  %v4596_v38 = vmul.f32 %v4580_v16, %v4468_v34  ;;  %v4582_v42 = vadd.f32 1.0, %v5897_v1 }
 0xa84   : > { %v4600_v33 = vmul.f32 %v4584_v52, %v4472_v28  ;;  %v4586_v49 = vadd.f32 1.0, %v5899_v63  ;;  %v5901_v26 = vpop.eup %5900 }
 0xa85   : > { %4955 = vmatprep.mubr.bf16.mxu0 %v4606_v6  ;;  %v5903_v54 = vpop.eup %5902  ;;  %v4598_v17 = vmul.f32 %v4582_v42, %v4470_v21  ;;  %v4579_v40 = vadd.f32 1.0, %v5901_v26 }
 0xa86   : > { %4956 = vmatmul.mubr.bf16.vlgmr.msra.gmra.mrb[32].mxu0 %v4605_v27  ;;  %v4608_v25 = vpack.c.bf16 %v4600_v33, %v4596_v38  ;;  %v4602_v60 = vmul.f32 %v4586_v49, %v4474_v3  ;;  %v5905_v15 = vpop.eup %5904  ;;  %v4583_v2 = vadd.f32 1.0, %v5903_v54  ;;  %v4473_v27 = vmul.f32 0.5, %v7624_v47 }
 0xa87   : > { %v5907_v57 = vpop.eup %5906  ;;  %v4581_v46 = vadd.f32 1.0, %v5905_v15  ;;  %v4595_v5 = vmul.f32 %v4579_v40, %v4467_v20 }
 0xa88   : > { %4914 = vmatprep.mubr.bf16.mxu1 %v4608_v25  ;;  %v4610_v59 = vpack.c.bf16 %v4602_v60, %v4598_v17  ;;  %v4599_v29 = vmul.f32 %v4583_v2, %v4471_v37  ;;  %v4585_v50 = vadd.f32 1.0, %v5907_v57 }
 0xa89   : > { %v4597_v14 = vmul.f32 %v4581_v46, %v4469_v22 }
 0xa8a   : > { %4963 = vmatprep.mubr.bf16.mxu0 %v4610_v59  ;;  %v4607_v31 = vpack.c.bf16 %v4599_v29, %v4595_v5  ;;  %v4601_v23 = vmul.f32 %v4585_v50, %v4473_v27 }
 0xa8c   : > { %4915 = vmatmul.mubr.bf16.gmra.mrb[36].mxu1 %v4607_v31  ;;  %v4609_v53 = vpack.c.bf16 %v4601_v23, %v4597_v14 }
 0xa8e   : > { %4964 = vmatmul.mubr.bf16.gmra.mrb[36].mxu0 %v4609_v53 }
 0xb56   : > { %v5370_v44 = vpop.f32.mrb[32].mxu1 }
 0xb57   : > { %v5371_v0 = vpop.f32.mrb[33].mxu1 }
 0xb58   : > { %v5372_v4 = vadd.f32 %v5371_v0, %v5370_v44  ;;  %v5373_v62 = vpop.f32.mrb[34].mxu1 }
 0xb59   : > { %v5398_v43 = vpop.f32.mrb[32].mxu0  ;;  %v5374_v39 = vpop.f32.mrb[35].mxu1 }
 0xb5a   : > { %v4909_v47 = vadd.f32 %v5372_v4, %v5262_v7  ;;  %v5399_v35 = vpop.f32.mrb[33].mxu0  ;;  %v5375_v9 = vadd.f32 %v5374_v39, %v5373_v62 }
 0xb5b   : > { %v5400_v55 = vadd.f32 %v5399_v35, %v5398_v43  ;;  %v5401_v18 = vpop.f32.mrb[34].mxu0 }
 0xb5c   : > { %v4912_v56 = vadd.f32 %v5375_v9, %v5262_v7  ;;  %v5402_v11 = vpop.f32.mrb[35].mxu0 }
 0xb5d   : > { %v4958_v48 = vadd.f32 %v5400_v55, %v4909_v47  ;;  %v5403_v13 = vadd.f32 %v5402_v11, %v5401_v18 }
 0xb5f   : > { %v4972_v58 = vadd.f32 %v4958_v48, %v7505_v30  ;;  %v4961_v41 = vadd.f32 %v5403_v13, %v4912_v56  ;;  %v5376_v61 = vpop.f32.mrb[36].mxu1 }
 0xb60   : > { %v5377_v8 = vpop.f32.mrb[37].mxu1 }
 0xb61   : > { %4976 = vst [vmem:[%s541_s23] sm:$0xff] %v4972_v58  ;;  %v4973_v24 = vadd.f32 %v4961_v41, %v7508_v45  ;;  %v5404_v12 = vpop.f32.mrb[36].mxu0  ;;  %v5378_v10 = vadd.f32 %v5377_v8, %v5376_v61  ;;  %v5379_v19 = vpop.f32.mrb[38].mxu1 }
 0xb62   : > { %v5405_v36 = vpop.f32.mrb[37].mxu0  ;;  %v5380_v16 = vpop.f32.mrb[39].mxu1 }
 0xb63   : > { %4977 = vst [vmem:[%s541_s23 + $0x8] sm:$0xff] %v4973_v24  ;;  %v4917_v34 = vadd.f32 %v5378_v10, %v5262_v7  ;;  %v5406_v28 = vadd.f32 %v5405_v36, %v5404_v12  ;;  %v5407_v52 = vpop.f32.mrb[38].mxu0  ;;  %v5381_v30 = vadd.f32 %v5380_v16, %v5379_v19 }
 0xb64   : > { %v5408_v1 = vpop.f32.mrb[39].mxu0 }
 0xb65   : > { %v4966_v6 = vadd.f32 %v5406_v28, %v4917_v34  ;;  %v4920_v63 = vadd.f32 %v5381_v30, %v5262_v7  ;;  %v5409_v45 = vadd.f32 %v5408_v1, %v5407_v52 }
 0xb67   : > { %v4974_v38 = vadd.f32 %v4966_v6, %v7512_v32  ;;  %v4969_v33 = vadd.f32 %v5409_v45, %v4920_v63 }
 0xb69   : > { %4978 = vst [vmem:[%s541_s23 + $0x10] sm:$0xff] %v4974_v38  ;;  %v4975_v42 = vadd.f32 %v4969_v33, %v7517_v51 }
 0xb6b   : > { %4979 = vst [vmem:[%s541_s23 + $0x18] sm:$0xff] %v4975_v42 }
 0xb6c   : > { %6123 = shalt.err (!%p6120_p8)
}
 0xb6d   : > { %s6124_s21 = scalar_lea.hbm %s7697_s13, 512  ;;  %s6128_s23 = scalar_lea.hbm %s7789_s8, 1024 }
 0xb6e   : > { %p6125_p10 = scmp.ne.s32.totalorder %s7697_s13, %s6124_s21  ;;  %p6129_p0 = scmp.lt.u32.totalorder %s7697_s13, %s7789_s8 }
 0xb6f   : > { %p6130_p5 = scmp.lt.u32.totalorder %s6128_s23, %s6124_s21  ;;  %p6132_p6 = scmp.lt.u32.totalorder %s6124_s21, %s7697_s13 }
 0xb70   : > { %p6126_p11 = pnand %p6125_p10, %p7790_p9 }
 0xb71   : > { %p6131_p7 = por %p6130_p5, %p6129_p0 }
 0xb72   : > { %p6127_p12 = pneg %p6126_p11 }
 0xb73   : > { %p6133_p4 = por %p6132_p6, %p6131_p7 }
 0xb75   : > { %p6134_p13 = pnand %p6133_p4, %p6127_p12 }
 0xb77   : > { %6137 = shalt.err (!%p6134_p13)
}
 0xb78   : > { %s6213_s17 = smov 128   ;;  %s6214_s15 = smov 8  }
 0xb79   : > { %5548 = dma.vmem_to_hbm [thread:$0]  (%p7790_p9), %s7691_s19, 512, %s7697_s13, %s4981_s30, %s6213_s17, %s6213_s17, %s6214_s15  }
 0xb7a PF: > { %s5009_s14 = sand.u32 1, %s6176_s25   ;;  %p7791_p1 = scmp.ne.s32.totalorder %s7776_s7, 0 }
 0xb7b   : > { %p7792_p3 = scmp.ge.s32.totalorder %s6188_s28, 2  ;;  %s5010_s24 = scalar_lea.sflag [#allocation4], %s5009_s14 }
 0xb7d   : > { %p5574_p2 = pnand %p7792_p3, %p7791_p1 }
 0xb7f   : > { %6171 = dma.done.wait (!%p5574_p2), %s5010_s24, 512  }
 0xb80   : > { %6173 = vsyncadd (!%p5574_p2), %s5010_s24, 4294966784  ;;  %p29_p8 = scmp.ge.s32.totalorder %s6462_s18, 4   ;;  %s7793_s25 = smov %s6180_s26 }
 0xb81   : > { %s7794_s26 = smov %s6184_s27  ;;  %s7795_s27 = smov %s6473_s10 }
 0xb82   : > { %s7796_s28 = smov %s6462_s18  ;;  %31 = sbr.rel (!%p29_p8) target bundleno = 16 (0x10), region = 141 }
 0xb89   :  { %5015 = vsyncpa [#allocation3], 1 }
 0xb8a   :  { %5017 = vsyncpa [#allocation3 + $0x1], 1 }
 0xb8b   :  { %5018 = vsyncpa [#allocation6], 1 }
 0xb8c   :  { %5019 = vsyncpa [#allocation9], 1 }
 0xb8d   :  { %5020 = vsyncpa [#allocation12], 1 }
 0xb8e   :  { %5021 = vsyncpa [#allocation4], 1 }
 0xb8f   :  { %5023 = vsyncpa [#allocation4 + $0x1], 1 }

</bundles_post_ra>
